<compile_context>
chip_gen: v7x
topology: tpu7x:2x2x1
jax: 0.10.0
libtpu: 0.0.40
codegen_flags: <defaults>
</compile_context>

<pallas_src>
import jax
import jax.numpy as jnp
from jax.experimental import pallas as pl
from jax.experimental.pallas import tpu as pltpu

BN_EPS = 1e-5            # nn.BatchNorm1d default eps
KEEP_PROB = 0.8          # Dropout(0.2) keep probability


def _softplus(x):
    # F.softplus(beta=1): log(1 + exp(x)), numerically stable form.
    return jnp.logaddexp(x, 0.0)


def _softmax_rows(x):
    # Exact row softmax (dim=1), all in f32.
    m = jnp.max(x, axis=1, keepdims=True)
    e = jnp.exp(x - m)
    s = jnp.sum(e, axis=1, keepdims=True)
    return e / s


def _batchnorm_nogamma(x, beta):
    # Training-mode BatchNorm1d with weight=None: normalize with per-column batch
    # statistics (biased variance), unit scale, learned bias.
    # Shifted two-pass variance -> no catastrophic cancellation.
    mu = jnp.mean(x, axis=0, keepdims=True)
    d = x - mu
    var = jnp.mean(d * d, axis=0, keepdims=True)
    return d * jax.lax.rsqrt(var + BN_EPS) + beta


def prodlda_kernel(x_ref, w1_ref, b1_ref, w2_ref, b2_ref,
                   wml_ref, bnml_b_ref, wd_ref, bnd_b_ref,
                   eps_ref, drop_en2_ref, drop_p_ref,
                   recon_ref):
    x = x_ref[...]                                   # (B, V) f32

    # ---- Encoder --------------------------------------------------------
    # bf16 MXU operands, f32 accumulation, f32 elementwise.
    en1 = _softplus(
        jnp.dot(x.astype(jnp.bfloat16), w1_ref[...],
                preferred_element_type=jnp.float32) + b1_ref[...])
    en2 = _softplus(
        jnp.dot(en1.astype(jnp.bfloat16), w2_ref[...],
                preferred_element_type=jnp.float32) + b2_ref[...])
    en2 = en2 * drop_en2_ref[...]                    # Dropout(0.2), train mode

    # ---- Fused posterior mean / logvar heads ----------------------------
    # One (B, 2T) matmul; the following fused no-gamma BatchNorm is exactly
    # equivalent to the two separate BatchNorms (stats are per-column).
    # The pre-BN Linear biases cancel under the BatchNorm and were removed.
    ml = jnp.dot(en2.astype(jnp.bfloat16), wml_ref[...],
                 preferred_element_type=jnp.float32)
    ml = _batchnorm_nogamma(ml, bnml_b_ref[...])

    num_topic = eps_ref.shape[1]                     # T is a multiple of 128 ->
    posterior_mean = ml[:, :num_topic]               # lane-aligned split, no relayout
    posterior_logvar = ml[:, num_topic:]

    # ---- Reparameterization:  sqrt(exp(lv)) == exp(0.5 * lv) -------------
    z = posterior_mean + jnp.exp(0.5 * posterior_logvar) * eps_ref[...]

    # ---- Topic proportions ----------------------------------------------
    p = _softmax_rows(z)
    p = p * drop_p_ref[...]                          # Dropout(0.2), train mode

    # ---- Decoder (+ no-gamma BatchNorm) and softmax over vocab ----------
    dec = jnp.dot(p.astype(jnp.bfloat16), wd_ref[...],
                  preferred_element_type=jnp.float32)
    recon_ref[...] = _softmax_rows(_batchnorm_nogamma(dec, bnd_b_ref[...]))


def prodlda_forward(x, params, eps, drop_en2, drop_p):
    B, V = x.shape
    T = eps.shape[1]
    E1 = params["w1"].shape[1]
    E2 = params["w2"].shape[1]
    assert B % 8 == 0, "pad the batch to a multiple of 8 (sublane alignment)"

    args = (
        x,
        params["w1"], params["b1"], params["w2"], params["b2"],
        params["wml"], params["bn_ml_b"],
        params["wd"], params["bnd_b"],
        eps, drop_en2, drop_p,
    )

    # --- explicit VMEM budget (review item): inputs + output + f32 temporaries ---
    io_bytes = sum(int(a.size) * a.dtype.itemsize for a in args) + B * V * 4
    scratch_bytes = B * (E1 + E2 + 4 * T + 2 * V) * 4      # en1/en2/ml/z/p/dec/recon
    vmem_limit = min(128 << 20, max(32 << 20, 2 * (io_bytes + scratch_bytes)))

    # --- advisory cost estimate so XLA can overlap the call ---------------------
    flops = 2 * B * (V * E1 + E1 * E2 + E2 * 2 * T + T * V)
    transcendentals = B * (2 * E1 + 2 * E2 + 3 * T + V) + 2 * T + V
    cost = pl.CostEstimate(flops=flops, transcendentals=transcendentals,
                           bytes_accessed=io_bytes)

    # Small operands: keep everything fully VMEM-resident, no grid tiling (the
    # training-mode BatchNorms couple the whole batch, which stays in one call).
    in_specs = [pl.BlockSpec(memory_space=pltpu.MemorySpace.VMEM) for _ in args]
    out_spec = pl.BlockSpec(memory_space=pltpu.MemorySpace.VMEM)

    return pl.pallas_call(
        prodlda_kernel,
        out_shape=jax.ShapeDtypeStruct((B, V), jnp.float32),
        in_specs=in_specs,
        out_specs=out_spec,
        compiler_params=pltpu.CompilerParams(vmem_limit_bytes=int(vmem_limit)),
        cost_estimate=cost,
    )(*args)


def init_params(key, num_input, en1_units, en2_units, num_topic, init_mult=1.0):
    ks = jax.random.split(key, 5)

    def lin(k, fan_in, fan_out, with_bias=True):
        # deterministic stand-in for torch's default Linear init
        bound = 1.0 / jnp.sqrt(fan_in)
        kw, kb = jax.random.split(k)
        w = jax.random.uniform(kw, (fan_in, fan_out), jnp.float32, -bound, bound)
        if not with_bias:
            return w
        b = jax.random.uniform(kb, (1, fan_out), jnp.float32, -bound, bound)
        return w, b

    w1, b1 = lin(ks[0], num_input, en1_units)
    w2, b2 = lin(ks[1], en1_units, en2_units)
    # mean / logvar head weights, fused column-wise into (E2, 2T).
    # Their Linear biases (and the decoder Linear bias) are omitted: each is
    # immediately followed by a weight=None training-mode BatchNorm, so the
    # per-column constant shift cancels exactly.
    wm = lin(ks[2], en2_units, num_topic, with_bias=False)
    wl = lin(ks[3], en2_units, num_topic, with_bias=False)
    wml = jnp.concatenate([wm, wl], axis=1)             # (E2, 2*T)
    # decoder weight: uniform_(0, init_mult) as in the module
    wd = jax.random.uniform(ks[4], (num_topic, num_input), jnp.float32,
                            0.0, init_mult)
    # BatchNorm biases (weight=None in the module, bias initialized to 0)
    bn_ml_b = jnp.zeros((1, 2 * num_topic), jnp.float32)    # mean_bn || logvar_bn
    bnd_b = jnp.zeros((1, num_input), jnp.float32)
    # MXU operands stored in bf16 (halves weight DMA bytes, doubles MXU rate);
    # biases / BN params stay f32 (elementwise path stays f32 on all chips).
    return dict(w1=w1.astype(jnp.bfloat16), b1=b1,
                w2=w2.astype(jnp.bfloat16), b2=b2,
                wml=wml.astype(jnp.bfloat16), bn_ml_b=bn_ml_b,
                wd=wd.astype(jnp.bfloat16), bnd_b=bnd_b)


def host_dropout_mask(key, shape, keep_prob=KEEP_PROB):
    # Dropout train-mode keep mask, pre-scaled by 1/keep (matches nn.Dropout(0.2)).
    keep = jax.random.bernoulli(key, keep_prob, shape)
    return keep.astype(jnp.float32) * (1.0 / keep_prob)


if __name__ == "__main__":
    # net_arch: num_input=256 (vocab), en1_units=128, en2_units=128,
    # num_topic=128, variance=1.0, init_mult=1.0.
    # B=128 so every matmul fills the MXU's native row dimension.
    B, V, E1, E2, T = 128, 256, 128, 128, 128

    key = jax.random.PRNGKey(0)
    k_par, k_x, k_eps, k_d1, k_d2 = jax.random.split(key, 5)

    params = init_params(k_par, V, E1, E2, T)

    # Bag-of-words-like input counts
    x = jax.random.uniform(k_x, (B, V), jnp.float32, 0.0, 3.0)

    # Reparameterization noise eps ~ N(0, 1)
    eps = jax.random.normal(k_eps, (B, T), jnp.float32)

    # Host-generated Dropout(0.2) keep masks (stand-in for torch's dropout RNG)
    drop_en2 = host_dropout_mask(k_d1, (B, E2))
    drop_p = host_dropout_mask(k_d2, (B, T))

    recon = prodlda_forward(x, params, eps, drop_en2, drop_p)
    recon = jax.block_until_ready(recon)

    assert recon.shape == (B, V)
    assert bool(jnp.all(jnp.isfinite(recon)))
    # rows of recon are (exact-divide) softmax outputs -> each sums to ~1
    assert bool(jnp.allclose(jnp.sum(recon, axis=1), 1.0, atol=1e-3))

    print("KERNEL_OK")
</pallas_src>

<mosaic_0001>
module attributes {stable_mosaic.version = 11 : i64} {
  func.func @prodlda_kernel(%arg0: memref<128x256xf32, #tpu.memory_space<vmem>>, %arg1: memref<256x128xbf16, #tpu.memory_space<vmem>>, %arg2: memref<1x128xf32, #tpu.memory_space<vmem>>, %arg3: memref<128x128xbf16, #tpu.memory_space<vmem>>, %arg4: memref<1x128xf32, #tpu.memory_space<vmem>>, %arg5: memref<128x256xbf16, #tpu.memory_space<vmem>>, %arg6: memref<1x256xf32, #tpu.memory_space<vmem>>, %arg7: memref<128x256xbf16, #tpu.memory_space<vmem>>, %arg8: memref<1x256xf32, #tpu.memory_space<vmem>>, %arg9: memref<128x128xf32, #tpu.memory_space<vmem>>, %arg10: memref<128x128xf32, #tpu.memory_space<vmem>>, %arg11: memref<128x128xf32, #tpu.memory_space<vmem>>, %arg12: memref<128x256xf32, #tpu.memory_space<vmem>>) attributes {dimension_semantics = [], scalar_prefetch = 0 : i64, scratch_operands = 0 : i64, tpu.core_type = #tpu.core_type<tc>} {
    %c0 = arith.constant 0 : index
    %c0_0 = arith.constant 0 : index
    %0 = vector.load %arg0[%c0, %c0_0] : memref<128x256xf32, #tpu.memory_space<vmem>>, vector<128x256xf32>
    %1 = arith.truncf %0 : vector<128x256xf32> to vector<128x256xbf16>
    %c0_1 = arith.constant 0 : index
    %c0_2 = arith.constant 0 : index
    %2 = vector.load %arg1[%c0_1, %c0_2] : memref<256x128xbf16, #tpu.memory_space<vmem>>, vector<256x128xbf16>
    %cst = arith.constant dense<0.000000e+00> : vector<128x128xf32>
    %3 = tpu.matmul %1, %2, %cst {dimension_numbers = #tpu.dot_dimension_numbers<[1], [0], [0], [1], [0, 0, 1, 1], [], []>} : vector<128x256xbf16>, vector<256x128xbf16>, vector<128x128xf32> -> vector<128x128xf32>
    %c0_3 = arith.constant 0 : index
    %c0_4 = arith.constant 0 : index
    %4 = vector.load %arg2[%c0_3, %c0_4] : memref<1x128xf32, #tpu.memory_space<vmem>>, vector<1x128xf32>
    %5 = vector.broadcast %4 : vector<1x128xf32> to vector<128x128xf32>
    %6 = arith.addf %3, %5 : vector<128x128xf32>
    %cst_5 = arith.constant 0.000000e+00 : f32
    %7 = vector.broadcast %cst_5 : f32 to vector<128x128xf32>
    %8 = arith.maximumf %6, %7 : vector<128x128xf32>
    %9 = vector.broadcast %cst_5 : f32 to vector<128x128xf32>
    %10 = arith.subf %6, %9 : vector<128x128xf32>
    %11 = arith.cmpf one, %10, %10 : vector<128x128xf32>
    %12 = vector.broadcast %cst_5 : f32 to vector<128x128xf32>
    %13 = arith.addf %6, %12 : vector<128x128xf32>
    %14 = math.absf %10 : vector<128x128xf32>
    %cst_6 = arith.constant 0.000000e+00 : f32
    %15 = vector.broadcast %cst_6 : f32 to vector<128x128xf32>
    %16 = arith.subf %15, %14 : vector<128x128xf32>
    %17 = math.exp %16 : vector<128x128xf32>
    %18 = math.log1p %17 : vector<128x128xf32>
    %19 = arith.addf %8, %18 : vector<128x128xf32>
    %20 = arith.select %11, %13, %19 : vector<128x128xi1>, vector<128x128xf32>
    %21 = arith.truncf %20 : vector<128x128xf32> to vector<128x128xbf16>
    %c0_7 = arith.constant 0 : index
    %c0_8 = arith.constant 0 : index
    %22 = vector.load %arg3[%c0_7, %c0_8] : memref<128x128xbf16, #tpu.memory_space<vmem>>, vector<128x128xbf16>
    %cst_9 = arith.constant dense<0.000000e+00> : vector<128x128xf32>
    %23 = tpu.matmul %21, %22, %cst_9 {dimension_numbers = #tpu.dot_dimension_numbers<[1], [0], [0], [1], [0, 0, 1, 1], [], []>} : vector<128x128xbf16>, vector<128x128xbf16>, vector<128x128xf32> -> vector<128x128xf32>
    %c0_10 = arith.constant 0 : index
    %c0_11 = arith.constant 0 : index
    %24 = vector.load %arg4[%c0_10, %c0_11] : memref<1x128xf32, #tpu.memory_space<vmem>>, vector<1x128xf32>
    %25 = vector.broadcast %24 : vector<1x128xf32> to vector<128x128xf32>
    %26 = arith.addf %23, %25 : vector<128x128xf32>
    %cst_12 = arith.constant 0.000000e+00 : f32
    %27 = vector.broadcast %cst_12 : f32 to vector<128x128xf32>
    %28 = arith.maximumf %26, %27 : vector<128x128xf32>
    %29 = vector.broadcast %cst_12 : f32 to vector<128x128xf32>
    %30 = arith.subf %26, %29 : vector<128x128xf32>
    %31 = arith.cmpf one, %30, %30 : vector<128x128xf32>
    %32 = vector.broadcast %cst_12 : f32 to vector<128x128xf32>
    %33 = arith.addf %26, %32 : vector<128x128xf32>
    %34 = math.absf %30 : vector<128x128xf32>
    %cst_13 = arith.constant 0.000000e+00 : f32
    %35 = vector.broadcast %cst_13 : f32 to vector<128x128xf32>
    %36 = arith.subf %35, %34 : vector<128x128xf32>
    %37 = math.exp %36 : vector<128x128xf32>
    %38 = math.log1p %37 : vector<128x128xf32>
    %39 = arith.addf %28, %38 : vector<128x128xf32>
    %40 = arith.select %31, %33, %39 : vector<128x128xi1>, vector<128x128xf32>
    %c0_14 = arith.constant 0 : index
    %c0_15 = arith.constant 0 : index
    %41 = vector.load %arg10[%c0_14, %c0_15] : memref<128x128xf32, #tpu.memory_space<vmem>>, vector<128x128xf32>
    %42 = arith.mulf %40, %41 : vector<128x128xf32>
    %43 = arith.truncf %42 : vector<128x128xf32> to vector<128x128xbf16>
    %c0_16 = arith.constant 0 : index
    %c0_17 = arith.constant 0 : index
    %44 = vector.load %arg5[%c0_16, %c0_17] : memref<128x256xbf16, #tpu.memory_space<vmem>>, vector<128x256xbf16>
    %cst_18 = arith.constant dense<0.000000e+00> : vector<128x256xf32>
    %45 = tpu.matmul %43, %44, %cst_18 {dimension_numbers = #tpu.dot_dimension_numbers<[1], [0], [0], [1], [0, 0, 1, 1], [], []>} : vector<128x128xbf16>, vector<128x256xbf16>, vector<128x256xf32> -> vector<128x256xf32>
    %c0_19 = arith.constant 0 : index
    %c0_20 = arith.constant 0 : index
    %46 = vector.load %arg6[%c0_19, %c0_20] : memref<1x256xf32, #tpu.memory_space<vmem>>, vector<1x256xf32>
    %cst_21 = arith.constant dense<0.000000e+00> : vector<256xf32>
    %47 = vector.multi_reduction <add>, %45, %cst_21 [0] : vector<128x256xf32> to vector<256xf32>
    %48 = vector.shape_cast %47 : vector<256xf32> to vector<1x256xf32>
    %cst_22 = arith.constant 1.280000e+02 : f32
    %49 = vector.broadcast %cst_22 : f32 to vector<1x256xf32>
    %50 = arith.divf %48, %49 : vector<1x256xf32>
    %51 = vector.broadcast %50 : vector<1x256xf32> to vector<128x256xf32>
    %52 = arith.subf %45, %51 : vector<128x256xf32>
    %53 = arith.mulf %52, %52 : vector<128x256xf32>
    %cst_23 = arith.constant dense<0.000000e+00> : vector<256xf32>
    %54 = vector.multi_reduction <add>, %53, %cst_23 [0] : vector<128x256xf32> to vector<256xf32>
    %55 = vector.shape_cast %54 : vector<256xf32> to vector<1x256xf32>
    %cst_24 = arith.constant 1.280000e+02 : f32
    %56 = vector.broadcast %cst_24 : f32 to vector<1x256xf32>
    %57 = arith.divf %55, %56 : vector<1x256xf32>
    %cst_25 = arith.constant 9.99999974E-6 : f32
    %58 = vector.broadcast %cst_25 : f32 to vector<1x256xf32>
    %59 = arith.addf %57, %58 : vector<1x256xf32>
    %60 = math.rsqrt %59 : vector<1x256xf32>
    %61 = vector.broadcast %60 : vector<1x256xf32> to vector<128x256xf32>
    %62 = arith.mulf %52, %61 : vector<128x256xf32>
    %63 = vector.broadcast %46 : vector<1x256xf32> to vector<128x256xf32>
    %64 = arith.addf %62, %63 : vector<128x256xf32>
    %65 = vector.extract_strided_slice %64 {offsets = [0, 0], sizes = [128, 128], strides = [1, 1]} : vector<128x256xf32> to vector<128x128xf32>
    %66 = vector.extract_strided_slice %64 {offsets = [0, 128], sizes = [128, 128], strides = [1, 1]} : vector<128x256xf32> to vector<128x128xf32>
    %cst_26 = arith.constant 5.000000e-01 : f32
    %67 = vector.broadcast %cst_26 : f32 to vector<128x128xf32>
    %68 = arith.mulf %67, %66 : vector<128x128xf32>
    %69 = math.exp %68 : vector<128x128xf32>
    %c0_27 = arith.constant 0 : index
    %c0_28 = arith.constant 0 : index
    %70 = vector.load %arg9[%c0_27, %c0_28] : memref<128x128xf32, #tpu.memory_space<vmem>>, vector<128x128xf32>
    %71 = arith.mulf %69, %70 : vector<128x128xf32>
    %72 = arith.addf %65, %71 : vector<128x128xf32>
    %cst_29 = arith.constant dense<0xFF800000> : vector<128xf32>
    %73 = vector.multi_reduction <maximumf>, %72, %cst_29 [1] : vector<128x128xf32> to vector<128xf32>
    %74 = vector.shape_cast %73 : vector<128xf32> to vector<128x1xf32>
    %75 = vector.broadcast %74 : vector<128x1xf32> to vector<128x128xf32>
    %76 = arith.subf %72, %75 : vector<128x128xf32>
    %77 = math.exp %76 : vector<128x128xf32>
    %cst_30 = arith.constant dense<0.000000e+00> : vector<128xf32>
    %78 = vector.multi_reduction <add>, %77, %cst_30 [1] : vector<128x128xf32> to vector<128xf32>
    %79 = vector.shape_cast %78 : vector<128xf32> to vector<128x1xf32>
    %80 = vector.broadcast %79 : vector<128x1xf32> to vector<128x128xf32>
    %81 = arith.divf %77, %80 : vector<128x128xf32>
    %c0_31 = arith.constant 0 : index
    %c0_32 = arith.constant 0 : index
    %82 = vector.load %arg11[%c0_31, %c0_32] : memref<128x128xf32, #tpu.memory_space<vmem>>, vector<128x128xf32>
    %83 = arith.mulf %81, %82 : vector<128x128xf32>
    %84 = arith.truncf %83 : vector<128x128xf32> to vector<128x128xbf16>
    %c0_33 = arith.constant 0 : index
    %c0_34 = arith.constant 0 : index
    %85 = vector.load %arg7[%c0_33, %c0_34] : memref<128x256xbf16, #tpu.memory_space<vmem>>, vector<128x256xbf16>
    %cst_35 = arith.constant dense<0.000000e+00> : vector<128x256xf32>
    %86 = tpu.matmul %84, %85, %cst_35 {dimension_numbers = #tpu.dot_dimension_numbers<[1], [0], [0], [1], [0, 0, 1, 1], [], []>} : vector<128x128xbf16>, vector<128x256xbf16>, vector<128x256xf32> -> vector<128x256xf32>
    %c0_36 = arith.constant 0 : index
    %c0_37 = arith.constant 0 : index
    %87 = vector.load %arg8[%c0_36, %c0_37] : memref<1x256xf32, #tpu.memory_space<vmem>>, vector<1x256xf32>
    %cst_38 = arith.constant dense<0.000000e+00> : vector<256xf32>
    %88 = vector.multi_reduction <add>, %86, %cst_38 [0] : vector<128x256xf32> to vector<256xf32>
    %89 = vector.shape_cast %88 : vector<256xf32> to vector<1x256xf32>
    %cst_39 = arith.constant 1.280000e+02 : f32
    %90 = vector.broadcast %cst_39 : f32 to vector<1x256xf32>
    %91 = arith.divf %89, %90 : vector<1x256xf32>
    %92 = vector.broadcast %91 : vector<1x256xf32> to vector<128x256xf32>
    %93 = arith.subf %86, %92 : vector<128x256xf32>
    %94 = arith.mulf %93, %93 : vector<128x256xf32>
    %cst_40 = arith.constant dense<0.000000e+00> : vector<256xf32>
    %95 = vector.multi_reduction <add>, %94, %cst_40 [0] : vector<128x256xf32> to vector<256xf32>
    %96 = vector.shape_cast %95 : vector<256xf32> to vector<1x256xf32>
    %cst_41 = arith.constant 1.280000e+02 : f32
    %97 = vector.broadcast %cst_41 : f32 to vector<1x256xf32>
    %98 = arith.divf %96, %97 : vector<1x256xf32>
    %cst_42 = arith.constant 9.99999974E-6 : f32
    %99 = vector.broadcast %cst_42 : f32 to vector<1x256xf32>
    %100 = arith.addf %98, %99 : vector<1x256xf32>
    %101 = math.rsqrt %100 : vector<1x256xf32>
    %102 = vector.broadcast %101 : vector<1x256xf32> to vector<128x256xf32>
    %103 = arith.mulf %93, %102 : vector<128x256xf32>
    %104 = vector.broadcast %87 : vector<1x256xf32> to vector<128x256xf32>
    %105 = arith.addf %103, %104 : vector<128x256xf32>
    %cst_43 = arith.constant dense<0xFF800000> : vector<128xf32>
    %106 = vector.multi_reduction <maximumf>, %105, %cst_43 [1] : vector<128x256xf32> to vector<128xf32>
    %107 = vector.shape_cast %106 : vector<128xf32> to vector<128x1xf32>
    %108 = vector.broadcast %107 : vector<128x1xf32> to vector<128x256xf32>
    %109 = arith.subf %105, %108 : vector<128x256xf32>
    %110 = math.exp %109 : vector<128x256xf32>
    %cst_44 = arith.constant dense<0.000000e+00> : vector<128xf32>
    %111 = vector.multi_reduction <add>, %110, %cst_44 [1] : vector<128x256xf32> to vector<128xf32>
    %112 = vector.shape_cast %111 : vector<128xf32> to vector<128x1xf32>
    %113 = vector.broadcast %112 : vector<128x1xf32> to vector<128x256xf32>
    %114 = arith.divf %110, %113 : vector<128x256xf32>
    %c0_45 = arith.constant 0 : index
    %c0_46 = arith.constant 0 : index
    %115 = vector.load %arg12[%c0_45, %c0_46] : memref<128x256xf32, #tpu.memory_space<vmem>>, vector<128x256xf32>
    tpu.vector_store %arg12[%c0_45, %c0_46], %114 {strides = array<i32>} : memref<128x256xf32, #tpu.memory_space<vmem>>, vector<128x256xf32>,
    return
  }
}

</mosaic_0001>

<bundles_post_ra>
// kernel: tpu_custom_call.1
= control target key start
LH: loop header
LB: loop body
LE: loop exit
PB: predicated region body
PF: predicated region fallthrough
CT: control target
= control target key end

     0   :  { %17 = vsyncpa [#allocation3], 0  ;;  %s5342_s0 = inlined_call_operand.hbm [shape: f32[128,256], index: 0, kind: input, shape index: {}]   ;;  %s5343_s1 = inlined_call_operand.hbm [shape: bf16[256,128], index: 1, kind: input, shape index: {}]   ;;  %s5344_s2 = inlined_call_operand.vmem [shape: f32[1,128], index: 2, kind: input, shape index: {}]   ;;  %s5345_s3 = inlined_call_operand.hbm [shape: bf16[128,128], index: 3, kind: input, shape index: {}]   ;;  %s5346_s4 = inlined_call_operand.vmem [shape: f32[1,128], index: 4, kind: input, shape index: {}]   ;;  %s5347_s5 = inlined_call_operand.hbm [shape: bf16[128,256], index: 5, kind: input, shape index: {}]   ;;  %s5348_s6 = inlined_call_operand.vmem [shape: f32[1,256], index: 6, kind: input, shape index: {}]   ;;  %s5349_s7 = inlined_call_operand.hbm [shape: bf16[128,256], index: 7, kind: input, shape index: {}]   ;;  %s5350_s8 = inlined_call_operand.vmem [shape: f32[1,256], index: 8, kind: input, shape index: {}]   ;;  %s5351_s9 = inlined_call_operand.hbm [shape: f32[128,128], index: 9, kind: input, shape index: {}]   ;;  %s5352_s10 = inlined_call_operand.hbm [shape: f32[128,128], index: 10, kind: input, shape index: {}]   ;;  %s5353_s11 = inlined_call_operand.hbm [shape: f32[128,128], index: 11, kind: input, shape index: {}]   ;;  %s5354_s12 = inlined_call_operand.hbm [shape: f32[128,256], index: 12, kind: output, shape index: {}]  }
   0x1   :  { %18 = vsyncpa [#allocation6], 0 }
   0x2   :  { %19 = vsyncpa [#allocation9], 0 }
   0x3   :  { %20 = vsyncpa [#allocation12], 0 }
   0x4   :  { %21 = vsyncpa [#allocation15], 0 }
   0x5   :  { %22 = vsyncpa [#allocation4], 0  ;;  %s3492_s21 = smov [#allocation5]   ;;  %s3282_s25 = scalar_lea.hbm %s5343_s1, 2048 }
   0x6   :  { %s40_s22 = sshll.u32 %s3492_s21, 4  ;;  %p3283_p0 = scmp.ne.s32.totalorder %s5343_s1, %s3282_s25  ;;  %s41_s22 = int_to_ptr.vmem [resolvable:$true] %s40_s22 }
   0x7   :  { %p3286_p1 = scmp.lt.u32.totalorder %s3282_s25, %s5343_s1 }
   0x9   :  { %p3288_p2 = pnand %p3286_p1, %p3283_p0 }
   0xb   :  { %3291 = shalt.err (!%p3288_p2)
}
   0xc   :  { %s3292_s30 = scalar_lea.vmem %s41_s22, 2048  ;;  %p3297_p4 = scmp.lt.s32.totalorder %s41_s22, %s41_s22 }
   0xd   :  { %p3293_p3 = scmp.ne.s32.totalorder %s41_s22, %s3292_s30  ;;  %p3298_p5 = scmp.lt.s32.totalorder %s3292_s30, %s3292_s30 }
   0xf   :  { %p3299_p6 = por %p3298_p5, %p3297_p4 }
  0x11   :  { %p3300_p7 = pnand %p3299_p6, %p3293_p3 }
  0x13   :  { %3303 = shalt.err (!%p3300_p7)
}
  0x14   :  { %s3493_s13 = smov 64   ;;  %s3494_s14 = smov 4  }
  0x15   :  { %46 = dma.hbm_to_vmem [thread:$0]  %s5343_s1, 2048, %s41_s22, [#allocation6], %s3493_s13, %s3493_s13, %s3494_s14  }
  0x16   :  { %s3495_s17 = smov [#allocation8]   ;;  %s3304_s21 = scalar_lea.hbm %s5347_s5, 2048 }
  0x17   :  { %s68_s18 = sshll.u32 %s3495_s17, 4  ;;  %p3305_p8 = scmp.ne.s32.totalorder %s5347_s5, %s3304_s21  ;;  %s69_s18 = int_to_ptr.vmem [resolvable:$true] %s68_s18 }
  0x18   :  { %p3308_p9 = scmp.lt.u32.totalorder %s3304_s21, %s5347_s5 }
  0x1a   :  { %p3310_p10 = pnand %p3308_p9, %p3305_p8 }
  0x1c   :  { %3313 = shalt.err (!%p3310_p10)
}
  0x1d   :  { %s3314_s27 = scalar_lea.vmem %s69_s18, 2048  ;;  %p3319_p12 = scmp.lt.s32.totalorder %s69_s18, %s69_s18 }
  0x1e   :  { %p3315_p11 = scmp.ne.s32.totalorder %s69_s18, %s3314_s27  ;;  %p3320_p13 = scmp.lt.s32.totalorder %s3314_s27, %s3314_s27 }
  0x20   :  { %p3321_p0 = por %p3320_p13, %p3319_p12 }
  0x22   :  { %p3322_p1 = pnand %p3321_p0, %p3315_p11 }
  0x24   :  { %3325 = shalt.err (!%p3322_p1)
}
  0x25   :  { %s3496_s1 = smov 128   ;;  %s3497_s22 = smov 8  }
  0x26   :  { %74 = dma.hbm_to_vmem [thread:$0]  %s5347_s5, 2048, %s69_s18, [#allocation9], %s3496_s1, %s3496_s1, %s3497_s22  }
  0x27   :  { %s3498_s30 = smov [#allocation11]   ;;  %s3499_s16 = smov [#allocation2]  }
  0x28   :  { %s96_s15 = sshll.u32 %s3498_s30, 4  ;;  %s28_s17 = sshll.u32 %s3499_s16, 4  ;;  %s97_s15 = int_to_ptr.vmem [resolvable:$true] %s96_s15  ;;  %s3603_s17 = int_to_ptr.vmem [resolvable:$true] %s28_s17 }
  0x29   :  { %s3326_s21 = scalar_lea.hbm %s5351_s9, 2048 }
  0x2a   :  { %p3327_p2 = scmp.ne.s32.totalorder %s5351_s9, %s3326_s21  ;;  %p3330_p3 = scmp.lt.u32.totalorder %s3326_s21, %s5351_s9 }
  0x2c   :  { %p3332_p4 = pnand %p3330_p3, %p3327_p2 }
  0x2e   :  { %3335 = shalt.err (!%p3332_p4)
}
  0x2f   :  { %s3336_s5 = scalar_lea.vmem %s97_s15, 2048  ;;  %p3341_p6 = scmp.lt.s32.totalorder %s97_s15, %s97_s15 }
  0x30   :  { %p3337_p5 = scmp.ne.s32.totalorder %s97_s15, %s3336_s5  ;;  %p3342_p7 = scmp.lt.s32.totalorder %s3336_s5, %s3336_s5 }
  0x32   :  { %p3343_p8 = por %p3342_p7, %p3341_p6 }
  0x34   :  { %p3344_p9 = pnand %p3343_p8, %p3337_p5 }
  0x36   :  { %3347 = shalt.err (!%p3344_p9)
}
  0x37   :  { %102 = dma.hbm_to_vmem [thread:$0]  %s5351_s9, 2048, %s97_s15, [#allocation12], %s3496_s1, %s3496_s1, %s3497_s22  }
  0x38   :  { %s3348_s30 = scalar_lea.hbm %s5342_s0, 4096 }
  0x39   :  { %p3349_p10 = scmp.ne.s32.totalorder %s5342_s0, %s3348_s30  ;;  %p3352_p11 = scmp.lt.u32.totalorder %s3348_s30, %s5342_s0 }
  0x3b   :  { %p3354_p12 = pnand %p3352_p11, %p3349_p10 }
  0x3d   :  { %3357 = shalt.err (!%p3354_p12)
}
  0x3e   :  { %s3358_s23 = scalar_lea.vmem %s3603_s17, 4096  ;;  %p3363_p0 = scmp.lt.s32.totalorder %s3603_s17, %s3603_s17 }
  0x3f   :  { %p3359_p13 = scmp.ne.s32.totalorder %s3603_s17, %s3358_s23  ;;  %p3364_p1 = scmp.lt.s32.totalorder %s3358_s23, %s3358_s23 }
  0x41   :  { %p3365_p2 = por %p3364_p1, %p3363_p0 }
  0x43   :  { %p3366_p3 = pnand %p3365_p2, %p3359_p13 }
  0x45   :  { %3369 = shalt.err (!%p3366_p3)
}
  0x46   :  { %s3500_s9 = smov 256   ;;  %s3501_s15 = smov 16  }
  0x47   :  { %34 = dma.hbm_to_vmem [thread:$0]  %s5342_s0, 4096, %s3603_s17, [#allocation3], %s3500_s9, %s3500_s9, %s3501_s15  }
  0x48   :  { %s3502_s26 = smov [#allocation7]   ;;  %s3503_s18 = smov [#allocation10]  }
  0x49   :  { %s54_s5 = sshll.u32 %s3502_s26, 4  ;;  %s82_s27 = sshll.u32 %s3503_s18, 4  ;;  %s55_s5 = int_to_ptr.vmem [resolvable:$true] %s54_s5  ;;  %s3640_s27 = int_to_ptr.vmem [resolvable:$true] %s82_s27 }
  0x4a   :  { %s3370_s30 = scalar_lea.hbm %s5345_s3, 1024 }
  0x4b   :  { %p3371_p4 = scmp.ne.s32.totalorder %s5345_s3, %s3370_s30  ;;  %p3374_p5 = scmp.lt.u32.totalorder %s3370_s30, %s5345_s3 }
  0x4d   :  { %p3376_p6 = pnand %p3374_p5, %p3371_p4 }
  0x4f   :  { %3379 = shalt.err (!%p3376_p6)
}
  0x50   :  { %s3380_s0 = scalar_lea.vmem %s55_s5, 1024  ;;  %p3385_p8 = scmp.lt.s32.totalorder %s55_s5, %s55_s5 }
  0x51   :  { %p3381_p7 = scmp.ne.s32.totalorder %s55_s5, %s3380_s0  ;;  %p3386_p9 = scmp.lt.s32.totalorder %s3380_s0, %s3380_s0 }
  0x53   :  { %p3387_p10 = por %p3386_p9, %p3385_p8 }
  0x55   :  { %p3388_p11 = pnand %p3387_p10, %p3381_p7 }
  0x57   :  { %3391 = shalt.err (!%p3388_p11)
}
  0x58   :  { %60 = dma.hbm_to_vmem [thread:$0]  %s5345_s3, 1024, %s55_s5, [#allocation6], %s3493_s13, %s3493_s13, %s3494_s14  }
  0x59   :  { %s3392_s26 = scalar_lea.hbm %s5349_s7, 2048 }
  0x5a   :  { %p3393_p12 = scmp.ne.s32.totalorder %s5349_s7, %s3392_s26  ;;  %p3396_p13 = scmp.lt.u32.totalorder %s3392_s26, %s5349_s7 }
  0x5c   :  { %p3398_p0 = pnand %p3396_p13, %p3393_p12 }
  0x5e   :  { %3401 = shalt.err (!%p3398_p0)
}
  0x5f   :  { %s3402_s16 = scalar_lea.vmem %s3640_s27, 2048  ;;  %p3407_p2 = scmp.lt.s32.totalorder %s3640_s27, %s3640_s27 }
  0x60   :  { %p3403_p1 = scmp.ne.s32.totalorder %s3640_s27, %s3402_s16  ;;  %p3408_p3 = scmp.lt.s32.totalorder %s3402_s16, %s3402_s16 }
  0x62   :  { %p3409_p4 = por %p3408_p3, %p3407_p2 }
  0x64   :  { %p3410_p5 = pnand %p3409_p4, %p3403_p1 }
  0x66   :  { %3413 = shalt.err (!%p3410_p5)
}
  0x67   :  { %88 = dma.hbm_to_vmem [thread:$0]  %s5349_s7, 2048, %s3640_s27, [#allocation9], %s3496_s1, %s3496_s1, %s3497_s22  }
  0x68   :  { %s3504_s14 = smov [#allocation13]   ;;  %s3505_s19 = smov [#allocation14]  }
  0x69   :  { %s108_s5 = sshll.u32 %s3504_s14, 4  ;;  %s120_s20 = sshll.u32 %s3505_s19, 4  ;;  %s109_s5 = int_to_ptr.vmem [resolvable:$true] %s108_s5  ;;  %s3677_s20 = int_to_ptr.vmem [resolvable:$true] %s120_s20 }
  0x6a   :  { %s3414_s17 = scalar_lea.hbm %s5352_s10, 2048 }
  0x6b   :  { %p3415_p6 = scmp.ne.s32.totalorder %s5352_s10, %s3414_s17  ;;  %p3418_p7 = scmp.lt.u32.totalorder %s3414_s17, %s5352_s10 }
  0x6d   :  { %p3420_p8 = pnand %p3418_p7, %p3415_p6 }
  0x6f   :  { %3423 = shalt.err (!%p3420_p8)
}
  0x70   :  { %s3424_s7 = scalar_lea.vmem %s109_s5, 2048  ;;  %p3429_p10 = scmp.lt.s32.totalorder %s109_s5, %s109_s5 }
  0x71   :  { %p3425_p9 = scmp.ne.s32.totalorder %s109_s5, %s3424_s7  ;;  %p3430_p11 = scmp.lt.s32.totalorder %s3424_s7, %s3424_s7 }
  0x73   :  { %p3431_p12 = por %p3430_p11, %p3429_p10 }
  0x75   :  { %p3432_p13 = pnand %p3431_p12, %p3425_p9 }
  0x77   :  { %3435 = shalt.err (!%p3432_p13)
}
  0x78   :  { %114 = dma.hbm_to_vmem [thread:$0]  %s5352_s10, 2048, %s109_s5, [#allocation12], %s3496_s1, %s3496_s1, %s3497_s22  }
  0x79   :  { %s3436_s30 = scalar_lea.hbm %s5353_s11, 2048 }
  0x7a   :  { %p3437_p0 = scmp.ne.s32.totalorder %s5353_s11, %s3436_s30  ;;  %p3440_p1 = scmp.lt.u32.totalorder %s3436_s30, %s5353_s11 }
  0x7c   :  { %p3442_p2 = pnand %p3440_p1, %p3437_p0 }
  0x7e   :  { %3445 = shalt.err (!%p3442_p2)
}
  0x7f   :  { %s3446_s19 = scalar_lea.vmem %s3677_s20, 2048  ;;  %p3451_p4 = scmp.lt.s32.totalorder %s3677_s20, %s3677_s20 }
  0x80   :  { %p3447_p3 = scmp.ne.s32.totalorder %s3677_s20, %s3446_s19  ;;  %p3452_p5 = scmp.lt.s32.totalorder %s3446_s19, %s3446_s19 }
  0x82   :  { %p3453_p6 = por %p3452_p5, %p3451_p4 }
  0x84   :  { %p3454_p7 = pnand %p3453_p6, %p3447_p3 }
  0x86   :  { %3457 = shalt.err (!%p3454_p7)
}
  0x87   :  { %126 = dma.hbm_to_vmem [thread:$0]  %s5353_s11, 2048, %s3677_s20, [#allocation15], %s3496_s1, %s3496_s1, %s3497_s22  }
  0x88   :  { %3480 = dma.done.wait [#allocation3], 4096  }
  0x89   :  { %3481 = vsyncadd [#allocation3], 4294963200 }
  0x8a   :  { %3482 = dma.done.wait [#allocation6], 3072  }
  0x8b   :  { %3483 = vsyncadd [#allocation6], 4294964224 }
  0x8c   :  { %3484 = dma.done.wait [#allocation9], 4096  }
  0x8d   :  { %3485 = vsyncadd [#allocation9], 4294963200 }
  0x8e   :  { %3486 = dma.done.wait [#allocation12], 4096  }
  0x8f   :  { %3487 = vsyncadd [#allocation12], 4294963200 }
  0x90   :  { %3488 = dma.done.wait [#allocation15], 2048  }
  0x91   :  { %3489 = vsyncadd [#allocation15], 4294965248  ;;  %v2882_v0 = vld [vmem:[#allocation5 + $0x40] sm:$0xff]   ;;  %v2884_v2 = vld [vmem:[#allocation5 + $0x48] sm:$0xff]  }
  0x92   :  { %v2883_v1 = vld [vmem:[#allocation5] sm:$0xff]   ;;  %2738 = vmatprep.subr.bf16.mxu0 %v2882_v0  ;;  %v2885_v3 = vld [vmem:[#allocation5 + $0x8] sm:$0xff]   ;;  %v2886_v4 = vld [vmem:[#allocation5 + $0x50] sm:$0xff]  }
  0x93   :  { %2739 = vmatpush3.bf16.msra.mxu0 %v2883_v1  ;;  %v2887_v5 = vld [vmem:[#allocation5 + $0x10] sm:$0xff]   ;;  %v2888_v6 = vld [vmem:[#allocation5 + $0x58] sm:$0xff]   ;;  %v2890_v8 = vld [vmem:[#allocation5 + $0x60] sm:$0xff]  }
  0x94   :  { %2740 = vmatprep.subr.bf16.mxu0 %v2884_v2  ;;  %v2889_v7 = vld [vmem:[#allocation5 + $0x18] sm:$0xff]   ;;  %v2891_v9 = vld [vmem:[#allocation5 + $0x20] sm:$0xff]   ;;  %v2892_v10 = vld [vmem:[#allocation5 + $0x68] sm:$0xff]  }
  0x95   :  { %v153_v11 = vld [vmem:[#allocation2 + $0x8] sm:$0xff]  ;;  %v155_v12 = vld [vmem:[#allocation2 + $0x18] sm:$0xff]  ;;  %v2894_v15 = vld [vmem:[#allocation5 + $0x70] sm:$0xff]  }
  0x96   :  { %v185_v13 = vpack.c.bf16 %v155_v12, %v153_v11  ;;  %v2893_v14 = vld [vmem:[#allocation5 + $0x28] sm:$0xff]   ;;  %v2895_v16 = vld [vmem:[#allocation5 + $0x30] sm:$0xff]   ;;  %v2896_v17 = vld [vmem:[#allocation5 + $0x78] sm:$0xff]  }
  0x97   :  { %2741 = vmatpush3.bf16.msra.mxu0 %v2885_v3  ;;  %v2897_v18 = vld [vmem:[#allocation5 + $0x38] sm:$0xff]   ;;  %v152_v19 = vld [vmem:[#allocation2] sm:$0xff]  ;;  %v154_v20 = vld [vmem:[#allocation2 + $0x10] sm:$0xff] }
  0x98   :  { %2742 = vmatprep.subr.bf16.mxu0 %v2886_v4  ;;  %367 = vmatprep.mubr.bf16.mxu0 %v185_v13  ;;  %v157_v21 = vld [vmem:[#allocation2 + $0x28] sm:$0xff]  ;;  %v159_v22 = vld [vmem:[#allocation2 + $0x38] sm:$0xff]  ;;  %v184_v23 = vpack.c.bf16 %v154_v20, %v152_v19  ;;  %v156_v25 = vld [vmem:[#allocation2 + $0x20] sm:$0xff] }
  0x99   :  { %v187_v24 = vpack.c.bf16 %v159_v22, %v157_v21  ;;  %v158_v26 = vld [vmem:[#allocation2 + $0x30] sm:$0xff]  ;;  %v161_v27 = vld [vmem:[#allocation2 + $0x48] sm:$0xff]  ;;  %v163_v28 = vld [vmem:[#allocation2 + $0x58] sm:$0xff] }
  0x9a   :  { %v186_v29 = vpack.c.bf16 %v158_v26, %v156_v25  ;;  %v189_v30 = vpack.c.bf16 %v163_v28, %v161_v27  ;;  %v160_v31 = vld [vmem:[#allocation2 + $0x40] sm:$0xff]  ;;  %v162_v32 = vld [vmem:[#allocation2 + $0x50] sm:$0xff]  ;;  %v165_v33 = vld [vmem:[#allocation2 + $0x68] sm:$0xff] }
  0x9b   :  { %2743 = vmatpush3.bf16.msra.mxu0 %v2887_v5  ;;  %v167_v34 = vld [vmem:[#allocation2 + $0x78] sm:$0xff]  ;;  %v188_v35 = vpack.c.bf16 %v162_v32, %v160_v31  ;;  %v164_v37 = vld [vmem:[#allocation2 + $0x60] sm:$0xff]  ;;  %v166_v38 = vld [vmem:[#allocation2 + $0x70] sm:$0xff] }
  0x9c   :  { %2744 = vmatprep.subr.bf16.mxu0 %v2888_v6  ;;  %v191_v36 = vpack.c.bf16 %v167_v34, %v165_v33  ;;  %v169_v39 = vld [vmem:[#allocation2 + $0x88] sm:$0xff]  ;;  %v171_v40 = vld [vmem:[#allocation2 + $0x98] sm:$0xff]  ;;  %v190_v41 = vpack.c.bf16 %v166_v38, %v164_v37  ;;  %v168_v43 = vld [vmem:[#allocation2 + $0x80] sm:$0xff] }
  0x9d   :  { %v193_v42 = vpack.c.bf16 %v171_v40, %v169_v39  ;;  %v170_v44 = vld [vmem:[#allocation2 + $0x90] sm:$0xff]  ;;  %v173_v45 = vld [vmem:[#allocation2 + $0xa8] sm:$0xff]  ;;  %v175_v46 = vld [vmem:[#allocation2 + $0xb8] sm:$0xff] }
  0x9e   :  { %v192_v47 = vpack.c.bf16 %v170_v44, %v168_v43  ;;  %v195_v48 = vpack.c.bf16 %v175_v46, %v173_v45  ;;  %v172_v49 = vld [vmem:[#allocation2 + $0xa0] sm:$0xff]  ;;  %v174_v50 = vld [vmem:[#allocation2 + $0xb0] sm:$0xff]  ;;  %v177_v51 = vld [vmem:[#allocation2 + $0xc8] sm:$0xff] }
  0x9f   :  { %2745 = vmatpush3.bf16.msra.mxu0 %v2889_v7  ;;  %v179_v52 = vld [vmem:[#allocation2 + $0xd8] sm:$0xff]  ;;  %v194_v53 = vpack.c.bf16 %v174_v50, %v172_v49  ;;  %v176_v55 = vld [vmem:[#allocation2 + $0xc0] sm:$0xff]  ;;  %v178_v56 = vld [vmem:[#allocation2 + $0xd0] sm:$0xff] }
  0xa0   :  { %2746 = vmatprep.subr.bf16.mxu0 %v2890_v8  ;;  %v197_v54 = vpack.c.bf16 %v179_v52, %v177_v51  ;;  %v181_v57 = vld [vmem:[#allocation2 + $0xe8] sm:$0xff]  ;;  %v183_v58 = vld [vmem:[#allocation2 + $0xf8] sm:$0xff]  ;;  %v196_v59 = vpack.c.bf16 %v178_v56, %v176_v55  ;;  %v180_v61 = vld [vmem:[#allocation2 + $0xe0] sm:$0xff] }
  0xa1   :  { %v199_v60 = vpack.c.bf16 %v183_v58, %v181_v57  ;;  %v182_v62 = vld [vmem:[#allocation2 + $0xf0] sm:$0xff]  ;;  %v2898_v0 = vld [vmem:[#allocation7] sm:$0xff]   ;;  %v2899_v1 = vld [vmem:[#allocation7 + $0x8] sm:$0xff]  }
  0xa2   :  { %v198_v63 = vpack.c.bf16 %v182_v62, %v180_v61  ;;  %2818 = vmatprep.subr.bf16.mxu1 %v2898_v0  ;;  %v2900_v2 = vld [vmem:[#allocation7 + $0x10] sm:$0xff]   ;;  %v2901_v3 = vld [vmem:[#allocation7 + $0x18] sm:$0xff]   ;;  %v2902_v4 = vld [vmem:[#allocation7 + $0x20] sm:$0xff]  }
  0xa3   :  { %2747 = vmatpush3.bf16.msra.mxu0 %v2891_v9  ;;  %2819 = vmatpush3.bf16.msra.mxu1 %v2898_v0  ;;  %v2903_v5 = vld [vmem:[#allocation7 + $0x28] sm:$0xff]   ;;  %v2904_v6 = vld [vmem:[#allocation7 + $0x30] sm:$0xff]   ;;  %v2905_v7 = vld [vmem:[#allocation7 + $0x38] sm:$0xff]  }
  0xa4   :  { %2748 = vmatprep.subr.bf16.mxu0 %v2892_v10  ;;  %2820 = vmatprep.subr.bf16.mxu1 %v2899_v1  ;;  %v3717_v9 = vld [vmem:[%s5344_s2] ss:$0 sm:$0xff] }
  0xa7   :  { %2749 = vmatpush3.bf16.msra.mxu0 %v2893_v14  ;;  %2821 = vmatpush3.bf16.msra.mxu1 %v2899_v1 }
  0xa8   :  { %2750 = vmatprep.subr.bf16.mxu0 %v2894_v15  ;;  %2822 = vmatprep.subr.bf16.mxu1 %v2900_v2 }
  0xab   :  { %2751 = vmatpush3.bf16.msra.mxu0 %v2895_v16  ;;  %2823 = vmatpush3.bf16.msra.mxu1 %v2900_v2 }
  0xac   :  { %2752 = vmatprep.subr.bf16.mxu0 %v2896_v17  ;;  %2824 = vmatprep.subr.bf16.mxu1 %v2901_v3 }
  0xaf   :  { %2753 = vmatpush3.bf16.msra.mxu0 %v2897_v18  ;;  %2825 = vmatpush3.bf16.msra.mxu1 %v2901_v3 }
  0xb0   :  { %2826 = vmatprep.subr.bf16.mxu1 %v2902_v4 }
  0xb2   :  { %368 = vmatmul.mubr.bf16.vlgmr.msra.gmra.mrb[0].mxu0 %v184_v23 }
  0xb3   :  { %375 = vmatprep.mubr.bf16.mxu0 %v187_v24  ;;  %2827 = vmatpush3.bf16.msra.mxu1 %v2902_v4 }
  0xb4   :  { %2828 = vmatprep.subr.bf16.mxu1 %v2903_v5 }
  0xb7   :  { %2829 = vmatpush3.bf16.msra.mxu1 %v2903_v5 }
  0xb8   :  { %2830 = vmatprep.subr.bf16.mxu1 %v2904_v6 }
  0xba   :  { %376 = vmatmul.mubr.bf16.gmra.mrb[4].mxu0 %v186_v29 }
  0xbb   :  { %383 = vmatprep.mubr.bf16.mxu0 %v189_v30  ;;  %2831 = vmatpush3.bf16.msra.mxu1 %v2904_v6 }
  0xbc   :  { %2832 = vmatprep.subr.bf16.mxu1 %v2905_v7 }
  0xbf   :  { %2833 = vmatpush3.bf16.msra.mxu1 %v2905_v7 }
  0xc2   :  { %384 = vmatmul.mubr.bf16.gmra.mrb[8].mxu0 %v188_v35 }
  0xc3   :  { %391 = vmatprep.mubr.bf16.mxu0 %v191_v36 }
  0xca   :  { %392 = vmatmul.mubr.bf16.gmra.mrb[12].mxu0 %v190_v41 }
  0xcb   :  { %399 = vmatprep.mubr.bf16.mxu0 %v193_v42 }
  0xd2   :  { %400 = vmatmul.mubr.bf16.gmra.mrb[16].mxu0 %v192_v47 }
  0xd3   :  { %407 = vmatprep.mubr.bf16.mxu0 %v195_v48 }
  0xda   :  { %408 = vmatmul.mubr.bf16.gmra.mrb[20].mxu0 %v194_v53 }
  0xdb   :  { %415 = vmatprep.mubr.bf16.mxu0 %v197_v54 }
  0xe2   :  { %416 = vmatmul.mubr.bf16.gmra.mrb[24].mxu0 %v196_v59 }
  0xe3   :  { %423 = vmatprep.mubr.bf16.mxu0 %v199_v60 }
  0xea   :  { %424 = vmatmul.mubr.bf16.gmra.mrb[28].mxu0 %v198_v63 }
 0x185   :  { %v2754_v8 = vpop.f32.mrb[0].mxu0 }
 0x186   :  { %v2755_v10 = vpop.f32.mrb[1].mxu0 }
 0x187   :  { %v2756_v11 = vadd.f32 %v2755_v10, %v2754_v8  ;;  %v2757_v12 = vpop.f32.mrb[2].mxu0 }
 0x188   :  { %v2758_v13 = vpop.f32.mrb[3].mxu0 }
 0x189   :  { %v3720_v14 = vadd.f32 %v2756_v11, %v3717_v9  ;;  %v2759_v15 = vadd.f32 %v2758_v13, %v2757_v12 }
 0x18b   :  { %v480_v16 = vand.u32 2147483647, %v3720_v14  ;;  %v3724_v17 = vadd.f32 %v2759_v15, %v3717_v9  ;;  %vm448_vm2 = vcmp.ne.f32.partialorder %v3720_v14, %v3720_v14 }
 0x18d   :  { %v496_v18 = vsub.f32 0.0, %v480_v16  ;;  %v481_v19 = vand.u32 2147483647, %v3724_v17  ;;  %v2760_v20 = vpop.f32.mrb[4].mxu0  ;;  %vm449_vm1 = vcmp.ne.f32.partialorder %v3724_v17, %v3724_v17 }
 0x18e   :  { %v2761_v21 = vpop.f32.mrb[5].mxu0 }
 0x18f   :  { %v512_v22 = vmul.f32 1.442695, %v496_v18  ;;  %v497_v23 = vsub.f32 0.0, %v481_v19  ;;  %v2762_v24 = vadd.f32 %v2761_v21, %v2760_v20  ;;  %v2763_v25 = vpop.f32.mrb[6].mxu0  ;;  %v432_v19 = vmax.f32 %v3720_v14, 0.0 }
 0x190   :  { %v2764_v26 = vpop.f32.mrb[7].mxu0 }
 0x191   :  { %2954 = vpow2.f32 %v512_v22  ;;  %v514_v27 = vmul.f32 1.442695, %v497_v23  ;;  %v3728_v28 = vadd.f32 %v2762_v24, %v3717_v9  ;;  %v2765_v29 = vadd.f32 %v2764_v26, %v2763_v25 }
 0x192   :  { %v433_v24 = vmax.f32 %v3724_v17, 0.0 }
 0x193   :  { %2956 = vpow2.f32 %v514_v27  ;;  %v482_v30 = vand.u32 2147483647, %v3728_v28  ;;  %v3732_v31 = vadd.f32 %v2765_v29, %v3717_v9  ;;  %vm450_vm5 = vcmp.ne.f32.partialorder %v3728_v28, %v3728_v28 }
 0x195   :  { %v498_v32 = vsub.f32 0.0, %v482_v30  ;;  %v483_v33 = vand.u32 2147483647, %v3732_v31  ;;  %v2766_v34 = vpop.f32.mrb[8].mxu0  ;;  %vm451_vm7 = vcmp.ne.f32.partialorder %v3732_v31, %v3732_v31 }
 0x196   :  { %v2767_v35 = vpop.f32.mrb[9].mxu0 }
 0x197   :  { %v516_v36 = vmul.f32 1.442695, %v498_v32  ;;  %v499_v37 = vsub.f32 0.0, %v483_v33  ;;  %v2768_v38 = vadd.f32 %v2767_v35, %v2766_v34  ;;  %v2769_v39 = vpop.f32.mrb[10].mxu0 }
 0x198   :  { %v2770_v40 = vpop.f32.mrb[11].mxu0 }
 0x199   :  { %2958 = vpow2.f32 %v516_v36  ;;  %v518_v41 = vmul.f32 1.442695, %v499_v37  ;;  %v3736_v42 = vadd.f32 %v2768_v38, %v3717_v9  ;;  %v2771_v43 = vadd.f32 %v2770_v40, %v2769_v39 }
 0x19b   :  { %v2955_v44 = vpop.eup %2954  ;;  %2960 = vpow2.f32 %v518_v41  ;;  %v484_v45 = vand.u32 2147483647, %v3736_v42  ;;  %v3740_v46 = vadd.f32 %v2771_v43, %v3717_v9  ;;  %vm452_vm10 = vcmp.ne.f32.partialorder %v3736_v42, %v3736_v42 }
 0x19c   :  { %v544_v47 = vadd.f32 1.0, %v2955_v44  ;;  %v547_v62 = vmul.f32 -0.5, %v2955_v44  ;;  %v550_v3 = vand.u32 2147483647, %v2955_v44 }
 0x19d   :  { %v3742_v48 = vpop.eup %2956  ;;  %v500_v49 = vsub.f32 0.0, %v484_v45  ;;  %v485_v50 = vand.u32 2147483647, %v3740_v46  ;;  %v2772_v51 = vpop.f32.mrb[12].mxu0  ;;  %vm453_vm11 = vcmp.ne.f32.partialorder %v3740_v46, %v3740_v46 }
 0x19e   :  { %v2773_v52 = vpop.f32.mrb[13].mxu0  ;;  %2962 = vlog2.f32 %v544_v47  ;;  %v553_v53 = vadd.f32 1.0, %v3742_v48  ;;  %v556_v63 = vmul.f32 -0.5, %v3742_v48  ;;  %v548_v11 = vadd.f32 1.0, %v547_v62 }
 0x19f   :  { %v520_v54 = vmul.f32 1.442695, %v500_v49  ;;  %v501_v55 = vsub.f32 0.0, %v485_v50  ;;  %v2774_v56 = vadd.f32 %v2773_v52, %v2772_v51  ;;  %v2775_v57 = vpop.f32.mrb[14].mxu0  ;;  %vm3764_vm0 = vcmp.lt.f32.partialorder %v550_v3, 0.0004427343 }
 0x1a0   :  { %v2776_v58 = vpop.f32.mrb[15].mxu0  ;;  %2964 = vlog2.f32 %v553_v53  ;;  %v557_v12 = vadd.f32 1.0, %v556_v63  ;;  %v559_v29 = vand.u32 2147483647, %v3742_v48  ;;  %v549_v33 = vmul.f32 %v2955_v44, %v548_v11 }
 0x1a1   :  { %2966 = vpow2.f32 %v520_v54  ;;  %v522_v59 = vmul.f32 1.442695, %v501_v55  ;;  %v3747_v60 = vadd.f32 %v2774_v56, %v3717_v9  ;;  %v2777_v61 = vadd.f32 %v2776_v58, %v2775_v57 }
 0x1a2   :  { %v558_v34 = vmul.f32 %v3742_v48, %v557_v12  ;;  %v434_v48 = vmax.f32 %v3728_v28, 0.0  ;;  %v435_v49 = vmax.f32 %v3732_v31, 0.0  ;;  %vm560_vm3 = vcmp.lt.f32.partialorder %v559_v29, 0.0004427343 }
 0x1a3   :  { %v3750_v0 = vpop.eup %2958  ;;  %2968 = vpow2.f32 %v522_v59  ;;  %v486_v1 = vand.u32 2147483647, %v3747_v60  ;;  %v3754_v2 = vadd.f32 %v2777_v61, %v3717_v9  ;;  %vm454_vm13 = vcmp.ne.f32.partialorder %v3747_v60, %v3747_v60 }
 0x1a4   :  { %v562_v4 = vadd.f32 1.0, %v3750_v0  ;;  %v565_v20 = vmul.f32 -0.5, %v3750_v0  ;;  %v568_v35 = vand.u32 2147483647, %v3750_v0 }
 0x1a5   :  { %v3757_v5 = vpop.eup %2960  ;;  %v502_v6 = vsub.f32 0.0, %v486_v1  ;;  %v487_v7 = vand.u32 2147483647, %v3754_v2  ;;  %v2778_v8 = vpop.f32.mrb[16].mxu0  ;;  %vm455_vm14 = vcmp.ne.f32.partialorder %v3754_v2, %v3754_v2 }
 0x1a6   :  { %v2779_v10 = vpop.f32.mrb[17].mxu0  ;;  %2970 = vlog2.f32 %v562_v4  ;;  %v571_v13 = vadd.f32 1.0, %v3757_v5  ;;  %v566_v39 = vadd.f32 1.0, %v565_v20  ;;  %v574_v40 = vmul.f32 -0.5, %v3757_v5 }
 0x1a7   :  { %v524_v15 = vmul.f32 1.442695, %v502_v6  ;;  %v2780_v16 = vadd.f32 %v2779_v10, %v2778_v8  ;;  %v2781_v18 = vpop.f32.mrb[18].mxu0  ;;  %v503_v22 = vsub.f32 0.0, %v487_v7  ;;  %vm3793_vm4 = vcmp.lt.f32.partialorder %v568_v35, 0.0004427343 }
 0x1a8   :  { %v2963_v21 = vpop.eup %2962  ;;  %v2782_v23 = vpop.f32.mrb[19].mxu0  ;;  %2972 = vlog2.f32 %v571_v13  ;;  %v575_v61 = vadd.f32 1.0, %v574_v40  ;;  %v567_v1 = vmul.f32 %v3750_v0, %v566_v39  ;;  %v577_v3 = vand.u32 2147483647, %v3757_v5 }
 0x1a9   :  { %2974 = vpow2.f32 %v524_v15  ;;  %v3769_v26 = vadd.f32 %v2780_v16, %v3717_v9  ;;  %v2783_v27 = vadd.f32 %v2782_v23, %v2781_v18  ;;  %v546_v32 = vmul.f32 0.6931472, %v2963_v21 }
 0x1aa   :  { %v2965_v30 = vpop.eup %2964  ;;  %v526_v41 = vmul.f32 1.442695, %v503_v22  ;;  %v576_v20 = vmul.f32 %v3757_v5, %v575_v61  ;;  %vm578_vm6 = vcmp.lt.f32.partialorder %v577_v3, 0.0004427343 }
 0x1ab   :  { %v3778_v36 = vpop.eup %2966  ;;  %v488_v37 = vand.u32 2147483647, %v3769_v26  ;;  %v3782_v38 = vadd.f32 %v2783_v27, %v3717_v9  ;;  %v552_v43 = vsel %vm3764_vm0, %v549_v33, %v546_v32  ;;  %v555_v45 = vmul.f32 0.6931472, %v2965_v30 }
 0x1ac   :  { %v580_v44 = vadd.f32 1.0, %v3778_v36  ;;  %v688_v58 = vadd.f32 %v552_v43, %v432_v19  ;;  %v583_v10 = vmul.f32 -0.5, %v3778_v36  ;;  %v586_v43 = vand.u32 2147483647, %v3778_v36 }
 0x1ad   :  { %v3788_v47 = vpop.eup %2968  ;;  %v504_v50 = vsub.f32 0.0, %v488_v37  ;;  %v2784_v51 = vpop.f32.mrb[20].mxu0  ;;  %v489_v52 = vand.u32 2147483647, %v3782_v38  ;;  %v561_v54 = vsel %vm560_vm3, %v558_v34, %v555_v45 }
 0x1ae   :  { %v2785_v53 = vpop.f32.mrb[21].mxu0  ;;  %2976 = vlog2.f32 %v580_v44  ;;  %v689_v59 = vadd.f32 %v561_v54, %v433_v24  ;;  %v589_v4 = vadd.f32 1.0, %v3788_v47  ;;  %v704_v19 = vsel %vm448_vm2, %v3720_v14, %v688_v58 }
 0x1af   :  { %v2786_v56 = vadd.f32 %v2785_v53, %v2784_v51  ;;  %v2787_v57 = vpop.f32.mrb[22].mxu0  ;;  %2978 = vpow2.f32 %v526_v41  ;;  %v528_v6 = vmul.f32 1.442695, %v504_v50  ;;  %v505_v12 = vsub.f32 0.0, %v489_v52 }
 0x1b0   :  { %v2971_v62 = vpop.eup %2970  ;;  %v2788_v63 = vpop.f32.mrb[23].mxu0  ;;  %v705_v13 = vsel %vm449_vm1, %v3724_v17, %v689_v59  ;;  %2980 = vlog2.f32 %v589_v4  ;;  %v592_v23 = vmul.f32 -0.5, %v3788_v47  ;;  %v584_v27 = vadd.f32 1.0, %v583_v10 }
 0x1b1   :  { %v3801_v7 = vadd.f32 %v2786_v56, %v3717_v9  ;;  %v2789_v8 = vadd.f32 %v2788_v63, %v2787_v57  ;;  %v564_v0 = vmul.f32 0.6931472, %v2971_v62  ;;  %v720_v17 = vpack.c.bf16 %v705_v13, %v704_v19 }
 0x1b2   :  { %v2973_v11 = vpop.eup %2972  ;;  %2982 = vpow2.f32 %v528_v6  ;;  %v530_v29 = vmul.f32 1.442695, %v505_v12  ;;  %v593_v45 = vadd.f32 1.0, %v592_v23  ;;  %v585_v51 = vmul.f32 %v3778_v36, %v584_v27 }
 0x1b3   :  { %v3810_v15 = vpop.eup %2974  ;;  %v490_v16 = vand.u32 2147483647, %v3801_v7  ;;  %v3814_v18 = vadd.f32 %v2789_v8, %v3717_v9  ;;  %v570_v21 = vsel %vm3793_vm4, %v567_v1, %v564_v0  ;;  %v573_v22 = vmul.f32 0.6931472, %v2973_v11  ;;  %2834 = vmatprep.mubr.bf16.mxu1 %v720_v17 }
 0x1b4   :  { %v598_v5 = vadd.f32 1.0, %v3810_v15  ;;  %v690_v37 = vadd.f32 %v570_v21, %v434_v48  ;;  %v595_v52 = vand.u32 2147483647, %v3788_v47  ;;  %v436_v59 = vmax.f32 %v3736_v42, 0.0 }
 0x1b5   :  { %v491_v24 = vand.u32 2147483647, %v3814_v18  ;;  %v2790_v25 = vpop.f32.mrb[24].mxu0  ;;  %v506_v30 = vsub.f32 0.0, %v490_v16  ;;  %v579_v14 = vsel %vm578_vm6, %v576_v20, %v573_v22  ;;  %vm3846_vm8 = vcmp.lt.f32.partialorder %v586_v43, 0.0004427343 }
 0x1b6   :  { %v2791_v32 = vpop.f32.mrb[25].mxu0  ;;  %v691_v39 = vadd.f32 %v579_v14, %v435_v49  ;;  %2984 = vlog2.f32 %v598_v5  ;;  %v706_v36 = vsel %vm450_vm5, %v3728_v28, %v690_v37  ;;  %vm3854_vm9 = vcmp.lt.f32.partialorder %v595_v52, 0.0004427343  ;;  %v2911_v52 = vld [vmem:[#allocation8 + $0x14] ss:$8 sps:$4 sm:$0xff]  }
 0x1b7   :  { %v507_v33 = vsub.f32 0.0, %v491_v24  ;;  %v2792_v34 = vadd.f32 %v2791_v32, %v2790_v25  ;;  %v2793_v35 = vpop.f32.mrb[26].mxu0  ;;  %2986 = vpow2.f32 %v530_v29  ;;  %v532_v48 = vmul.f32 1.442695, %v506_v30 }
 0x1b8   :  { %v2977_v40 = vpop.eup %2976  ;;  %v2794_v41 = vpop.f32.mrb[27].mxu0  ;;  %v707_v49 = vsel %vm451_vm7, %v3732_v31, %v691_v39  ;;  %v594_v31 = vmul.f32 %v3788_v47, %v593_v45  ;;  %v601_v10 = vmul.f32 -0.5, %v3810_v15  ;;  %v437_v19 = vmax.f32 %v3740_v46, 0.0 }
 0x1b9   :  { %v3830_v44 = vadd.f32 %v2792_v34, %v3717_v9  ;;  %v2795_v50 = vadd.f32 %v2794_v41, %v2793_v35  ;;  %v3834_v53 = vpop.eup %2978  ;;  %v582_v54 = vmul.f32 0.6931472, %v2977_v40  ;;  %v534_v55 = vmul.f32 1.442695, %v507_v33 }
 0x1ba   :  { %v2981_v58 = vpop.eup %2980  ;;  %v721_v61 = vpack.c.bf16 %v707_v49, %v706_v36  ;;  %2988 = vpow2.f32 %v532_v48  ;;  %v607_v11 = vadd.f32 1.0, %v3834_v53  ;;  %v602_v29 = vadd.f32 1.0, %v601_v10 }
 0x1bb   :  { %v492_v56 = vand.u32 2147483647, %v3830_v44  ;;  %v3839_v57 = vadd.f32 %v2795_v50, %v3717_v9  ;;  %v588_v4 = vsel %vm3846_vm8, %v585_v51, %v582_v54  ;;  %v591_v8 = vmul.f32 0.6931472, %v2981_v58 }
 0x1bc   :  { %2835 = vmatmul.mubr.bf16.vlgmr.msra.gmra.mrb[0].mxu1 %v721_v61  ;;  %v3860_v47 = vpop.eup %2982  ;;  %2990 = vpow2.f32 %v534_v55  ;;  %v692_v21 = vadd.f32 %v588_v4, %v436_v59  ;;  %v610_v30 = vmul.f32 -0.5, %v3834_v53  ;;  %v604_v5 = vand.u32 2147483647, %v3810_v15 }
 0x1bd   :  { %v508_v63 = vsub.f32 0.0, %v492_v56  ;;  %v493_v1 = vand.u32 2147483647, %v3839_v57  ;;  %v2796_v3 = vpop.f32.mrb[28].mxu0  ;;  %v597_v17 = vsel %vm3854_vm9, %v594_v31, %v591_v8  ;;  %2992 = vlog2.f32 %v607_v11 }
 0x1be   :  { %v2797_v28 = vpop.f32.mrb[29].mxu0  ;;  %v693_v27 = vadd.f32 %v597_v17, %v437_v19  ;;  %v708_v34 = vsel %vm452_vm10, %v3736_v42, %v692_v21  ;;  %v616_v39 = vadd.f32 1.0, %v3860_v47  ;;  %v603_v45 = vmul.f32 %v3810_v15, %v602_v29 }
 0x1bf   :  { %v536_v12 = vmul.f32 1.442695, %v508_v63  ;;  %v509_v13 = vsub.f32 0.0, %v493_v1  ;;  %v2798_v0 = vadd.f32 %v2797_v28, %v2796_v3  ;;  %v2799_v16 = vpop.f32.mrb[30].mxu0  ;;  %vm3885_vm12 = vcmp.lt.f32.partialorder %v604_v5, 0.0004427343 }
 0x1c0   :  { %v2800_v20 = vpop.f32.mrb[31].mxu0  ;;  %v2985_v25 = vpop.eup %2984  ;;  %v709_v35 = vsel %vm453_vm11, %v3740_v46, %v693_v27  ;;  %v438_v48 = vmax.f32 %v3747_v60, 0.0  ;;  %v613_v15 = vand.u32 2147483647, %v3834_v53  ;;  %v439_v55 = vmax.f32 %v3754_v2, 0.0 }
 0x1c1   :  { %v538_v22 = vmul.f32 1.442695, %v509_v13  ;;  %v3866_v23 = vadd.f32 %v2798_v0, %v3717_v9  ;;  %v2801_v24 = vadd.f32 %v2800_v20, %v2799_v16  ;;  %2994 = vpow2.f32 %v536_v12  ;;  %v3878_v33 = vpop.eup %2986 }
 0x1c2   :  { %v600_v37 = vmul.f32 0.6931472, %v2985_v25  ;;  %v722_v43 = vpack.c.bf16 %v709_v35, %v708_v34  ;;  %v625_v42 = vadd.f32 1.0, %v3878_v33  ;;  %v619_v36 = vmul.f32 -0.5, %v3860_v47 }
 0x1c3   :  { %v494_v32 = vand.u32 2147483647, %v3866_v23  ;;  %v3875_v14 = vadd.f32 %v2801_v24, %v3717_v9  ;;  %2996 = vpow2.f32 %v538_v22  ;;  %v611_v9 = vadd.f32 1.0, %v610_v30 }
 0x1c4   :  { %2998 = vlog2.f32 %v616_v39  ;;  %2838 = vmatprep.mubr.bf16.mxu1 %v722_v43  ;;  %v3890_v46 = vpop.eup %2988  ;;  %v606_v49 = vsel %vm3885_vm12, %v603_v45, %v600_v37  ;;  %v622_v61 = vand.u32 2147483647, %v3860_v47  ;;  %vm614_vm15 = vcmp.lt.f32.partialorder %v613_v15, 0.0004427343 }
 0x1c5   :  { %v510_v40 = vsub.f32 0.0, %v494_v32  ;;  %v495_v41 = vand.u32 2147483647, %v3875_v14  ;;  %v612_v59 = vmul.f32 %v3834_v53, %v611_v9  ;;  %v694_v31 = vadd.f32 %v606_v49, %v438_v48 }
 0x1c6   :  { %v3896_v54 = vpop.eup %2990  ;;  %v634_v63 = vadd.f32 1.0, %v3890_v46  ;;  %v628_v1 = vmul.f32 -0.5, %v3878_v33  ;;  %v440_v53 = vmax.f32 %v3769_v26, 0.0  ;;  %v620_v28 = vadd.f32 1.0, %v619_v36 }
 0x1c7   :  { %v540_v50 = vmul.f32 1.442695, %v510_v40  ;;  %v511_v51 = vsub.f32 0.0, %v495_v41  ;;  %v2993_v58 = vpop.eup %2992  ;;  %v643_v3 = vadd.f32 1.0, %v3896_v54  ;;  %v441_v8 = vmax.f32 %v3782_v38, 0.0 }
 0x1c8   :  { %v609_v62 = vmul.f32 0.6931472, %v2993_v58  ;;  %v442_v10 = vmax.f32 %v3801_v7, 0.0  ;;  %v443_v13 = vmax.f32 %v3814_v18, 0.0  ;;  %v710_v0 = vsel %vm454_vm13, %v3747_v60, %v694_v31 }
 0x1c9   :  { %3000 = vpow2.f32 %v540_v50  ;;  %v542_v56 = vmul.f32 1.442695, %v511_v51  ;;  %vm3921_vm0 = vcmp.lt.f32.partialorder %v622_v61, 0.0004427343  ;;  %v637_v19 = vmul.f32 -0.5, %v3890_v46 }
 0x1ca   :  { %3002 = vlog2.f32 %v625_v42  ;;  %v615_v6 = vsel %vm614_vm15, %v612_v59, %v609_v62  ;;  %v629_v21 = vadd.f32 1.0, %v628_v1  ;;  %v646_v22 = vmul.f32 -0.5, %v3896_v54  ;;  %v2909_v42 = vld [vmem:[#allocation8 + $0x10] ss:$8 sps:$4 sm:$0xff]  }
 0x1cb   :  { %3004 = vpow2.f32 %v542_v56  ;;  %v3909_v4 = vpop.eup %2994  ;;  %v695_v11 = vadd.f32 %v615_v6, %v439_v55  ;;  %v621_v60 = vmul.f32 %v3860_v47, %v620_v28  ;;  %v631_v29 = vand.u32 2147483647, %v3878_v33 }
 0x1cc   :  { %3006 = vlog2.f32 %v634_v63  ;;  %v652_v24 = vadd.f32 1.0, %v3909_v4  ;;  %v640_v30 = vand.u32 2147483647, %v3890_v46  ;;  %v649_v32 = vand.u32 2147483647, %v3896_v54 }
 0x1cd   :  { %3008 = vlog2.f32 %v643_v3  ;;  %v3914_v12 = vpop.eup %2996  ;;  %v711_v17 = vsel %vm455_vm14, %v3754_v2, %v695_v11  ;;  %v444_v2 = vmax.f32 %v3830_v44, 0.0  ;;  %vm456_vm1 = vcmp.ne.f32.partialorder %v3769_v26, %v3769_v26 }
 0x1ce   :  { %v2999_v20 = vpop.eup %2998  ;;  %v723_v25 = vpack.c.bf16 %v711_v17, %v710_v0  ;;  %3010 = vlog2.f32 %v652_v24  ;;  %v661_v5 = vadd.f32 1.0, %v3914_v12  ;;  %v638_v35 = vadd.f32 1.0, %v637_v19 }
 0x1cf   :  { %v618_v27 = vmul.f32 0.6931472, %v2999_v20  ;;  %vm457_vm2 = vcmp.ne.f32.partialorder %v3782_v38, %v3782_v38  ;;  %v630_v39 = vmul.f32 %v3878_v33, %v629_v21  ;;  %v647_v40 = vadd.f32 1.0, %v646_v22 }
 0x1d0   :  { %2839 = vmatmul.mubr.bf16.gmra.mrb[4].mxu1 %v723_v25  ;;  %3012 = vlog2.f32 %v661_v5  ;;  %v655_v45 = vmul.f32 -0.5, %v3909_v4  ;;  %v664_v9 = vmul.f32 -0.5, %v3914_v12  ;;  %vm632_vm3 = vcmp.lt.f32.partialorder %v631_v29, 0.0004427343 }
 0x1d1   :  { %v624_v47 = vsel %vm3921_vm0, %v621_v60, %v618_v27  ;;  %vm3952_vm4 = vcmp.lt.f32.partialorder %v640_v30, 0.0004427343  ;;  %vm3956_vm5 = vcmp.lt.f32.partialorder %v649_v32, 0.0004427343  ;;  %v639_v49 = vmul.f32 %v3890_v46, %v638_v35 }
 0x1d2   :  { %v696_v51 = vadd.f32 %v624_v47, %v440_v53  ;;  %v648_v58 = vmul.f32 %v3896_v54, %v647_v40  ;;  %v658_v59 = vand.u32 2147483647, %v3909_v4  ;;  %v656_v62 = vadd.f32 1.0, %v655_v45 }
 0x1d3   :  { %v3937_v34 = vpop.eup %3000  ;;  %v665_v31 = vadd.f32 1.0, %v664_v9  ;;  %vm458_vm6 = vcmp.ne.f32.partialorder %v3801_v7, %v3801_v7  ;;  %vm459_vm7 = vcmp.ne.f32.partialorder %v3814_v18, %v3814_v18  ;;  %v445_v27 = vmax.f32 %v3839_v57, 0.0 }
 0x1d4   :  { %v3003_v37 = vpop.eup %3002  ;;  %v670_v50 = vadd.f32 1.0, %v3937_v34  ;;  %v712_v63 = vsel %vm456_vm1, %v3769_v26, %v696_v51  ;;  %v673_v54 = vmul.f32 -0.5, %v3937_v34  ;;  %v657_v0 = vmul.f32 %v3909_v4, %v656_v62  ;;  %v2906_v51 = vld [vmem:[#allocation8] ss:$8 sps:$4 sm:$0xff]  }
 0x1d5   :  { %v3947_v41 = vpop.eup %3004  ;;  %v627_v43 = vmul.f32 0.6931472, %v3003_v37  ;;  %vm659_vm8 = vcmp.lt.f32.partialorder %v658_v59, 0.0004427343  ;;  %v666_v16 = vmul.f32 %v3914_v12, %v665_v31  ;;  %v676_v21 = vand.u32 2147483647, %v3937_v34 }
 0x1d6   :  { %v3007_v33 = vpop.eup %3006  ;;  %3014 = vlog2.f32 %v670_v50  ;;  %v679_v15 = vadd.f32 1.0, %v3947_v41  ;;  %v682_v28 = vmul.f32 -0.5, %v3947_v41  ;;  %v674_v17 = vadd.f32 1.0, %v673_v54  ;;  %v2908_v50 = vld [vmem:[#allocation8 + $0x4] ss:$8 sps:$4 sm:$0xff]  }
 0x1d7   :  { %v633_v48 = vsel %vm632_vm3, %v630_v39, %v627_v43  ;;  %v3009_v55 = vpop.eup %3008  ;;  %v636_v36 = vmul.f32 0.6931472, %v3007_v33  ;;  %vm460_vm10 = vcmp.ne.f32.partialorder %v3830_v44, %v3830_v44  ;;  %vm461_vm11 = vcmp.ne.f32.partialorder %v3839_v57, %v3839_v57  ;;  %1320 = vmatprep.subr.bf16.mxu1 %v2908_v50  ;;  %v2914_v33 = vld [vmem:[#allocation8 + $0x24] ss:$8 sps:$4 sm:$0xff]   ;;  %v2929_v59 = vld [vmem:[#allocation8 + $0x74] ss:$8 sps:$4 sm:$0xff]  }
 0x1d8   :  { %v697_v56 = vadd.f32 %v633_v48, %v441_v8  ;;  %v645_v61 = vmul.f32 0.6931472, %v3009_v55  ;;  %3016 = vlog2.f32 %v679_v15  ;;  %v3011_v8 = vpop.eup %3010  ;;  %v683_v25 = vadd.f32 1.0, %v682_v28  ;;  %1321 = vmatpush1.bf16.msra.mxu1 %v2906_v51  ;;  %v2912_v48 = vld [vmem:[#allocation8 + $0x20] ss:$8 sps:$4 sm:$0xff]  }
 0x1d9   :  { %v642_v1 = vsel %vm3952_vm4, %v639_v49, %v636_v36  ;;  %v654_v11 = vmul.f32 0.6931472, %v3011_v8  ;;  %v675_v32 = vmul.f32 %v3937_v34, %v674_v17  ;;  %vm677_vm12 = vcmp.lt.f32.partialorder %v676_v21, 0.0004427343  ;;  %1322 = vmatprep.subr.bf16.mxu1 %v2911_v52  ;;  %v2917_v49 = vld [vmem:[#allocation8 + $0x34] ss:$8 sps:$4 sm:$0xff]  }
 0x1da   :  { %v713_v46 = vsel %vm457_vm2, %v3782_v38, %v697_v56  ;;  %v651_v53 = vsel %vm3956_vm5, %v648_v58, %v645_v61  ;;  %v698_v6 = vadd.f32 %v642_v1, %v442_v10  ;;  %v667_v38 = vand.u32 2147483647, %v3914_v12  ;;  %v3013_v10 = vpop.eup %3012  ;;  %v2915_v15 = vld [vmem:[#allocation8 + $0x30] ss:$8 sps:$4 sm:$0xff]   ;;  %v2923_v55 = vld [vmem:[#allocation8 + $0x54] ss:$8 sps:$4 sm:$0xff]  }
 0x1db   :  { %v724_v3 = vpack.c.bf16 %v713_v46, %v712_v63  ;;  %v699_v26 = vadd.f32 %v651_v53, %v443_v13  ;;  %v660_v24 = vsel %vm659_vm8, %v657_v0, %v654_v11  ;;  %v663_v13 = vmul.f32 0.6931472, %v3013_v10  ;;  %v2921_v56 = vld [vmem:[#allocation8 + $0x50] ss:$8 sps:$4 sm:$0xff]   ;;  %v2926_v36 = vld [vmem:[#allocation8 + $0x64] ss:$8 sps:$4 sm:$0xff]  }
 0x1dc   :  { %v714_v19 = vsel %vm458_vm6, %v3801_v7, %v698_v6  ;;  %vm668_vm9 = vcmp.lt.f32.partialorder %v667_v38, 0.0004427343  ;;  %v700_v60 = vadd.f32 %v660_v24, %v444_v2  ;;  %v685_v12 = vand.u32 2147483647, %v3947_v41  ;;  %1323 = vmatpush1.bf16.msra.mxu1 %v2909_v42  ;;  %v2924_v58 = vld [vmem:[#allocation8 + $0x60] ss:$8 sps:$4 sm:$0xff]  }
 0x1dd   :  { %2842 = vmatprep.mubr.bf16.mxu1 %v724_v3  ;;  %v715_v20 = vsel %vm459_vm7, %v3814_v18, %v699_v26  ;;  %v669_v29 = vsel %vm668_vm9, %v666_v16, %v663_v13  ;;  %v446_v7 = vmax.f32 %v3866_v23, 0.0  ;;  %v684_v2 = vmul.f32 %v3947_v41, %v683_v25  ;;  %1324 = vmatprep.subr.bf16.mxu1 %v2914_v33  ;;  %v2927_v61 = vld [vmem:[#allocation8 + $0x70] ss:$8 sps:$4 sm:$0xff]   ;;  %v4011_v31 = vld [vmem:[%s5346_s4] ss:$0 sm:$0xff] }
 0x1de   :  { %v725_v22 = vpack.c.bf16 %v715_v20, %v714_v19  ;;  %v701_v30 = vadd.f32 %v669_v29, %v445_v27  ;;  %v716_v47 = vsel %vm460_vm10, %v3830_v44, %v700_v60  ;;  %v447_v40 = vmax.f32 %v3875_v14, 0.0 }
 0x1df   :  { %vm686_vm13 = vcmp.lt.f32.partialorder %v685_v12, 0.0004427343  ;;  %vm462_vm14 = vcmp.ne.f32.partialorder %v3866_v23, %v3866_v23  ;;  %vm463_vm15 = vcmp.ne.f32.partialorder %v3875_v14, %v3875_v14  ;;  %v3506_v62 = vmov 0  }
 0x1e0   :  { %v3015_v4 = vpop.eup %3014  ;;  %2843 = vmatmul.mubr.bf16.gmra.mrb[8].mxu1 %v725_v22  ;;  %v717_v35 = vsel %vm461_vm11, %v3839_v57, %v701_v30  ;;  %2074 = vmatprep.mubr.bf16.mxu0 %v3506_v62 }
 0x1e1   :  { %v672_v18 = vmul.f32 0.6931472, %v3015_v4  ;;  %v726_v43 = vpack.c.bf16 %v717_v35, %v716_v47  ;;  %1325 = vmatpush1.bf16.msra.mxu1 %v2912_v48 }
 0x1e2   :  { %v3017_v5 = vpop.eup %3016  ;;  %1326 = vmatprep.subr.bf16.mxu1 %v2917_v49 }
 0x1e3   :  { %v678_v37 = vsel %vm677_vm12, %v675_v32, %v672_v18  ;;  %v681_v39 = vmul.f32 0.6931472, %v3017_v5  ;;  %2846 = vmatprep.mubr.bf16.mxu1 %v726_v43 }
 0x1e4   :  { %v702_v34 = vadd.f32 %v678_v37, %v446_v7 }
 0x1e5   :  { %v687_v45 = vsel %vm686_vm13, %v684_v2, %v681_v39  ;;  %1327 = vmatpush1.bf16.msra.mxu1 %v2915_v15 }
 0x1e6   :  { %v703_v9 = vadd.f32 %v687_v45, %v447_v40  ;;  %v718_v44 = vsel %vm462_vm14, %v3866_v23, %v702_v34  ;;  %v2920_v23 = vld [vmem:[#allocation8 + $0x44] ss:$8 sps:$4 sm:$0xff]  }
 0x1e7   :  { %1328 = vmatprep.subr.bf16.mxu1 %v2920_v23 }
 0x1e8   :  { %v719_v57 = vsel %vm463_vm15, %v3875_v14, %v703_v9  ;;  %v2918_v14 = vld [vmem:[#allocation8 + $0x40] ss:$8 sps:$4 sm:$0xff]  }
 0x1e9   :  { %v727_v41 = vpack.c.bf16 %v719_v57, %v718_v44  ;;  %1329 = vmatpush1.bf16.msra.mxu1 %v2918_v14 }
 0x1ea   :  { %1330 = vmatprep.subr.bf16.mxu1 %v2923_v55 }
 0x1eb   :  { %2847 = vmatmul.mubr.bf16.gmra.mrb[12].mxu1 %v727_v41 }
 0x1ec   :  { %1352 = vmatprep.mubr.bf16.mxu1 %v3506_v62 }
 0x1ed   :  { %1331 = vmatpush1.bf16.msra.mxu1 %v2921_v56 }
 0x1ee   :  { %1332 = vmatprep.subr.bf16.mxu1 %v2926_v36 }
 0x1f1   :  { %1333 = vmatpush1.bf16.msra.mxu1 %v2924_v58 }
 0x1f2   :  { %1334 = vmatprep.subr.bf16.mxu1 %v2929_v59 }
 0x1f5   :  { %1335 = vmatpush1.bf16.msra.mxu1 %v2927_v61 }
 0x28f   :  { %v2836_v63 = vpop.f32.mrb[0].mxu1 }
 0x290   :  { %v4014_v46 = vadd.f32 %v2836_v63, %v4011_v31  ;;  %v833_v1 = vpop.f32.mrb[1].mxu1 }
 0x291   :  { %v4017_v54 = vadd.f32 %v4011_v31, %v833_v1  ;;  %v2837_v3 = vpop.f32.mrb[2].mxu1 }
 0x292   :  { %v946_v53 = vand.u32 2147483647, %v4014_v46  ;;  %v4021_v6 = vadd.f32 %v2837_v3, %v4011_v31  ;;  %v836_v28 = vpop.f32.mrb[3].mxu1  ;;  %v898_v41 = vmax.f32 %v4014_v46, 0.0  ;;  %vm914_vm5 = vcmp.ne.f32.partialorder %v4014_v46, %v4014_v46 }
 0x293   :  { %v944_v8 = vand.u32 2147483647, %v4017_v54  ;;  %v4025_v26 = vadd.f32 %v4011_v31, %v836_v28  ;;  %v896_v50 = vmax.f32 %v4017_v54, 0.0  ;;  %vm912_vm1 = vcmp.ne.f32.partialorder %v4017_v54, %v4017_v54 }
 0x294   :  { %v962_v38 = vsub.f32 0.0, %v946_v53  ;;  %v947_v11 = vand.u32 2147483647, %v4021_v6  ;;  %vm915_vm9 = vcmp.ne.f32.partialorder %v4021_v6, %v4021_v6 }
 0x295   :  { %v960_v0 = vsub.f32 0.0, %v944_v8  ;;  %v945_v16 = vand.u32 2147483647, %v4025_v26  ;;  %vm913_vm3 = vcmp.ne.f32.partialorder %v4025_v26, %v4025_v26 }
 0x296   :  { %v980_v10 = vmul.f32 1.442695, %v962_v38  ;;  %v963_v19 = vsub.f32 0.0, %v947_v11 }
 0x297   :  { %v976_v20 = vmul.f32 1.442695, %v960_v0  ;;  %v961_v17 = vsub.f32 0.0, %v945_v16  ;;  %v897_v0 = vmax.f32 %v4025_v26, 0.0 }
 0x298   :  { %v982_v21 = vmul.f32 1.442695, %v963_v19 }
 0x299   :  { %3018 = vpow2.f32 %v976_v20  ;;  %v978_v22 = vmul.f32 1.442695, %v961_v17 }
 0x29a   :  { %3020 = vpow2.f32 %v980_v10 }
 0x29b   :  { %3022 = vpow2.f32 %v978_v22 }
 0x29c   :  { %3024 = vpow2.f32 %v982_v21 }
 0x2a3   :  { %v3019_v24 = vpop.eup %3018  ;;  %v2840_v27 = vpop.f32.mrb[4].mxu1 }
 0x2a4   :  { %v4029_v13 = vpop.eup %3020  ;;  %v1008_v25 = vadd.f32 1.0, %v3019_v24  ;;  %v849_v4 = vpop.f32.mrb[5].mxu1  ;;  %v1011_v32 = vmul.f32 -0.5, %v3019_v24  ;;  %v4036_v2 = vadd.f32 %v2840_v27, %v4011_v31  ;;  %v1014_v44 = vand.u32 2147483647, %v3019_v24  ;;  %v1184_v27 = vld [vmem:[#allocation13] sm:$0xff] }
 0x2a5   :  { %v3023_v60 = vpop.eup %3022  ;;  %v2841_v12 = vpop.f32.mrb[6].mxu1  ;;  %v1026_v18 = vadd.f32 1.0, %v4029_v13  ;;  %v4039_v47 = vadd.f32 %v4011_v31, %v849_v4  ;;  %v1029_v56 = vmul.f32 -0.5, %v4029_v13  ;;  %v1032_v20 = vand.u32 2147483647, %v4029_v13  ;;  %v1185_v4 = vld [vmem:[#allocation13 + $0x8] sm:$0xff] }
 0x2a6   :  { %v4031_v29 = vpop.eup %3024  ;;  %3026 = vlog2.f32 %v1008_v25  ;;  %v1017_v7 = vadd.f32 1.0, %v3023_v60  ;;  %v852_v30 = vpop.f32.mrb[7].mxu1  ;;  %v4042_v35 = vadd.f32 %v2841_v12, %v4011_v31  ;;  %v950_v37 = vand.u32 2147483647, %v4036_v2 }
 0x2a7   :  { %v1035_v5 = vadd.f32 1.0, %v4031_v29  ;;  %v1012_v39 = vadd.f32 1.0, %v1011_v32  ;;  %v1020_v40 = vmul.f32 -0.5, %v3023_v60  ;;  %v948_v43 = vand.u32 2147483647, %v4039_v47 }
 0x2a8   :  { %3028 = vlog2.f32 %v1017_v7  ;;  %v966_v34 = vsub.f32 0.0, %v950_v37  ;;  %v951_v45 = vand.u32 2147483647, %v4042_v35  ;;  %v4048_v9 = vadd.f32 %v4011_v31, %v852_v30 }
 0x2a9   :  { %3030 = vlog2.f32 %v1026_v18  ;;  %v964_v57 = vsub.f32 0.0, %v948_v43  ;;  %v1013_v33 = vmul.f32 %v3019_v24, %v1012_v39  ;;  %v1021_v48 = vadd.f32 1.0, %v1020_v40 }
 0x2aa   :  { %3032 = vlog2.f32 %v1035_v5  ;;  %v988_v51 = vmul.f32 1.442695, %v966_v34  ;;  %v967_v52 = vsub.f32 0.0, %v951_v45  ;;  %v949_v15 = vand.u32 2147483647, %v4048_v9 }
 0x2ab   :  { %v984_v49 = vmul.f32 1.442695, %v964_v57  ;;  %v1023_v14 = vand.u32 2147483647, %v3023_v60  ;;  %vm1015_vm0 = vcmp.lt.f32.partialorder %v1014_v44, 0.0004427343  ;;  %v1022_v8 = vmul.f32 %v3023_v60, %v1021_v48 }
 0x2ac   :  { %3034 = vpow2.f32 %v988_v51  ;;  %v990_v55 = vmul.f32 1.442695, %v967_v52  ;;  %v965_v36 = vsub.f32 0.0, %v949_v15  ;;  %v1038_v63 = vmul.f32 -0.5, %v4031_v29 }
 0x2ad   :  { %3036 = vpow2.f32 %v984_v49  ;;  %vm1024_vm2 = vcmp.lt.f32.partialorder %v1023_v14, 0.0004427343  ;;  %v1030_v24 = vadd.f32 1.0, %v1029_v56  ;;  %v1041_v5 = vand.u32 2147483647, %v4031_v29 }
 0x2ae   :  { %3038 = vpow2.f32 %v990_v55  ;;  %v986_v38 = vmul.f32 1.442695, %v965_v36  ;;  %v1039_v7 = vadd.f32 1.0, %v1038_v63  ;;  %vm4078_vm4 = vcmp.lt.f32.partialorder %v1032_v20, 0.0004427343 }
 0x2af   :  { %v1031_v44 = vmul.f32 %v4029_v13, %v1030_v24  ;;  %v899_v49 = vmax.f32 %v4021_v6, 0.0  ;;  %vm4097_vm6 = vcmp.lt.f32.partialorder %v1041_v5, 0.0004427343  ;;  %v902_v36 = vmax.f32 %v4036_v2, 0.0 }
 0x2b0   :  { %v3027_v42 = vpop.eup %3026  ;;  %3040 = vpow2.f32 %v986_v38  ;;  %vm918_vm12 = vcmp.ne.f32.partialorder %v4036_v2, %v4036_v2  ;;  %vm916_vm13 = vcmp.ne.f32.partialorder %v4039_v47, %v4039_v47  ;;  %vm917_vm14 = vcmp.ne.f32.partialorder %v4048_v9, %v4048_v9 }
 0x2b1   :  { %v1010_v23 = vmul.f32 0.6931472, %v3027_v42  ;;  %vm919_vm15 = vcmp.ne.f32.partialorder %v4042_v35, %v4042_v35 }
 0x2b2   :  { %v3029_v59 = vpop.eup %3028 }
 0x2b3   :  { %v2844_v58 = vpop.f32.mrb[8].mxu1  ;;  %v1016_v61 = vsel %vm1015_vm0, %v1013_v33, %v1010_v23  ;;  %v1019_v28 = vmul.f32 0.6931472, %v3029_v59  ;;  %v3031_v19 = vpop.eup %3030 }
 0x2b4   :  { %v4056_v1 = vadd.f32 %v2844_v58, %v4011_v31  ;;  %v865_v3 = vpop.f32.mrb[9].mxu1  ;;  %v1152_v53 = vadd.f32 %v1016_v61, %v896_v50  ;;  %v3033_v22 = vpop.eup %3032  ;;  %v1028_v32 = vmul.f32 0.6931472, %v3031_v19  ;;  %v900_v58 = vmax.f32 %v4039_v47, 0.0 }
 0x2b5   :  { %v2845_v11 = vpop.f32.mrb[10].mxu1  ;;  %v1025_v17 = vsel %vm1024_vm2, %v1022_v8, %v1019_v28  ;;  %v4064_v21 = vadd.f32 %v4011_v31, %v865_v3  ;;  %v1037_v40 = vmul.f32 0.6931472, %v3033_v22  ;;  %v903_v3 = vmax.f32 %v4042_v35, 0.0 }
 0x2b6   :  { %v954_v16 = vand.u32 2147483647, %v4056_v1  ;;  %v868_v10 = vpop.f32.mrb[11].mxu1  ;;  %v1168_v25 = vsel %vm912_vm1, %v4017_v54, %v1152_v53  ;;  %v1153_v60 = vadd.f32 %v1025_v17, %v897_v0  ;;  %v4071_v18 = vadd.f32 %v2845_v11, %v4011_v31  ;;  %v4075_v45 = vpop.eup %3034 }
 0x2b7   :  { %v952_v30 = vand.u32 2147483647, %v4064_v21  ;;  %v1200_v54 = vmul.f32 %v1184_v27, %v1168_v25  ;;  %v4083_v50 = vadd.f32 %v4011_v31, %v868_v10  ;;  %v4085_v51 = vpop.eup %3036  ;;  %v1062_v42 = vadd.f32 1.0, %v4075_v45 }
 0x2b8   :  { %v970_v12 = vsub.f32 0.0, %v954_v16  ;;  %v1169_v37 = vsel %vm913_vm3, %v4025_v26, %v1153_v60  ;;  %v1040_v26 = vmul.f32 %v4031_v29, %v1039_v7  ;;  %v955_v33 = vand.u32 2147483647, %v4071_v18  ;;  %v4090_v48 = vpop.eup %3038 }
 0x2b9   :  { %v1201_v43 = vmul.f32 %v1185_v4, %v1169_v37  ;;  %v968_v34 = vsub.f32 0.0, %v952_v30  ;;  %v1034_v13 = vsel %vm4078_vm4, %v1031_v44, %v1028_v32  ;;  %v1044_v29 = vadd.f32 1.0, %v4085_v51 }
 0x2ba   :  { %v996_v39 = vmul.f32 1.442695, %v970_v12  ;;  %v1043_v23 = vsel %vm4097_vm6, %v1040_v26, %v1037_v40  ;;  %v1071_v14 = vadd.f32 1.0, %v4090_v48  ;;  %v953_v59 = vand.u32 2147483647, %v4083_v50  ;;  %v3041_v63 = vpop.eup %3040 }
 0x2bb   :  { %v1216_v52 = vpack.c.bf16 %v1201_v43, %v1200_v54  ;;  %v992_v55 = vmul.f32 1.442695, %v968_v34  ;;  %v901_v53 = vmax.f32 %v4048_v9, 0.0  ;;  %v971_v28 = vsub.f32 0.0, %v955_v33 }
 0x2bc   :  { %3042 = vpow2.f32 %v996_v39  ;;  %v1154_v38 = vadd.f32 %v1034_v13, %v898_v41  ;;  %v4113_v11 = vadd.f32 %v1043_v23, %v899_v49  ;;  %v1053_v0 = vadd.f32 1.0, %v3041_v63 }
 0x2bd   :  { %3044 = vlog2.f32 %v1062_v42  ;;  %1353 = vmatmul.mubr.bf16.vlgmr.msra.gmra.mrb[16].mxu1 %v1216_v52  ;;  %v906_v16 = vmax.f32 %v4056_v1, 0.0  ;;  %v1065_v19 = vmul.f32 -0.5, %v4075_v45  ;;  %v904_v20 = vmax.f32 %v4064_v21, 0.0 }
 0x2be   :  { %v2848_v56 = vpop.f32.mrb[12].mxu1  ;;  %3046 = vlog2.f32 %v1044_v29  ;;  %1362 = vmatprep.mubr.bf16.mxu1 %v3506_v62  ;;  %v998_v17 = vmul.f32 1.442695, %v971_v28  ;;  %v1068_v22 = vand.u32 2147483647, %v4075_v45  ;;  %v1047_v24 = vmul.f32 -0.5, %v4085_v51 }
 0x2bf   :  { %v881_v61 = vpop.f32.mrb[13].mxu1  ;;  %3048 = vlog2.f32 %v1071_v14  ;;  %v969_v25 = vsub.f32 0.0, %v953_v59  ;;  %v1074_v41 = vmul.f32 -0.5, %v4090_v48  ;;  %v4122_v27 = vadd.f32 %v2848_v56, %v4011_v31  ;;  %v1188_v14 = vld [vmem:[#allocation13 + $0x20] sm:$0xff] }
 0x2c0   :  { %v2849_v8 = vpop.f32.mrb[14].mxu1  ;;  %3050 = vpow2.f32 %v992_v55  ;;  %v4125_v60 = vadd.f32 %v4011_v31, %v881_v61  ;;  %v1056_v12 = vmul.f32 -0.5, %v3041_v63  ;;  %v1066_v5 = vadd.f32 1.0, %v1065_v19 }
 0x2c1   :  { %v884_v10 = vpop.f32.mrb[15].mxu1  ;;  %3052 = vlog2.f32 %v1053_v0  ;;  %v994_v7 = vmul.f32 1.442695, %v969_v25  ;;  %v4128_v30 = vadd.f32 %v2849_v8, %v4011_v31  ;;  %v1050_v37 = vand.u32 2147483647, %v4085_v51 }
 0x2c2   :  { %3054 = vpow2.f32 %v998_v17  ;;  %v4131_v32 = vadd.f32 %v4011_v31, %v884_v10  ;;  %v4138_v54 = vsel %vm914_vm5, %v4014_v46, %v1154_v38  ;;  %vm4140_vm7 = vcmp.lt.f32.partialorder %v1068_v22, 0.0004427343 }
 0x2c3   :  { %v1048_v43 = vadd.f32 1.0, %v1047_v24  ;;  %3056 = vpow2.f32 %v994_v7  ;;  %v958_v34 = vand.u32 2147483647, %v4122_v27  ;;  %v1075_v44 = vadd.f32 1.0, %v1074_v41 }
 0x2c4   :  { %v1077_v57 = vand.u32 2147483647, %v4090_v48  ;;  %v1059_v26 = vand.u32 2147483647, %v3041_v63  ;;  %v1057_v42 = vadd.f32 1.0, %v1056_v12  ;;  %v1067_v29 = vmul.f32 %v4075_v45, %v1066_v5 }
 0x2c5   :  { %v974_v13 = vsub.f32 0.0, %v958_v34  ;;  %v956_v46 = vand.u32 2147483647, %v4125_v60  ;;  %vm4148_vm8 = vcmp.lt.f32.partialorder %v1050_v37, 0.0004427343  ;;  %v1049_v55 = vmul.f32 %v4085_v51, %v1048_v43 }
 0x2c6   :  { %v3043_v4 = vpop.eup %3042  ;;  %v959_v61 = vand.u32 2147483647, %v4128_v30  ;;  %v1076_v8 = vmul.f32 %v4090_v48, %v1075_v44  ;;  %vm4159_vm10 = vcmp.lt.f32.partialorder %v1077_v57, 0.0004427343  ;;  %vm4163_vm11 = vcmp.lt.f32.partialorder %v1059_v26, 0.0004427343 }
 0x2c7   :  { %v1098_v39 = vadd.f32 1.0, %v3043_v4  ;;  %v3045_v31 = vpop.eup %3044  ;;  %v1101_v33 = vmul.f32 -0.5, %v3043_v4  ;;  %v1004_v59 = vmul.f32 1.442695, %v974_v13  ;;  %v972_v51 = vsub.f32 0.0, %v956_v46 }
 0x2c8   :  { %v3047_v52 = vpop.eup %3046  ;;  %v1064_v15 = vmul.f32 0.6931472, %v3045_v31  ;;  %v1058_v10 = vmul.f32 %v3041_v63, %v1057_v42  ;;  %v1104_v17 = vand.u32 2147483647, %v3043_v4  ;;  %v975_v7 = vsub.f32 0.0, %v959_v61 }
 0x2c9   :  { %3058 = vlog2.f32 %v1098_v39  ;;  %v3049_v49 = vpop.eup %3048  ;;  %v1046_v23 = vmul.f32 0.6931472, %v3047_v52  ;;  %v1102_v19 = vadd.f32 1.0, %v1101_v33  ;;  %v1000_v40 = vmul.f32 1.442695, %v972_v51  ;;  %v1190_v51 = vld [vmem:[#allocation13 + $0x30] sm:$0xff] }
 0x2ca   :  { %v1073_v56 = vmul.f32 0.6931472, %v3049_v49  ;;  %v4154_v28 = vpop.eup %3050  ;;  %v1070_v48 = vsel %vm4140_vm7, %v1067_v29, %v1064_v15  ;;  %3060 = vpow2.f32 %v1004_v59  ;;  %vm4191_vm0 = vcmp.lt.f32.partialorder %v1104_v17, 0.0004427343  ;;  %v1186_v49 = vld [vmem:[#allocation13 + $0x10] sm:$0xff]  ;;  %v1187_v15 = vld [vmem:[#allocation13 + $0x18] sm:$0xff] }
 0x2cb   :  { %v3053_v0 = vpop.eup %3052  ;;  %v1080_v22 = vadd.f32 1.0, %v4154_v28  ;;  %v1052_v25 = vsel %vm4148_vm8, %v1049_v55, %v1046_v23  ;;  %v1083_v37 = vmul.f32 -0.5, %v4154_v28  ;;  %v1086_v39 = vand.u32 2147483647, %v4154_v28  ;;  %v1189_v55 = vld [vmem:[#allocation13 + $0x28] sm:$0xff] }
 0x2cc   :  { %v4168_v24 = vpop.eup %3054  ;;  %v1055_v63 = vmul.f32 0.6931472, %v3053_v0  ;;  %v1079_v41 = vsel %vm4159_vm10, %v1076_v8, %v1073_v56  ;;  %v1103_v34 = vmul.f32 %v3043_v4, %v1102_v19  ;;  %v1158_v26 = vadd.f32 %v1070_v48, %v902_v36  ;;  %v1191_v0 = vld [vmem:[#allocation13 + $0x38] sm:$0xff] }
 0x2cd   :  { %3062 = vlog2.f32 %v1080_v22  ;;  %v1107_v12 = vadd.f32 1.0, %v4168_v24  ;;  %v4189_v43 = vpop.eup %3056  ;;  %v1110_v44 = vmul.f32 -0.5, %v4168_v24  ;;  %v1156_v52 = vadd.f32 %v1052_v25, %v900_v58 }
 0x2ce   :  { %v1061_v5 = vsel %vm4163_vm11, %v1058_v10, %v1055_v63  ;;  %v1159_v42 = vadd.f32 %v1079_v41, %v903_v3  ;;  %v1089_v33 = vadd.f32 1.0, %v4189_v43  ;;  %v1006_v46 = vmul.f32 1.442695, %v975_v7 }
 0x2cf   :  { %3064 = vlog2.f32 %v1107_v12  ;;  %v1157_v4 = vadd.f32 %v1061_v5, %v901_v53  ;;  %v1084_v29 = vadd.f32 1.0, %v1083_v37  ;;  %vm4205_vm1 = vcmp.lt.f32.partialorder %v1086_v39, 0.0004427343 }
 0x2d0   :  { %3066 = vpow2.f32 %v1000_v40  ;;  %v1113_v36 = vand.u32 2147483647, %v4168_v24  ;;  %v1111_v58 = vadd.f32 1.0, %v1110_v44  ;;  %v957_v3 = vand.u32 2147483647, %v4131_v32 }
 0x2d1   :  { %3068 = vlog2.f32 %v1089_v33  ;;  %v1171_v53 = vsel %vm915_vm9, %v4021_v6, %v4113_v11  ;;  %v1092_v59 = vmul.f32 -0.5, %v4189_v43  ;;  %v1202_v61 = vmul.f32 %v1186_v49, %v4138_v54 }
 0x2d2   :  { %3070 = vpow2.f32 %v1006_v46  ;;  %v1203_v8 = vmul.f32 %v1187_v15, %v1171_v53  ;;  %v973_v45 = vsub.f32 0.0, %v957_v3  ;;  %v1172_v38 = vsel %vm916_vm13, %v4039_v47, %v1156_v52  ;;  %v1194_v15 = vld [vmem:[#allocation13 + $0x50] sm:$0xff]  ;;  %v1193_v3 = vld [vmem:[#allocation13 + $0x48] sm:$0xff] }
 0x2d3   :  { %v3059_v57 = vpop.eup %3058  ;;  %v1173_v6 = vsel %vm917_vm14, %v4048_v9, %v1157_v4  ;;  %v1174_v11 = vsel %vm918_vm12, %v4036_v2, %v1158_v26  ;;  %v1204_v19 = vmul.f32 %v1188_v14, %v1172_v38  ;;  %v1175_v47 = vsel %vm919_vm15, %v4042_v35, %v1159_v42 }
 0x2d4   :  { %v1100_v13 = vmul.f32 0.6931472, %v3059_v57  ;;  %v4232_v54 = vpop.eup %3060  ;;  %v1217_v10 = vpack.c.bf16 %v1203_v8, %v1202_v61  ;;  %v1205_v17 = vmul.f32 %v1189_v55, %v1173_v6  ;;  %v1085_v9 = vmul.f32 %v4154_v28, %v1084_v29  ;;  %v1195_v29 = vld [vmem:[#allocation13 + $0x58] sm:$0xff] }
 0x2d5   :  { %v1095_v48 = vand.u32 2147483647, %v4189_v43  ;;  %v1134_v25 = vadd.f32 1.0, %v4232_v54  ;;  %v1002_v2 = vmul.f32 1.442695, %v973_v45  ;;  %v4241_v12 = vmul.f32 %v1190_v51, %v1174_v11 }
 0x2d6   :  { %v1106_v56 = vsel %vm4191_vm0, %v1103_v34, %v1100_v13  ;;  %1363 = vmatmul.mubr.bf16.gmra.mrb[20].mxu1 %v1217_v10  ;;  %v1218_v41 = vpack.c.bf16 %v1205_v17, %v1204_v19  ;;  %v4243_v7 = vmul.f32 %v1191_v0, %v1175_v47  ;;  %v1112_v35 = vmul.f32 %v4168_v24, %v1111_v58  ;;  %v1192_v58 = vld [vmem:[#allocation13 + $0x40] sm:$0xff] }
 0x2d7   :  { %v3063_v22 = vpop.eup %3062  ;;  %v1162_v37 = vadd.f32 %v1106_v56, %v906_v16  ;;  %v1093_v39 = vadd.f32 1.0, %v1092_v59  ;;  %3072 = vlog2.f32 %v1134_v25  ;;  %1372 = vmatprep.mubr.bf16.mxu1 %v3506_v62  ;;  %vm922_vm2 = vcmp.ne.f32.partialorder %v4056_v1, %v4056_v1 }
 0x2d8   :  { %v1082_v63 = vmul.f32 0.6931472, %v3063_v22  ;;  %3074 = vpow2.f32 %v1002_v2  ;;  %v1219_v34 = vpack.c.bf16 %v4243_v7, %v4241_v12  ;;  %v907_v16 = vmax.f32 %v4071_v18, 0.0 }
 0x2d9   :  { %v3065_v5 = vpop.eup %3064  ;;  %vm1114_vm3 = vcmp.lt.f32.partialorder %v1113_v36, 0.0004427343  ;;  %v905_v26 = vmax.f32 %v4083_v50, 0.0  ;;  %v1094_v13 = vmul.f32 %v4189_v43, %v1093_v39  ;;  %v1137_v46 = vmul.f32 -0.5, %v4232_v54 }
 0x2da   :  { %v1088_v28 = vsel %vm4205_vm1, %v1085_v9, %v1082_v63  ;;  %v1109_v40 = vmul.f32 0.6931472, %v3065_v5  ;;  %v4253_v31 = vpop.eup %3066  ;;  %vm1096_vm4 = vcmp.lt.f32.partialorder %v1095_v48, 0.0004427343  ;;  %vm920_vm5 = vcmp.ne.f32.partialorder %v4064_v21, %v4064_v21 }
 0x2db   :  { %v3069_v24 = vpop.eup %3068  ;;  %v1160_v44 = vadd.f32 %v1088_v28, %v904_v20  ;;  %v1116_v52 = vadd.f32 1.0, %v4253_v31  ;;  %v1178_v20 = vsel %vm922_vm2, %v4056_v1, %v1162_v37  ;;  %vm923_vm6 = vcmp.ne.f32.partialorder %v4071_v18, %v4071_v18 }
 0x2dc   :  { %v1115_v57 = vsel %vm1114_vm3, %v1112_v35, %v1109_v40  ;;  %v3071_v42 = vpop.eup %3070  ;;  %v1091_v4 = vmul.f32 0.6931472, %v3069_v24  ;;  %vm921_vm7 = vcmp.ne.f32.partialorder %v4083_v50, %v4083_v50  ;;  %v1138_v1 = vadd.f32 1.0, %v1137_v46 }
 0x2dd   :  { %v1163_v33 = vadd.f32 %v1115_v57, %v907_v16  ;;  %3076 = vlog2.f32 %v1116_v52  ;;  %v1143_v49 = vadd.f32 1.0, %v3071_v42  ;;  %v1176_v36 = vsel %vm920_vm5, %v4064_v21, %v1160_v44  ;;  %v1199_v16 = vld [vmem:[#allocation13 + $0x78] sm:$0xff] }
 0x2de   :  { %v1097_v23 = vsel %vm1096_vm4, %v1094_v13, %v1091_v4  ;;  %1373 = vmatmul.mubr.bf16.gmra.mrb[24].mxu1 %v1218_v41  ;;  %v4277_v14 = vmul.f32 %v1194_v15, %v1178_v20  ;;  %v1140_v56 = vand.u32 2147483647, %v4232_v54  ;;  %v1146_v21 = vmul.f32 -0.5, %v3071_v42  ;;  %v1197_v15 = vld [vmem:[#allocation13 + $0x68] sm:$0xff] }
 0x2df   :  { %v1161_v43 = vadd.f32 %v1097_v23, %v905_v26  ;;  %3078 = vlog2.f32 %v1143_v49  ;;  %v1179_v53 = vsel %vm923_vm6, %v4071_v18, %v1163_v33  ;;  %1382 = vmatprep.mubr.bf16.mxu1 %v3506_v62  ;;  %v1208_v8 = vmul.f32 %v1192_v58, %v1176_v36 }
 0x2e0   :  { %v4279_v55 = vmul.f32 %v1195_v29, %v1179_v53  ;;  %v1119_v11 = vmul.f32 -0.5, %v4253_v31  ;;  %v1139_v51 = vmul.f32 %v4232_v54, %v1138_v1  ;;  %vm1141_vm8 = vcmp.lt.f32.partialorder %v1140_v56, 0.0004427343 }
 0x2e1   :  { %v1177_v59 = vsel %vm921_vm7, %v4083_v50, %v1161_v43  ;;  %v3073_v61 = vpop.eup %3072  ;;  %v1147_v17 = vadd.f32 1.0, %v1146_v21  ;;  %v910_v47 = vmax.f32 %v4122_v27, 0.0  ;;  %v1149_v9 = vand.u32 2147483647, %v3071_v42 }
 0x2e2   :  { %v1209_v45 = vmul.f32 %v1193_v3, %v1177_v59  ;;  %v1221_v18 = vpack.c.bf16 %v4279_v55, %v4277_v14  ;;  %v3075_v38 = vpop.eup %3074  ;;  %v1136_v6 = vmul.f32 0.6931472, %v3073_v61  ;;  %v1120_v22 = vadd.f32 1.0, %v1119_v11 }
 0x2e3   :  { %v1125_v0 = vadd.f32 1.0, %v3075_v38  ;;  %v1122_v48 = vand.u32 2147483647, %v4253_v31  ;;  %v1128_v54 = vmul.f32 -0.5, %v3075_v38  ;;  %v1148_v12 = vmul.f32 %v3071_v42, %v1147_v17 }
 0x2e4   :  { %v1220_v10 = vpack.c.bf16 %v1209_v45, %v1208_v8  ;;  %v1142_v19 = vsel %vm1141_vm8, %v1139_v51, %v1136_v6  ;;  %v1121_v7 = vmul.f32 %v4253_v31, %v1120_v22  ;;  %v911_v5 = vmax.f32 %v4128_v30, 0.0 }
 0x2e5   :  { %3080 = vlog2.f32 %v1125_v0  ;;  %v1166_v2 = vadd.f32 %v1142_v19, %v910_v47  ;;  %vm1150_vm9 = vcmp.lt.f32.partialorder %v1149_v9, 0.0004427343  ;;  %vm926_vm10 = vcmp.ne.f32.partialorder %v4122_v27, %v4122_v27 }
 0x2e6   :  { %1383 = vmatmul.mubr.bf16.gmra.mrb[28].mxu1 %v1219_v34  ;;  %vm1123_vm11 = vcmp.lt.f32.partialorder %v1122_v48, 0.0004427343  ;;  %v1129_v28 = vadd.f32 1.0, %v1128_v54  ;;  %v1198_v34 = vld [vmem:[#allocation13 + $0x70] sm:$0xff]  ;;  %v908_v24 = vmax.f32 %v4125_v60, 0.0  ;;  %vm927_vm12 = vcmp.ne.f32.partialorder %v4128_v30, %v4128_v30 }
 0x2e7   :  { %v3077_v50 = vpop.eup %3076  ;;  %1392 = vmatprep.mubr.bf16.mxu1 %v3506_v62  ;;  %v1182_v40 = vsel %vm926_vm10, %v4122_v27, %v1166_v2  ;;  %v1131_v31 = vand.u32 2147483647, %v3075_v38  ;;  %v909_v27 = vmax.f32 %v4131_v32, 0.0  ;;  %vm924_vm14 = vcmp.ne.f32.partialorder %v4125_v60, %v4125_v60 }
 0x2e8   :  { %v1118_v63 = vmul.f32 0.6931472, %v3077_v50  ;;  %v1214_v52 = vmul.f32 %v1198_v34, %v1182_v40  ;;  %v1130_v4 = vmul.f32 %v3075_v38, %v1129_v28  ;;  %vm925_vm15 = vcmp.ne.f32.partialorder %v4131_v32, %v4131_v32 }
 0x2e9   :  { %v3079_v25 = vpop.eup %3078  ;;  %vm1132_vm13 = vcmp.lt.f32.partialorder %v1131_v31, 0.0004427343 }
 0x2ea   :  { %v1145_v41 = vmul.f32 0.6931472, %v3079_v25  ;;  %v1124_v35 = vsel %vm1123_vm11, %v1121_v7, %v1118_v63 }
 0x2eb   :  { %v1164_v26 = vadd.f32 %v1124_v35, %v908_v24 }
 0x2ec   :  { %v1151_v37 = vsel %vm1150_vm9, %v1148_v12, %v1145_v41 }
 0x2ed   :  { %v1167_v39 = vadd.f32 %v1151_v37, %v911_v5  ;;  %v1180_v20 = vsel %vm924_vm14, %v4125_v60, %v1164_v26 }
 0x2ee   :  { %1393 = vmatmul.mubr.bf16.gmra.mrb[32].mxu1 %v1220_v10 }
 0x2ef   :  { %v1183_v44 = vsel %vm927_vm12, %v4128_v30, %v1167_v39  ;;  %v3081_v57 = vpop.eup %3080  ;;  %1402 = vmatprep.mubr.bf16.mxu1 %v3506_v62  ;;  %v1196_v30 = vld [vmem:[#allocation13 + $0x60] sm:$0xff] }
 0x2f0   :  { %v1215_v42 = vmul.f32 %v1199_v16, %v1183_v44  ;;  %v1127_v33 = vmul.f32 0.6931472, %v3081_v57  ;;  %v1212_v23 = vmul.f32 %v1196_v30, %v1180_v20 }
 0x2f2   :  { %v1223_v13 = vpack.c.bf16 %v1215_v42, %v1214_v52  ;;  %v1133_v46 = vsel %vm1132_vm13, %v1130_v4, %v1127_v33 }
 0x2f3   :  { %v1165_v49 = vadd.f32 %v1133_v46, %v909_v27 }
 0x2f5   :  { %v1181_v29 = vsel %vm925_vm15, %v4131_v32, %v1165_v49 }
 0x2f6   :  { %1403 = vmatmul.mubr.bf16.gmra.mrb[36].mxu1 %v1221_v18  ;;  %v1213_v43 = vmul.f32 %v1197_v15, %v1181_v29 }
 0x2f7   :  { %1412 = vmatprep.mubr.bf16.mxu1 %v3506_v62 }
 0x2f8   :  { %v1222_v36 = vpack.c.bf16 %v1213_v43, %v1212_v23 }
 0x2fe   :  { %1413 = vmatmul.mubr.bf16.gmra.mrb[40].mxu1 %v1222_v36 }
 0x2ff   :  { %1422 = vmatprep.mubr.bf16.mxu1 %v3506_v62 }
 0x306   :  { %1423 = vmatmul.mubr.bf16.gmra.mrb[44].mxu1 %v1223_v13 }
 0x307   :  { %2134 = vmatprep.mubr.bf16.mxu1 %v3506_v62 }
 0x390   :  { %v4310_v60 = vpop.f32.mrb[16].mxu1 }
 0x391   :  { %v4312_v58 = vpop.f32.mrb[17].mxu1 }
 0x392   :  { %v4314_v3 = vpop.f32.mrb[18].mxu1 }
 0x393   :  { %v1434_v32 = vadd.f32 %v4314_v3, %v4310_v60  ;;  %v4318_v53 = vpop.f32.mrb[19].mxu1 }
 0x394   :  { %v1455_v1 = vadd.f32 %v4318_v53, %v4312_v58 }
 0x3a9   :  { %v4322_v14 = vpop.f32.mrb[20].mxu1 }
 0x3aa   :  { %v1435_v55 = vadd.f32 %v1434_v32, %v4322_v14  ;;  %v4325_v56 = vpop.f32.mrb[21].mxu1 }
 0x3ab   :  { %v1456_v59 = vadd.f32 %v1455_v1, %v4325_v56  ;;  %v4328_v61 = vpop.f32.mrb[22].mxu1 }
 0x3ac   :  { %v1436_v21 = vadd.f32 %v1435_v55, %v4328_v61  ;;  %v4331_v8 = vpop.f32.mrb[23].mxu1 }
 0x3ad   :  { %v1457_v45 = vadd.f32 %v1456_v59, %v4331_v8 }
 0x3b1   :  { %v4334_v18 = vpop.f32.mrb[24].mxu1 }
 0x3b2   :  { %v1437_v38 = vadd.f32 %v1436_v21, %v4334_v18  ;;  %v4337_v6 = vpop.f32.mrb[25].mxu1 }
 0x3b3   :  { %v1458_v11 = vadd.f32 %v1457_v45, %v4337_v6  ;;  %v1378_v51 = vpop.f32.mrb[26].mxu1 }
 0x3b4   :  { %v1438_v0 = vadd.f32 %v1437_v38, %v1378_v51  ;;  %v4340_v10 = vpop.f32.mrb[27].mxu1 }
 0x3b5   :  { %v1459_v19 = vadd.f32 %v1458_v11, %v4340_v10 }
 0x3b9   :  { %v1384_v17 = vpop.f32.mrb[28].mxu1 }
 0x3ba   :  { %v1439_v50 = vadd.f32 %v1438_v0, %v1384_v17  ;;  %v4343_v47 = vpop.f32.mrb[29].mxu1 }
 0x3bb   :  { %v1460_v22 = vadd.f32 %v1459_v19, %v4343_v47  ;;  %v1388_v9 = vpop.f32.mrb[30].mxu1 }
 0x3bc   :  { %v1440_v48 = vadd.f32 %v1439_v50, %v1388_v9  ;;  %v4346_v25 = vpop.f32.mrb[31].mxu1 }
 0x3bd   :  { %v1461_v2 = vadd.f32 %v1460_v22, %v4346_v25 }
 0x3c1   :  { %v1394_v63 = vpop.f32.mrb[32].mxu1 }
 0x3c2   :  { %v1441_v54 = vadd.f32 %v1440_v48, %v1394_v63  ;;  %v4349_v41 = vpop.f32.mrb[33].mxu1 }
 0x3c3   :  { %v1462_v12 = vadd.f32 %v1461_v2, %v4349_v41  ;;  %v1398_v7 = vpop.f32.mrb[34].mxu1 }
 0x3c4   :  { %v1442_v5 = vadd.f32 %v1441_v54, %v1398_v7  ;;  %v4352_v37 = vpop.f32.mrb[35].mxu1 }
 0x3c5   :  { %v1463_v35 = vadd.f32 %v1462_v12, %v4352_v37 }
 0x3c9   :  { %v1404_v39 = vpop.f32.mrb[36].mxu1 }
 0x3ca   :  { %v1443_v28 = vadd.f32 %v1442_v5, %v1404_v39  ;;  %v4355_v40 = vpop.f32.mrb[37].mxu1 }
 0x3cb   :  { %v1464_v34 = vadd.f32 %v1463_v35, %v4355_v40  ;;  %v1408_v16 = vpop.f32.mrb[38].mxu1 }
 0x3cc   :  { %v1444_v24 = vadd.f32 %v1443_v28, %v1408_v16  ;;  %v4358_v31 = vpop.f32.mrb[39].mxu1 }
 0x3cd   :  { %v1465_v44 = vadd.f32 %v1464_v34, %v4358_v31 }
 0x3d1   :  { %v1414_v57 = vpop.f32.mrb[40].mxu1 }
 0x3d2   :  { %v1445_v26 = vadd.f32 %v1444_v24, %v1414_v57  ;;  %v1416_v52 = vpop.f32.mrb[41].mxu1 }
 0x3d3   :  { %v1466_v42 = vadd.f32 %v1465_v44, %v1416_v52  ;;  %v1418_v33 = vpop.f32.mrb[42].mxu1 }
 0x3d4   :  { %v1446_v4 = vadd.f32 %v1445_v26, %v1418_v33  ;;  %v1420_v27 = vpop.f32.mrb[43].mxu1 }
 0x3d5   :  { %v1467_v13 = vadd.f32 %v1466_v42, %v1420_v27 }
 0x3d9   :  { %v1424_v46 = vpop.f32.mrb[44].mxu1 }
 0x3da   :  { %v1447_v49 = vadd.f32 %v1446_v4, %v1424_v46  ;;  %v1426_v20 = vpop.f32.mrb[45].mxu1 }
 0x3db   :  { %v1468_v30 = vadd.f32 %v1467_v13, %v1426_v20  ;;  %v1428_v15 = vpop.f32.mrb[46].mxu1 }
 0x3dc   :  { %v1448_v29 = vadd.f32 %v1447_v49, %v1428_v15  ;;  %v1430_v23 = vpop.f32.mrb[47].mxu1 }
 0x3dd   :  { %v1469_v43 = vadd.f32 %v1468_v30, %v1430_v23 }
 0x3de   :  { %v1449_v36 = vrot.slane %v1448_v29, 4 }
 0x3df   :  { %v1470_v32 = vrot.slane %v1469_v43, 4 }
 0x3e0   :  { %v1450_v1 = vadd.f32 %v1449_v36, %v1448_v29 }
 0x3e1   :  { %v1471_v55 = vadd.f32 %v1470_v32, %v1469_v43 }
 0x3e2   :  { %v1451_v59 = vrot.slane %v1450_v1, 2 }
 0x3e3   :  { %v1472_v21 = vrot.slane %v1471_v55, 2 }
 0x3e4   :  { %v1452_v45 = vadd.f32 %v1451_v59, %v1450_v1 }
 0x3e5   :  { %v1473_v38 = vadd.f32 %v1472_v21, %v1471_v55 }
 0x3e6   :  { %v1453_v11 = vrot.slane %v1452_v45, 1 }
 0x3e7   :  { %v1474_v0 = vrot.slane %v1473_v38, 1 }
 0x3e8   :  { %v1454_v19 = vadd.f32 %v1453_v11, %v1452_v45 }
 0x3e9   :  { %v1475_v22 = vadd.f32 %v1474_v0, %v1473_v38 }
 0x3ea   :  { %v1477_v50 = vmul.f32 0.0078125, %v1454_v19 }
 0x3ec   :  { %v4362_v48 = vsub.f32 %v4310_v60, %v1477_v50  ;;  %v4365_v2 = vsub.f32 %v4314_v3, %v1477_v50  ;;  %v4368_v54 = vsub.f32 %v4322_v14, %v1477_v50  ;;  %v4371_v12 = vsub.f32 %v4328_v61, %v1477_v50 }
 0x3ed   :  { %v4374_v5 = vsub.f32 %v4334_v18, %v1477_v50  ;;  %v4376_v35 = vsub.f32 %v1378_v51, %v1477_v50  ;;  %v4378_v28 = vsub.f32 %v1384_v17, %v1477_v50  ;;  %v4380_v34 = vsub.f32 %v1388_v9, %v1477_v50 }
 0x3ee   :  { %v4382_v60 = vsub.f32 %v1394_v63, %v1477_v50  ;;  %v4384_v24 = vsub.f32 %v1398_v7, %v1477_v50  ;;  %v4386_v3 = vsub.f32 %v1404_v39, %v1477_v50  ;;  %v4388_v14 = vsub.f32 %v1408_v16, %v1477_v50 }
 0x3ef   :  { %v4390_v44 = vsub.f32 %v1414_v57, %v1477_v50  ;;  %v4392_v61 = vsub.f32 %v1418_v33, %v1477_v50  ;;  %v4394_v18 = vsub.f32 %v1424_v46, %v1477_v50  ;;  %v4396_v51 = vsub.f32 %v1428_v15, %v1477_v50 }
 0x3f0   :  { %v1511_v17 = vmul.f32 %v4362_v48, %v4362_v48  ;;  %v1513_v9 = vmul.f32 %v4365_v2, %v4365_v2  ;;  %v1478_v63 = vmul.f32 0.0078125, %v1475_v22  ;;  %v1515_v7 = vmul.f32 %v4368_v54, %v4368_v54 }
 0x3f1   :  { %v1517_v39 = vmul.f32 %v4371_v12, %v4371_v12  ;;  %v1527_v55 = vmul.f32 %v4382_v60, %v4382_v60  ;;  %v1529_v38 = vmul.f32 %v4384_v24, %v4384_v24  ;;  %v1531_v50 = vmul.f32 %v4386_v3, %v4386_v3 }
 0x3f2   :  { %v1543_v16 = vadd.f32 %v1513_v9, %v1511_v17  ;;  %v4407_v57 = vsub.f32 %v4312_v58, %v1478_v63  ;;  %v4410_v26 = vsub.f32 %v4318_v53, %v1478_v63  ;;  %v4413_v42 = vsub.f32 %v4325_v56, %v1478_v63 }
 0x3f3   :  { %v4416_v33 = vsub.f32 %v4331_v8, %v1478_v63  ;;  %v4419_v4 = vsub.f32 %v4337_v6, %v1478_v63  ;;  %v4422_v13 = vsub.f32 %v4340_v10, %v1478_v63  ;;  %v4425_v46 = vsub.f32 %v4343_v47, %v1478_v63 }
 0x3f4   :  { %v1544_v58 = vadd.f32 %v1543_v16, %v1515_v7  ;;  %v4428_v49 = vsub.f32 %v4346_v25, %v1478_v63  ;;  %v4431_v53 = vsub.f32 %v4349_v41, %v1478_v63  ;;  %v4434_v56 = vsub.f32 %v4352_v37, %v1478_v63 }
 0x3f5   :  { %v4437_v8 = vsub.f32 %v4355_v40, %v1478_v63  ;;  %v4440_v6 = vsub.f32 %v4358_v31, %v1478_v63  ;;  %v4442_v10 = vsub.f32 %v1416_v52, %v1478_v63  ;;  %v4444_v47 = vsub.f32 %v1420_v27, %v1478_v63 }
 0x3f6   :  { %v1519_v25 = vmul.f32 %v4374_v5, %v4374_v5  ;;  %v1545_v30 = vadd.f32 %v1544_v58, %v1517_v39  ;;  %v4448_v15 = vsub.f32 %v1426_v20, %v1478_v63  ;;  %v4450_v41 = vsub.f32 %v1430_v23, %v1478_v63 }
 0x3f7   :  { %v1512_v37 = vmul.f32 %v4407_v57, %v4407_v57  ;;  %v1514_v40 = vmul.f32 %v4410_v26, %v4410_v26  ;;  %v1521_v31 = vmul.f32 %v4376_v35, %v4376_v35  ;;  %v1523_v27 = vmul.f32 %v4378_v28, %v4378_v28 }
 0x3f8   :  { %v1546_v52 = vadd.f32 %v1545_v30, %v1519_v25  ;;  %v1516_v20 = vmul.f32 %v4413_v42, %v4413_v42  ;;  %v1525_v23 = vmul.f32 %v4380_v34, %v4380_v34  ;;  %v1518_v32 = vmul.f32 %v4416_v33, %v4416_v33 }
 0x3f9   :  { %v1564_v43 = vadd.f32 %v1514_v40, %v1512_v37  ;;  %v1520_v21 = vmul.f32 %v4419_v4, %v4419_v4  ;;  %v1522_v0 = vmul.f32 %v4422_v13, %v4422_v13  ;;  %v1524_v17 = vmul.f32 %v4425_v46, %v4425_v46 }
 0x3fa   :  { %v1547_v29 = vadd.f32 %v1546_v52, %v1521_v31  ;;  %v1533_v63 = vmul.f32 %v4388_v14, %v4388_v14  ;;  %v1526_v39 = vmul.f32 %v4428_v49, %v4428_v49  ;;  %v1535_v58 = vmul.f32 %v4390_v44, %v4390_v44 }
 0x3fb   :  { %v1565_v1 = vadd.f32 %v1564_v43, %v1516_v20  ;;  %v1528_v30 = vmul.f32 %v4431_v53, %v4431_v53  ;;  %v1537_v40 = vmul.f32 %v4392_v61, %v4392_v61  ;;  %v1530_v52 = vmul.f32 %v4434_v56, %v4434_v56 }
 0x3fc   :  { %v1548_v36 = vadd.f32 %v1547_v29, %v1523_v27  ;;  %v1539_v29 = vmul.f32 %v4394_v18, %v4394_v18  ;;  %v1532_v43 = vmul.f32 %v4437_v8, %v4437_v8 }
 0x3fd   :  { %v1566_v45 = vadd.f32 %v1565_v1, %v1518_v32  ;;  %v1534_v1 = vmul.f32 %v4440_v6, %v4440_v6 }
 0x3fe   :  { %v1549_v59 = vadd.f32 %v1548_v36, %v1525_v23  ;;  %v1541_v36 = vmul.f32 %v4396_v51, %v4396_v51 }
 0x3ff   :  { %v1567_v19 = vadd.f32 %v1566_v45, %v1520_v21  ;;  %v1536_v21 = vmul.f32 %v4442_v10, %v4442_v10 }
 0x400   :  { %v1550_v11 = vadd.f32 %v1549_v59, %v1527_v55 }
 0x401   :  { %v1568_v9 = vadd.f32 %v1567_v19, %v1522_v0 }
 0x402   :  { %v1551_v22 = vadd.f32 %v1550_v11, %v1529_v38  ;;  %v1538_v11 = vmul.f32 %v4444_v47, %v4444_v47 }
 0x403   :  { %v1569_v16 = vadd.f32 %v1568_v9, %v1524_v17  ;;  %v1542_v9 = vmul.f32 %v4450_v41, %v4450_v41 }
 0x404   :  { %v1552_v7 = vadd.f32 %v1551_v22, %v1531_v50  ;;  %v1540_v50 = vmul.f32 %v4448_v15, %v4448_v15 }
 0x405   :  { %v1570_v37 = vadd.f32 %v1569_v16, %v1526_v39 }
 0x406   :  { %v1553_v25 = vadd.f32 %v1552_v7, %v1533_v63 }
 0x407   :  { %v1571_v27 = vadd.f32 %v1570_v37, %v1528_v30 }
 0x408   :  { %v1554_v31 = vadd.f32 %v1553_v25, %v1535_v58 }
 0x409   :  { %v1572_v23 = vadd.f32 %v1571_v27, %v1530_v52 }
 0x40a   :  { %v1555_v20 = vadd.f32 %v1554_v31, %v1537_v40 }
 0x40b   :  { %v1573_v55 = vadd.f32 %v1572_v23, %v1532_v43  ;;  %v1624_v43 = vlaneseq }
 0x40c   :  { %v1556_v32 = vadd.f32 %v1555_v20, %v1539_v29 }
 0x40d   :  { %v1574_v45 = vadd.f32 %v1573_v55, %v1534_v1 }
 0x40e   :  { %v1557_v59 = vadd.f32 %v1556_v32, %v1541_v36  ;;  %v4506_v32 = vshrl.u32 %v1624_v43, 7 }
 0x40f   :  { %v1575_v0 = vadd.f32 %v1574_v45, %v1536_v21 }
 0x410   :  { %v1558_v38 = vrot.slane %v1557_v59, 4 }
 0x411   :  { %v1576_v22 = vadd.f32 %v1575_v0, %v1538_v11 }
 0x412   :  { %v1559_v19 = vadd.f32 %v1558_v38, %v1557_v59 }
 0x413   :  { %v1577_v63 = vadd.f32 %v1576_v22, %v1540_v50 }
 0x414   :  { %v1560_v17 = vrot.slane %v1559_v19, 2 }
 0x415   :  { %v1578_v39 = vadd.f32 %v1577_v63, %v1542_v9 }
 0x416   :  { %v1561_v7 = vadd.f32 %v1560_v17, %v1559_v19 }
 0x417   :  { %v1579_v58 = vrot.slane %v1578_v39, 4 }
 0x418   :  { %v1562_v16 = vrot.slane %v1561_v7, 1 }
 0x419   :  { %v1580_v30 = vadd.f32 %v1579_v58, %v1578_v39 }
 0x41a   :  { %v1563_v25 = vadd.f32 %v1562_v16, %v1561_v7 }
 0x41b   :  { %v1581_v40 = vrot.slane %v1580_v30, 2 }
 0x41c   :  { %v1585_v37 = vmul.f32 0.0078125, %v1563_v25 }
 0x41d   :  { %v1582_v52 = vadd.f32 %v1581_v40, %v1580_v30 }
 0x41e   :  { %v1587_v31 = vadd.f32 1e-05, %v1585_v37 }
 0x41f   :  { %v1583_v27 = vrot.slane %v1582_v52, 1 }
 0x420   :  { %3082 = vrsqrt.f32 %v1587_v31 }
 0x421   :  { %v1584_v29 = vadd.f32 %v1583_v27, %v1582_v52 }
 0x423   :  { %v1586_v20 = vmul.f32 0.0078125, %v1584_v29 }
 0x425   :  { %v1588_v23 = vadd.f32 1e-05, %v1586_v20 }
 0x427   :  { %3084 = vrsqrt.f32 %v1588_v23 }
 0x42a   :  { %v3083_v36 = vpop.eup %3082 }
 0x42b   :  { %v4509_v1 = vmul.f32 %v3083_v36, %v4396_v51  ;;  %v4512_v55 = vmul.f32 %v3083_v36, %v4368_v54  ;;  %v4515_v59 = vmul.f32 %v3083_v36, %v4362_v48  ;;  %v4518_v21 = vmul.f32 %v3083_v36, %v4371_v12  ;;  %v1433_v12 = vld [vmem:[%s5348_s6] sm:$0x3] }
 0x42c   :  { %v4521_v45 = vmul.f32 %v3083_v36, %v4365_v2  ;;  %v4524_v38 = vmul.f32 %v3083_v36, %v4376_v35  ;;  %v4527_v11 = vmul.f32 %v3083_v36, %v4374_v5  ;;  %v4530_v51 = vmul.f32 %v3083_v36, %v4380_v34 }
 0x42d   :  { %v4533_v54 = vmul.f32 %v3083_v36, %v4378_v28  ;;  %v1630_v48 = vsub.s32 1, %v4506_v32  ;;  %v1626_v2 = vsub.s32 0, %v4506_v32  ;;  %v4541_v35 = vmul.f32 %v3083_v36, %v4384_v24 }
 0x42e   :  { %v4544_v5 = vmul.f32 %v3083_v36, %v4382_v60  ;;  %v4547_v34 = vmul.f32 %v3083_v36, %v4388_v14  ;;  %v4550_v28 = vmul.f32 %v3083_v36, %v4386_v3  ;;  %v4553_v0 = vmul.f32 %v3083_v36, %v4392_v61 }
 0x42f   :  { %v4556_v19 = vmul.f32 %v3083_v36, %v4390_v44  ;;  %v4559_v50 = vmul.f32 %v3083_v36, %v4394_v18  ;;  %v4563_v24 = vrot.slane %v1433_v12, %v1630_v48  ;;  %v4567_v14 = vrot.slane %v1433_v12, %v1626_v2 }
 0x431   :  { %v3085_v60 = vpop.eup %3084 }
 0x432   :  { %v4570_v3 = vmul.f32 %v3085_v60, %v4442_v10  ;;  %v1618_v61 = vmul.f32 %v3085_v60, %v4444_v47  ;;  %v1620_v44 = vmul.f32 %v3085_v60, %v4448_v15  ;;  %v1622_v22 = vmul.f32 %v3085_v60, %v4450_v41 }
 0x433   :  { %v1596_v18 = vmul.f32 %v3085_v60, %v4413_v42  ;;  %v1592_v17 = vmul.f32 %v3085_v60, %v4407_v57  ;;  %v1598_v9 = vmul.f32 %v3085_v60, %v4416_v33  ;;  %v1594_v63 = vmul.f32 %v3085_v60, %v4410_v26 }
 0x434   :  { %v4580_v7 = vadd.f32 %v4563_v24, %v1620_v44  ;;  %v1665_v10 = vadd.f32 %v4563_v24, %v1622_v22  ;;  %v1602_v39 = vmul.f32 %v3085_v60, %v4422_v13  ;;  %v1600_v47 = vmul.f32 %v3085_v60, %v4419_v4 }
 0x435   :  { %v1639_v15 = vadd.f32 %v4563_v24, %v1596_v18  ;;  %v1635_v41 = vadd.f32 %v4563_v24, %v1592_v17  ;;  %v1641_v42 = vadd.f32 %v4563_v24, %v1598_v9  ;;  %v1637_v57 = vadd.f32 %v4563_v24, %v1594_v63 }
 0x436   :  { %v1681_v33 = vmul.f32 0.5, %v1665_v10  ;;  %v1645_v26 = vadd.f32 %v4563_v24, %v1602_v39  ;;  %v1643_v16 = vadd.f32 %v4563_v24, %v1600_v47  ;;  %v1606_v58 = vmul.f32 %v3085_v60, %v4428_v49 }
 0x437   :  { %v1668_v25 = vmul.f32 0.5, %v1639_v15  ;;  %v1666_v30 = vmul.f32 0.5, %v1635_v41  ;;  %v1669_v13 = vmul.f32 0.5, %v1641_v42  ;;  %v1667_v37 = vmul.f32 0.5, %v1637_v57 }
 0x438   :  { %v1712_v4 = vmul.f32 1.442695, %v1681_v33  ;;  %v1671_v40 = vmul.f32 0.5, %v1645_v26  ;;  %v1670_v31 = vmul.f32 0.5, %v1643_v16  ;;  %v1649_v52 = vadd.f32 %v4563_v24, %v1606_v58  ;;  %v1729_v26 = vld [vmem:[#allocation11 + $0x78] sm:$0xff] }
 0x439   :  { %v1686_v27 = vmul.f32 1.442695, %v1668_v25  ;;  %v1682_v29 = vmul.f32 1.442695, %v1666_v30  ;;  %v1688_v20 = vmul.f32 1.442695, %v1669_v13  ;;  %v1604_v43 = vmul.f32 %v3085_v60, %v4425_v46 }
 0x43a   :  { %3086 = vpow2.f32 %v1712_v4  ;;  %v1684_v23 = vmul.f32 1.442695, %v1667_v37  ;;  %v1692_v36 = vmul.f32 1.442695, %v1671_v40  ;;  %v1690_v12 = vmul.f32 1.442695, %v1670_v31 }
 0x43b   :  { %3088 = vpow2.f32 %v1686_v27  ;;  %v1673_v49 = vmul.f32 0.5, %v1649_v52  ;;  %v1647_v44 = vadd.f32 %v4563_v24, %v1604_v43  ;;  %v1610_v22 = vmul.f32 %v3085_v60, %v4434_v56  ;;  %v1716_v30 = vld [vmem:[#allocation11 + $0x10] sm:$0xff]  ;;  %v1714_v40 = vld [vmem:[#allocation11] sm:$0xff]  ;;  %v1717_v27 = vld [vmem:[#allocation11 + $0x18] sm:$0xff] }
 0x43c   :  { %3090 = vpow2.f32 %v1682_v29  ;;  %v1608_v18 = vmul.f32 %v3085_v60, %v4431_v53  ;;  %v1614_v17 = vmul.f32 %v3085_v60, %v4440_v6  ;;  %v1612_v9 = vmul.f32 %v3085_v60, %v4437_v8 }
 0x43d   :  { %3092 = vpow2.f32 %v1688_v20  ;;  %v1696_v63 = vmul.f32 1.442695, %v1673_v49  ;;  %v1672_v46 = vmul.f32 0.5, %v1647_v44  ;;  %v1653_v10 = vadd.f32 %v4563_v24, %v1610_v22  ;;  %v1719_v44 = vld [vmem:[#allocation11 + $0x28] sm:$0xff] }
 0x43e   :  { %3094 = vpow2.f32 %v1684_v23  ;;  %v1651_v39 = vadd.f32 %v4563_v24, %v1608_v18  ;;  %v1657_v47 = vadd.f32 %v4563_v24, %v1614_v17  ;;  %v1655_v15 = vadd.f32 %v4563_v24, %v1612_v9 }
 0x43f   :  { %3096 = vpow2.f32 %v1692_v36  ;;  %v1694_v56 = vmul.f32 1.442695, %v1672_v46  ;;  %v1675_v41 = vmul.f32 0.5, %v1653_v10  ;;  %v1661_v53 = vadd.f32 %v4563_v24, %v1618_v61  ;;  %v1715_v36 = vld [vmem:[#allocation11 + $0x8] sm:$0xff] }
 0x440   :  { %3098 = vpow2.f32 %v1690_v12  ;;  %v1674_v6 = vmul.f32 0.5, %v1651_v39  ;;  %v1677_v8 = vmul.f32 0.5, %v1657_v47  ;;  %v1676_v60 = vmul.f32 0.5, %v1655_v15  ;;  %v1721_v39 = vld [vmem:[#allocation11 + $0x38] sm:$0xff] }
 0x441   :  { %3100 = vpow2.f32 %v1696_v63  ;;  %v1700_v42 = vmul.f32 1.442695, %v1675_v41  ;;  %v1679_v57 = vmul.f32 0.5, %v1661_v53  ;;  %v1659_v33 = vadd.f32 %v4563_v24, %v4570_v3  ;;  %v1720_v41 = vld [vmem:[#allocation11 + $0x30] sm:$0xff] }
 0x442   :  { %3102 = vpow2.f32 %v1694_v56  ;;  %v1698_v16 = vmul.f32 1.442695, %v1674_v6  ;;  %v1704_v58 = vmul.f32 1.442695, %v1677_v8  ;;  %v1702_v25 = vmul.f32 1.442695, %v1676_v60 }
 0x443   :  { %3104 = vpow2.f32 %v1700_v42  ;;  %v1708_v13 = vmul.f32 1.442695, %v1679_v57  ;;  %v1678_v37 = vmul.f32 0.5, %v1659_v33  ;;  %v1680_v61 = vmul.f32 0.5, %v4580_v7  ;;  %v1723_v60 = vld [vmem:[#allocation11 + $0x48] sm:$0xff] }
 0x444   :  { %v3087_v4 = vpop.eup %3086  ;;  %3106 = vpow2.f32 %v1698_v16  ;;  %v1664_v31 = vadd.f32 %v4567_v14, %v4509_v1  ;;  %v1638_v43 = vadd.f32 %v4567_v14, %v4512_v55  ;;  %v1634_v12 = vadd.f32 %v4567_v14, %v4515_v59  ;;  %v1718_v55 = vld [vmem:[#allocation11 + $0x20] sm:$0xff] }
 0x445   :  { %v3089_v52 = vpop.eup %3088  ;;  %3108 = vpow2.f32 %v1704_v58  ;;  %v1706_v24 = vmul.f32 1.442695, %v1678_v37  ;;  %v1745_v3 = vmul.f32 %v3087_v4, %v1729_v26  ;;  %v1710_v29 = vmul.f32 1.442695, %v1680_v61 }
 0x446   :  { %v3091_v20 = vpop.eup %3090  ;;  %v1732_v23 = vmul.f32 %v3089_v52, %v1716_v30  ;;  %3110 = vpow2.f32 %v1702_v25  ;;  %v1640_v17 = vadd.f32 %v4567_v14, %v4518_v21  ;;  %v1636_v59 = vadd.f32 %v4567_v14, %v4521_v45 }
 0x447   :  { %v3093_v7 = vpop.eup %3092  ;;  %v1730_v49 = vmul.f32 %v3091_v20, %v1714_v40  ;;  %3112 = vpow2.f32 %v1708_v13  ;;  %v4613_v1 = vadd.f32 %v1745_v3, %v1664_v31  ;;  %v1644_v21 = vadd.f32 %v4567_v14, %v4524_v38  ;;  %v1722_v38 = vld [vmem:[#allocation11 + $0x40] sm:$0xff]  ;;  %v1725_v13 = vld [vmem:[#allocation11 + $0x58] sm:$0xff] }
 0x448   :  { %v3095_v22 = vpop.eup %3094  ;;  %v4615_v18 = vadd.f32 %v1732_v23, %v1638_v43  ;;  %v1733_v9 = vmul.f32 %v3093_v7, %v1717_v27  ;;  %3114 = vpow2.f32 %v1706_v24  ;;  %v1642_v45 = vadd.f32 %v4567_v14, %v4527_v11  ;;  %v1727_v27 = vld [vmem:[#allocation11 + $0x68] sm:$0xff] }
 0x449   :  { %v3097_v63 = vpop.eup %3096  ;;  %v4619_v46 = vadd.f32 %v1730_v49, %v1634_v12  ;;  %v1731_v10 = vmul.f32 %v3095_v22, %v1715_v36  ;;  %3116 = vpow2.f32 %v1710_v29  ;;  %v1648_v33 = vadd.f32 %v4567_v14, %v4530_v51  ;;  %v1724_v51 = vld [vmem:[#allocation11 + $0x50] sm:$0xff] }
 0x44a   :  { %v3099_v47 = vpop.eup %3098  ;;  %1766 = vmax.xlane.f32.xlu1 %v4615_v18  ;;  %v4624_v15 = vadd.f32 %v1733_v9, %v1640_v17  ;;  %v1735_v56 = vmul.f32 %v3097_v63, %v1719_v44  ;;  %v1646_v25 = vadd.f32 %v4567_v14, %v4533_v54  ;;  %v1652_v61 = vadd.f32 %v4567_v14, %v4541_v35  ;;  %v1726_v35 = vld [vmem:[#allocation11 + $0x60] sm:$0xff]  ;;  %v1728_v12 = vld [vmem:[#allocation11 + $0x70] sm:$0xff] }
 0x44b   :  { %v3101_v53 = vpop.eup %3100  ;;  %1762 = vmax.xlane.f32.xlu0 %v4619_v46  ;;  %v4629_v6 = vadd.f32 %v1731_v10, %v1636_v59  ;;  %v1734_v8 = vmul.f32 %v3099_v47, %v1718_v55  ;;  %v1650_v54 = vadd.f32 %v4567_v14, %v4544_v5  ;;  %v1656_v29 = vadd.f32 %v4567_v14, %v4547_v34  ;;  %v2938_v47 = vld [vmem:[#allocation10 + $0x24] ss:$8 sps:$4 sm:$0xff]  }
 0x44c   :  { %v3103_v42 = vpop.eup %3102  ;;  %v4633_v57 = vadd.f32 %v1735_v56, %v1644_v21  ;;  %v1737_v26 = vmul.f32 %v3101_v53, %v1721_v39  ;;  %v1654_v36 = vadd.f32 %v4567_v14, %v4550_v28  ;;  %v1660_v44 = vadd.f32 %v4567_v14, %v4553_v0  ;;  %v2933_v39 = vld [vmem:[#allocation10 + $0x10] ss:$8 sps:$4 sm:$0xff]   ;;  %v2936_v21 = vld [vmem:[#allocation10 + $0x20] ss:$8 sps:$4 sm:$0xff]   ;;  %v2941_v56 = vld [vmem:[#allocation10 + $0x34] ss:$8 sps:$4 sm:$0xff]  }
 0x44d   :  { %v3105_v16 = vpop.eup %3104  ;;  %v4637_v58 = vadd.f32 %v1734_v8, %v1642_v45  ;;  %v1736_v30 = vmul.f32 %v3103_v42, %v1720_v41  ;;  %v1658_v9 = vadd.f32 %v4567_v14, %v4556_v19  ;;  %v1662_v63 = vadd.f32 %v4567_v14, %v4559_v50  ;;  %v2930_v19 = vld [vmem:[#allocation10] ss:$8 sps:$4 sm:$0xff]   ;;  %v2932_v50 = vld [vmem:[#allocation10 + $0x4] ss:$8 sps:$4 sm:$0xff]   ;;  %v2935_v14 = vld [vmem:[#allocation10 + $0x14] ss:$8 sps:$4 sm:$0xff]  }
 0x44e   :  { %v3107_v37 = vpop.eup %3106  ;;  %1768 = vmax.xlane.f32.xlu1 %v4624_v15  ;;  %v4642_v11 = vadd.f32 %v1737_v26, %v1648_v33  ;;  %v1739_v4 = vmul.f32 %v3105_v16, %v1723_v60  ;;  %2042 = vmatprep.subr.bf16.mxu0 %v2932_v50  ;;  %v2939_v41 = vld [vmem:[#allocation10 + $0x30] ss:$8 sps:$4 sm:$0xff]   ;;  %v2944_v53 = vld [vmem:[#allocation10 + $0x44] ss:$8 sps:$4 sm:$0xff]   ;;  %v2942_v45 = vld [vmem:[#allocation10 + $0x40] ss:$8 sps:$4 sm:$0xff]  }
 0x44f   :  { %v3109_v40 = vpop.eup %3108  ;;  %1764 = vmax.xlane.f32.xlu0 %v4629_v6  ;;  %v4647_v31 = vadd.f32 %v1736_v30, %v1646_v25  ;;  %v1738_v52 = vmul.f32 %v3107_v37, %v1722_v38  ;;  %2850 = vmatprep.subr.bf16.mxu1 %v2932_v50  ;;  %v2947_v8 = vld [vmem:[#allocation10 + $0x54] ss:$8 sps:$4 sm:$0xff]   ;;  %v2945_v60 = vld [vmem:[#allocation10 + $0x50] ss:$8 sps:$4 sm:$0xff]  }
 0x450   :  { %v3111_v24 = vpop.eup %3110  ;;  %v4651_v3 = vadd.f32 %v1739_v4, %v1652_v61  ;;  %v1741_v20 = vmul.f32 %v3109_v40, %v1725_v13  ;;  %2043 = vmatpush1.bf16.msra.mxu0 %v2930_v19  ;;  %2858 = vmatpush1.bf16.msra.mxu1 %v2930_v19 }
 0x451   :  { %v3113_v43 = vpop.eup %3112  ;;  %v4655_v23 = vadd.f32 %v1738_v52, %v1650_v54  ;;  %v1740_v7 = vmul.f32 %v3111_v24, %v1724_v51  ;;  %2044 = vmatprep.subr.bf16.mxu0 %v2935_v14  ;;  %2851 = vmatprep.subr.bf16.mxu1 %v2935_v14 }
 0x452   :  { %v3115_v49 = vpop.eup %3114  ;;  %1772 = vmax.xlane.f32.xlu1 %v4633_v57  ;;  %v4660_v5 = vadd.f32 %v1741_v20, %v1656_v29  ;;  %v1743_v22 = vmul.f32 %v3113_v43, %v1727_v27 }
 0x453   :  { %v3117_v34 = vpop.eup %3116  ;;  %1770 = vmax.xlane.f32.xlu0 %v4637_v58  ;;  %v4665_v17 = vadd.f32 %v1740_v7, %v1654_v36  ;;  %v1742_v28 = vmul.f32 %v3115_v49, %v1726_v35 }
 0x454   :  { %v4669_v55 = vadd.f32 %v1743_v22, %v1660_v44  ;;  %v1744_v59 = vmul.f32 %v3117_v34, %v1728_v12  ;;  %2045 = vmatpush1.bf16.msra.mxu0 %v2933_v39  ;;  %2859 = vmatpush1.bf16.msra.mxu1 %v2933_v39 }
 0x455   :  { %v4673_v10 = vadd.f32 %v1742_v28, %v1658_v9  ;;  %2046 = vmatprep.subr.bf16.mxu0 %v2938_v47  ;;  %2852 = vmatprep.subr.bf16.mxu1 %v2938_v47 }
 0x456   :  { %1776 = vmax.xlane.f32.xlu1 %v4642_v11  ;;  %v4676_v0 = vadd.f32 %v1744_v59, %v1662_v63 }
 0x457   :  { %1774 = vmax.xlane.f32.xlu0 %v4647_v31 }
 0x458   :  { %2047 = vmatpush1.bf16.msra.mxu0 %v2936_v21  ;;  %2860 = vmatpush1.bf16.msra.mxu1 %v2936_v21 }
 0x459   :  { %2048 = vmatprep.subr.bf16.mxu0 %v2941_v56  ;;  %2853 = vmatprep.subr.bf16.mxu1 %v2941_v56 }
 0x45a   :  { %1780 = vmax.xlane.f32.xlu1 %v4651_v3 }
 0x45b   :  { %1778 = vmax.xlane.f32.xlu0 %v4655_v23 }
 0x45c   :  { %2049 = vmatpush1.bf16.msra.mxu0 %v2939_v41  ;;  %2861 = vmatpush1.bf16.msra.mxu1 %v2939_v41 }
 0x45d   :  { %2050 = vmatprep.subr.bf16.mxu0 %v2944_v53  ;;  %2854 = vmatprep.subr.bf16.mxu1 %v2944_v53 }
 0x45e   :  { %1784 = vmax.xlane.f32.xlu1 %v4660_v5 }
 0x45f   :  { %1782 = vmax.xlane.f32.xlu0 %v4665_v17 }
 0x460   :  { %2051 = vmatpush1.bf16.msra.mxu0 %v2942_v45  ;;  %2862 = vmatpush1.bf16.msra.mxu1 %v2942_v45 }
 0x461   :  { %2052 = vmatprep.subr.bf16.mxu0 %v2947_v8  ;;  %2855 = vmatprep.subr.bf16.mxu1 %v2947_v8 }
 0x462   :  { %1788 = vmax.xlane.f32.xlu1 %v4669_v55 }
 0x463   :  { %1786 = vmax.xlane.f32.xlu0 %v4673_v10 }
 0x464   :  { %2053 = vmatpush1.bf16.msra.mxu0 %v2945_v60  ;;  %2863 = vmatpush1.bf16.msra.mxu1 %v2945_v60 }
 0x466   :  { %1792 = vmax.xlane.f32.xlu1 %v4613_v1 }
 0x467   :  { %1790 = vmax.xlane.f32.xlu0 %v4676_v0 }
 0x4d7   :  { %v1767_v42 = vpop.xlane.xlu1 %1766 }
 0x4d8   :  { %v1796_v33 = vsub.f32 %v4615_v18, %v1767_v42  ;;  %v1763_v26 = vpop.xlane.xlu0 %1762 }
 0x4d9   :  { %v1794_v38 = vsub.f32 %v4619_v46, %v1763_v26 }
 0x4da   :  { %v1814_v30 = vmul.f32 1.442695, %v1796_v33 }
 0x4db   :  { %v1810_v16 = vmul.f32 1.442695, %v1794_v38  ;;  %v1769_v25 = vpop.xlane.xlu1 %1768 }
 0x4dc   :  { %v1797_v13 = vsub.f32 %v4624_v15, %v1769_v25  ;;  %v1765_v37 = vpop.xlane.xlu0 %1764  ;;  %v2950_v25 = vld [vmem:[#allocation10 + $0x64] ss:$8 sps:$4 sm:$0xff]  }
 0x4dd   :  { %3118 = vpow2.f32 %v1810_v16  ;;  %v1795_v61 = vsub.f32 %v4629_v6, %v1765_v37  ;;  %v2948_v16 = vld [vmem:[#allocation10 + $0x60] ss:$8 sps:$4 sm:$0xff]   ;;  %2054 = vmatprep.subr.bf16.mxu0 %v2950_v25  ;;  %2856 = vmatprep.subr.bf16.mxu1 %v2950_v25 }
 0x4de   :  { %3120 = vpow2.f32 %v1814_v30  ;;  %v1816_v40 = vmul.f32 1.442695, %v1797_v13  ;;  %v2953_v30 = vld [vmem:[#allocation10 + $0x74] ss:$8 sps:$4 sm:$0xff]   ;;  %2055 = vmatpush1.bf16.msra.mxu0 %v2948_v16  ;;  %v2951_v13 = vld [vmem:[#allocation10 + $0x70] ss:$8 sps:$4 sm:$0xff]   ;;  %2864 = vmatpush1.bf16.msra.mxu1 %v2948_v16 }
 0x4df   :  { %v1812_v4 = vmul.f32 1.442695, %v1795_v61  ;;  %v1773_v51 = vpop.xlane.xlu1 %1772  ;;  %2056 = vmatprep.subr.bf16.mxu0 %v2953_v30  ;;  %2857 = vmatprep.subr.bf16.mxu1 %v2953_v30  ;;  %v1913_v30 = vld [vmem:[#allocation14 + $0x38] sm:$0xff] }
 0x4e0   :  { %v1799_v54 = vsub.f32 %v4633_v57, %v1773_v51  ;;  %v1771_v52 = vpop.xlane.xlu0 %1770 }
 0x4e1   :  { %3122 = vpow2.f32 %v1812_v4  ;;  %v1798_v18 = vsub.f32 %v4637_v58, %v1771_v52 }
 0x4e2   :  { %3124 = vpow2.f32 %v1816_v40  ;;  %v1820_v24 = vmul.f32 1.442695, %v1799_v54  ;;  %2057 = vmatpush1.bf16.msra.mxu0 %v2951_v13  ;;  %2865 = vmatpush1.bf16.msra.mxu1 %v2951_v13 }
 0x4e3   :  { %v1818_v46 = vmul.f32 1.442695, %v1798_v18  ;;  %v1777_v27 = vpop.xlane.xlu1 %1776 }
 0x4e4   :  { %v1801_v15 = vsub.f32 %v4642_v11, %v1777_v27  ;;  %v1775_v29 = vpop.xlane.xlu0 %1774 }
 0x4e5   :  { %3126 = vpow2.f32 %v1818_v46  ;;  %v1800_v6 = vsub.f32 %v4647_v31, %v1775_v29 }
 0x4e6   :  { %3128 = vpow2.f32 %v1820_v24  ;;  %v1824_v57 = vmul.f32 1.442695, %v1801_v15  ;;  %v1906_v24 = vld [vmem:[#allocation14] sm:$0xff]  ;;  %v1907_v15 = vld [vmem:[#allocation14 + $0x8] sm:$0xff] }
 0x4e7   :  { %v4695_v20 = vpop.eup %3118  ;;  %v1822_v35 = vmul.f32 1.442695, %v1800_v6  ;;  %v1781_v43 = vpop.xlane.xlu1 %1780 }
 0x4e8   :  { %v1803_v36 = vsub.f32 %v4651_v3, %v1781_v43  ;;  %1842 = vadd.xlane.f32.xlu0 %v4695_v20  ;;  %v1779_v58 = vpop.xlane.xlu0 %1778  ;;  %v4700_v12 = vpop.eup %3120 }
 0x4e9   :  { %3130 = vpow2.f32 %v1822_v35  ;;  %v1802_v7 = vsub.f32 %v4655_v23, %v1779_v58 }
 0x4ea   :  { %3132 = vpow2.f32 %v1824_v57  ;;  %v1828_v44 = vmul.f32 1.442695, %v1803_v36 }
 0x4eb   :  { %v4702_v11 = vpop.eup %3122  ;;  %v1826_v49 = vmul.f32 1.442695, %v1802_v7  ;;  %v1785_v31 = vpop.xlane.xlu1 %1784 }
 0x4ec   :  { %v1805_v22 = vsub.f32 %v4660_v5, %v1785_v31  ;;  %1846 = vadd.xlane.f32.xlu0 %v4700_v12  ;;  %1844 = vadd.xlane.f32.xlu1 %v4702_v11  ;;  %v1783_v3 = vpop.xlane.xlu0 %1782  ;;  %v4708_v9 = vpop.eup %3124 }
 0x4ed   :  { %3134 = vpow2.f32 %v1826_v49  ;;  %v1804_v34 = vsub.f32 %v4665_v17, %v1783_v3 }
 0x4ee   :  { %3136 = vpow2.f32 %v1828_v44  ;;  %v1832_v59 = vmul.f32 1.442695, %v1805_v22  ;;  %v1909_v22 = vld [vmem:[#allocation14 + $0x18] sm:$0xff] }
 0x4ef   :  { %v4710_v23 = vpop.eup %3126  ;;  %v1830_v28 = vmul.f32 1.442695, %v1804_v34  ;;  %v1789_v63 = vpop.xlane.xlu1 %1788 }
 0x4f0   :  { %v1807_v19 = vsub.f32 %v4669_v55, %v1789_v63  ;;  %1848 = vadd.xlane.f32.xlu1 %v4708_v9  ;;  %1850 = vadd.xlane.f32.xlu0 %v4710_v23  ;;  %v1787_v5 = vpop.xlane.xlu0 %1786  ;;  %v4716_v14 = vpop.eup %3128 }
 0x4f1   :  { %3138 = vpow2.f32 %v1830_v28  ;;  %v1806_v50 = vsub.f32 %v4673_v10, %v1787_v5 }
 0x4f2   :  { %3140 = vpow2.f32 %v1832_v59  ;;  %v1836_v21 = vmul.f32 1.442695, %v1807_v19 }
 0x4f3   :  { %v4718_v17 = vpop.eup %3130  ;;  %v1834_v39 = vmul.f32 1.442695, %v1806_v50  ;;  %v1793_v47 = vpop.xlane.xlu1 %1792 }
 0x4f4   :  { %1852 = vadd.xlane.f32.xlu1 %v4716_v14  ;;  %1854 = vadd.xlane.f32.xlu0 %v4718_v17  ;;  %v1791_v55 = vpop.xlane.xlu0 %1790  ;;  %v1809_v56 = vsub.f32 %v4613_v1, %v1793_v47  ;;  %v4724_v53 = vpop.eup %3132  ;;  %v1911_v47 = vld [vmem:[#allocation14 + $0x28] sm:$0xff] }
 0x4f5   :  { %3142 = vpow2.f32 %v1834_v39  ;;  %v1808_v41 = vsub.f32 %v4676_v0, %v1791_v55 }
 0x4f6   :  { %3144 = vpow2.f32 %v1836_v21  ;;  %v1840_v8 = vmul.f32 1.442695, %v1809_v56  ;;  %v1910_v21 = vld [vmem:[#allocation14 + $0x20] sm:$0xff] }
 0x4f7   :  { %v4726_v10 = vpop.eup %3134  ;;  %v1838_v45 = vmul.f32 1.442695, %v1808_v41 }
 0x4f8   :  { %1856 = vadd.xlane.f32.xlu1 %v4724_v53  ;;  %1858 = vadd.xlane.f32.xlu0 %v4726_v10  ;;  %v4730_v60 = vpop.eup %3136 }
 0x4f9   :  { %3146 = vpow2.f32 %v1838_v45 }
 0x4fa   :  { %3148 = vpow2.f32 %v1840_v8 }
 0x4fb   :  { %v4732_v42 = vpop.eup %3138 }
 0x4fc   :  { %1860 = vadd.xlane.f32.xlu1 %v4730_v60  ;;  %1862 = vadd.xlane.f32.xlu0 %v4732_v42  ;;  %v4736_v1 = vpop.eup %3140 }
 0x4ff   :  { %v4738_v0 = vpop.eup %3142 }
 0x500   :  { %1864 = vadd.xlane.f32.xlu1 %v4736_v1  ;;  %1866 = vadd.xlane.f32.xlu0 %v4738_v0  ;;  %v4742_v33 = vpop.eup %3144 }
 0x503   :  { %v4744_v26 = vpop.eup %3146 }
 0x504   :  { %1868 = vadd.xlane.f32.xlu1 %v4742_v33  ;;  %1870 = vadd.xlane.f32.xlu0 %v4744_v26  ;;  %v4748_v38 = vpop.eup %3148 }
 0x508   :  { %1872 = vadd.xlane.f32.xlu1 %v4748_v38 }
 0x575   :  { %v1843_v37 = vpop.xlane.xlu0 %1842 }
 0x576   :  { %3150 = vrcp.f32 %v1843_v37 }
 0x579   :  { %v1845_v61 = vpop.xlane.xlu1 %1844  ;;  %v1847_v4 = vpop.xlane.xlu0 %1846 }
 0x57a   :  { %3152 = vrcp.f32 %v1845_v61  ;;  %v1918_v61 = vld [vmem:[#allocation14 + $0x60] sm:$0xff] }
 0x57b   :  { %3154 = vrcp.f32 %v1847_v4  ;;  %v1919_v4 = vld [vmem:[#allocation14 + $0x68] sm:$0xff] }
 0x57d   :  { %v1849_v51 = vpop.xlane.xlu1 %1848  ;;  %v1851_v40 = vpop.xlane.xlu0 %1850 }
 0x57e   :  { %3156 = vrcp.f32 %v1849_v51  ;;  %v1912_v51 = vld [vmem:[#allocation14 + $0x30] sm:$0xff] }
 0x580   :  { %v3151_v54 = vpop.eup %3150 }
 0x581   :  { %v1853_v52 = vpop.xlane.xlu1 %1852  ;;  %v1855_v18 = vpop.xlane.xlu0 %1854  ;;  %v1875_v46 = vmul.f32 %v3151_v54, %v4695_v20 }
 0x582   :  { %3158 = vrcp.f32 %v1853_v52 }
 0x583   :  { %3160 = vrcp.f32 %v1851_v40  ;;  %v1922_v57 = vmul.f32 %v1906_v24, %v1875_v46 }
 0x584   :  { %v3153_v27 = vpop.eup %3152 }
 0x585   :  { %v1877_v29 = vmul.f32 %v3153_v27, %v4702_v11  ;;  %v1857_v6 = vpop.xlane.xlu1 %1856  ;;  %v1859_v35 = vpop.xlane.xlu0 %1858  ;;  %v1908_v11 = vld [vmem:[#allocation14 + $0x10] sm:$0xff] }
 0x586   :  { %v3155_v43 = vpop.eup %3154  ;;  %3162 = vrcp.f32 %v1857_v6 }
 0x587   :  { %v1923_v36 = vmul.f32 %v1907_v15, %v1877_v29  ;;  %v1879_v20 = vmul.f32 %v3155_v43, %v4700_v12  ;;  %3164 = vrcp.f32 %v1855_v18  ;;  %v1921_v43 = vld [vmem:[#allocation14 + $0x78] sm:$0xff] }
 0x588   :  { %v3157_v58 = vpop.eup %3156 }
 0x589   :  { %v1861_v7 = vpop.xlane.xlu1 %1860  ;;  %v1863_v49 = vpop.xlane.xlu0 %1862  ;;  %v1938_v31 = vpack.c.bf16 %v1923_v36, %v1922_v57  ;;  %v1881_v44 = vmul.f32 %v3157_v58, %v4708_v9  ;;  %v1924_v59 = vmul.f32 %v1908_v11, %v1879_v20  ;;  %v1914_v36 = vld [vmem:[#allocation14 + $0x40] sm:$0xff]  ;;  %v1920_v58 = vld [vmem:[#allocation14 + $0x70] sm:$0xff] }
 0x58b   :  { %2075 = vmatmul.mubr.bf16.vlgmr.msra.gmra.mrb[32].mxu0 %v1938_v31  ;;  %v1925_v28 = vmul.f32 %v1909_v22, %v1881_v44 }
 0x58c   :  { %2084 = vmatprep.mubr.bf16.mxu0 %v3506_v62  ;;  %v3159_v63 = vpop.eup %3158 }
 0x58d   :  { %v1865_v3 = vpop.xlane.xlu1 %1864  ;;  %v1867_v34 = vpop.xlane.xlu0 %1866  ;;  %v1939_v50 = vpack.c.bf16 %v1925_v28, %v1924_v59  ;;  %v1885_v9 = vmul.f32 %v3159_v63, %v4716_v14 }
 0x58e   :  { %3166 = vrcp.f32 %v1867_v34  ;;  %v3161_v19 = vpop.eup %3160 }
 0x58f   :  { %v1883_v12 = vmul.f32 %v3161_v19, %v4710_v23  ;;  %v1927_v56 = vmul.f32 %v1911_v47, %v1885_v9 }
 0x590   :  { %v3163_v41 = vpop.eup %3162 }
 0x591   :  { %v1869_v5 = vpop.xlane.xlu1 %1868  ;;  %v1871_v39 = vpop.xlane.xlu0 %1870  ;;  %v1926_v45 = vmul.f32 %v1910_v21, %v1883_v12  ;;  %v1889_v25 = vmul.f32 %v3163_v41, %v4724_v53 }
 0x592   :  { %3168 = vrcp.f32 %v1869_v5  ;;  %v3165_v8 = vpop.eup %3164 }
 0x593   :  { %3170 = vrcp.f32 %v1859_v35  ;;  %2085 = vmatmul.mubr.bf16.gmra.mrb[36].mxu0 %v1939_v50  ;;  %v1940_v14 = vpack.c.bf16 %v1927_v56, %v1926_v45  ;;  %v1887_v23 = vmul.f32 %v3165_v8, %v4718_v17  ;;  %v1929_v52 = vmul.f32 %v1913_v30, %v1889_v25  ;;  %v1915_v35 = vld [vmem:[#allocation14 + $0x48] sm:$0xff] }
 0x594   :  { %3172 = vrcp.f32 %v1861_v7  ;;  %2094 = vmatprep.mubr.bf16.mxu0 %v3506_v62 }
 0x595   :  { %3174 = vrcp.f32 %v1871_v39  ;;  %v1873_v55 = vpop.xlane.xlu1 %1872 }
 0x596   :  { %3176 = vrcp.f32 %v1873_v55 }
 0x597   :  { %3178 = vrcp.f32 %v1865_v3  ;;  %v1917_v3 = vld [vmem:[#allocation14 + $0x58] sm:$0xff] }
 0x598   :  { %v3167_v16 = vpop.eup %3166  ;;  %3180 = vrcp.f32 %v1863_v49 }
 0x599   :  { %v1899_v13 = vmul.f32 %v3167_v16, %v4738_v0  ;;  %v1928_v0 = vmul.f32 %v1912_v51, %v1887_v23 }
 0x59b   :  { %2095 = vmatmul.mubr.bf16.gmra.mrb[40].mxu0 %v1940_v14  ;;  %v1934_v46 = vmul.f32 %v1918_v61, %v1899_v13  ;;  %v1941_v15 = vpack.c.bf16 %v1929_v52, %v1928_v0 }
 0x59c   :  { %v3169_v37 = vpop.eup %3168  ;;  %2104 = vmatprep.mubr.bf16.mxu0 %v3506_v62 }
 0x59d   :  { %v3171_v40 = vpop.eup %3170  ;;  %v1901_v54 = vmul.f32 %v3169_v37, %v4742_v33 }
 0x59e   :  { %v3173_v18 = vpop.eup %3172  ;;  %v1891_v33 = vmul.f32 %v3171_v40, %v4726_v10 }
 0x59f   :  { %v3175_v53 = vpop.eup %3174  ;;  %v1935_v27 = vmul.f32 %v1919_v4, %v1901_v54  ;;  %v1893_v29 = vmul.f32 %v3173_v18, %v4730_v60 }
 0x5a0   :  { %v3177_v24 = vpop.eup %3176  ;;  %v1903_v57 = vmul.f32 %v3175_v53, %v4744_v26  ;;  %v1930_v60 = vmul.f32 %v1914_v36, %v1891_v33  ;;  %v1916_v26 = vld [vmem:[#allocation14 + $0x50] sm:$0xff] }
 0x5a1   :  { %v1944_v17 = vpack.c.bf16 %v1935_v27, %v1934_v46  ;;  %v1905_v6 = vmul.f32 %v3177_v24, %v4748_v38  ;;  %v1931_v7 = vmul.f32 %v1915_v35, %v1893_v29  ;;  %v3179_v31 = vpop.eup %3178 }
 0x5a2   :  { %v1936_v44 = vmul.f32 %v1920_v58, %v1903_v57  ;;  %v3181_v38 = vpop.eup %3180  ;;  %v1897_v11 = vmul.f32 %v3179_v31, %v4736_v1 }
 0x5a3   :  { %2105 = vmatmul.mubr.bf16.gmra.mrb[44].mxu0 %v1941_v15  ;;  %2135 = vmatmul.mubr.bf16.vlgmr.msra.gmra.mrb[48].mxu1 %v1944_v17  ;;  %v1937_v49 = vmul.f32 %v1921_v43, %v1905_v6  ;;  %v1942_v22 = vpack.c.bf16 %v1931_v7, %v1930_v60  ;;  %v1895_v10 = vmul.f32 %v3181_v38, %v4732_v42 }
 0x5a4   :  { %2114 = vmatprep.mubr.bf16.mxu0 %v3506_v62  ;;  %2144 = vmatprep.mubr.bf16.mxu1 %v3506_v62  ;;  %v1933_v34 = vmul.f32 %v1917_v3, %v1897_v11 }
 0x5a5   :  { %v1945_v20 = vpack.c.bf16 %v1937_v49, %v1936_v44  ;;  %v1932_v28 = vmul.f32 %v1916_v26, %v1895_v10 }
 0x5a7   :  { %v1943_v63 = vpack.c.bf16 %v1933_v34, %v1932_v28 }
 0x5ab   :  { %2115 = vmatmul.mubr.bf16.gmra.mrb[48].mxu0 %v1942_v22  ;;  %2145 = vmatmul.mubr.bf16.gmra.mrb[52].mxu1 %v1945_v20 }
 0x5ac   :  { %2124 = vmatprep.mubr.bf16.mxu0 %v3506_v62 }
 0x5b3   :  { %2125 = vmatmul.mubr.bf16.gmra.mrb[52].mxu0 %v1943_v63 }
 0x65e   :  { %v4773_v59 = vpop.f32.mrb[32].mxu0 }
 0x65f   :  { %v4775_v19 = vpop.f32.mrb[33].mxu0 }
 0x660   :  { %v4777_v5 = vpop.f32.mrb[34].mxu0 }
 0x661   :  { %v2156_v1 = vadd.f32 %v4777_v5, %v4773_v59  ;;  %v4781_v50 = vpop.f32.mrb[35].mxu0 }
 0x662   :  { %v2177_v42 = vadd.f32 %v4781_v50, %v4775_v19 }
 0x666   :  { %v4785_v62 = vpop.f32.mrb[36].mxu0 }
 0x667   :  { %v2157_v9 = vadd.f32 %v2156_v1, %v4785_v62  ;;  %v4788_v39 = vpop.f32.mrb[37].mxu0 }
 0x668   :  { %v2178_v47 = vadd.f32 %v2177_v42, %v4788_v39  ;;  %v4791_v12 = vpop.f32.mrb[38].mxu0 }
 0x669   :  { %v2158_v21 = vadd.f32 %v2157_v9, %v4791_v12  ;;  %v4794_v55 = vpop.f32.mrb[39].mxu0 }
 0x66a   :  { %v2179_v56 = vadd.f32 %v2178_v47, %v4794_v55 }
 0x66e   :  { %v4797_v41 = vpop.f32.mrb[40].mxu0 }
 0x66f   :  { %v2159_v45 = vadd.f32 %v2158_v21, %v4797_v41  ;;  %v4800_v8 = vpop.f32.mrb[41].mxu0 }
 0x670   :  { %v2180_v16 = vadd.f32 %v2179_v56, %v4800_v8  ;;  %v2100_v14 = vpop.f32.mrb[42].mxu0 }
 0x671   :  { %v2160_v25 = vadd.f32 %v2159_v45, %v2100_v14  ;;  %v4803_v30 = vpop.f32.mrb[43].mxu0 }
 0x672   :  { %v2181_v13 = vadd.f32 %v2180_v16, %v4803_v30 }
 0x676   :  { %v2106_v23 = vpop.f32.mrb[44].mxu0  ;;  %v4806_v37 = vpop.f32.mrb[48].mxu1 }
 0x677   :  { %v2161_v61 = vadd.f32 %v2160_v25, %v2106_v23  ;;  %v4808_v4 = vpop.f32.mrb[45].mxu0  ;;  %v4810_v51 = vpop.f32.mrb[49].mxu1 }
 0x678   :  { %v2182_v40 = vadd.f32 %v2181_v13, %v4808_v4  ;;  %v2110_v54 = vpop.f32.mrb[46].mxu0  ;;  %v2140_v52 = vpop.f32.mrb[50].mxu1 }
 0x679   :  { %v2162_v18 = vadd.f32 %v2161_v61, %v2110_v54  ;;  %v4813_v53 = vpop.f32.mrb[47].mxu0  ;;  %v4815_v46 = vpop.f32.mrb[51].mxu1 }
 0x67a   :  { %v2183_v27 = vadd.f32 %v2182_v40, %v4813_v53 }
 0x67e   :  { %v2116_v0 = vpop.f32.mrb[48].mxu0  ;;  %v2146_v24 = vpop.f32.mrb[52].mxu1 }
 0x67f   :  { %v2163_v15 = vadd.f32 %v2162_v18, %v2116_v0  ;;  %v4818_v17 = vpop.f32.mrb[49].mxu0  ;;  %v4820_v29 = vpop.f32.mrb[53].mxu1 }
 0x680   :  { %v2184_v6 = vadd.f32 %v2183_v27, %v4818_v17  ;;  %v2120_v35 = vpop.f32.mrb[50].mxu0  ;;  %v2150_v43 = vpop.f32.mrb[54].mxu1 }
 0x681   :  { %v2164_v33 = vadd.f32 %v2163_v15, %v2120_v35  ;;  %v4823_v57 = vpop.f32.mrb[51].mxu0  ;;  %v4825_v36 = vpop.f32.mrb[55].mxu1 }
 0x682   :  { %v2185_v58 = vadd.f32 %v2184_v6, %v4823_v57 }
 0x686   :  { %v2126_v7 = vpop.f32.mrb[52].mxu0 }
 0x687   :  { %v2165_v49 = vadd.f32 %v2164_v33, %v2126_v7  ;;  %v2128_v31 = vpop.f32.mrb[53].mxu0 }
 0x688   :  { %v2186_v60 = vadd.f32 %v2185_v58, %v2128_v31  ;;  %v2130_v44 = vpop.f32.mrb[54].mxu0 }
 0x689   :  { %v2166_v38 = vadd.f32 %v2165_v49, %v2130_v44  ;;  %v2132_v22 = vpop.f32.mrb[55].mxu0 }
 0x68a   :  { %v2187_v20 = vadd.f32 %v2186_v60, %v2132_v22 }
 0x68b   :  { %v2167_v11 = vadd.f32 %v2166_v38, %v4806_v37 }
 0x68c   :  { %v2188_v3 = vadd.f32 %v2187_v20, %v4810_v51 }
 0x68d   :  { %v2168_v10 = vadd.f32 %v2167_v11, %v2140_v52 }
 0x68e   :  { %v2189_v26 = vadd.f32 %v2188_v3, %v4815_v46 }
 0x68f   :  { %v2169_v34 = vadd.f32 %v2168_v10, %v2146_v24 }
 0x690   :  { %v2190_v28 = vadd.f32 %v2189_v26, %v4820_v29 }
 0x691   :  { %v2170_v63 = vadd.f32 %v2169_v34, %v2150_v43 }
 0x692   :  { %v2191_v1 = vadd.f32 %v2190_v28, %v4825_v36 }
 0x693   :  { %v2171_v42 = vrot.slane %v2170_v63, 4 }
 0x694   :  { %v2192_v9 = vrot.slane %v2191_v1, 4 }
 0x695   :  { %v2172_v47 = vadd.f32 %v2171_v42, %v2170_v63 }
 0x696   :  { %v2193_v21 = vadd.f32 %v2192_v9, %v2191_v1 }
 0x697   :  { %v2173_v56 = vrot.slane %v2172_v47, 2 }
 0x698   :  { %v2194_v45 = vrot.slane %v2193_v21, 2 }
 0x699   :  { %v2174_v16 = vadd.f32 %v2173_v56, %v2172_v47 }
 0x69a   :  { %v2195_v25 = vadd.f32 %v2194_v45, %v2193_v21 }
 0x69b   :  { %v2175_v13 = vrot.slane %v2174_v16, 1 }
 0x69c   :  { %v2196_v61 = vrot.slane %v2195_v25, 1 }
 0x69d   :  { %v2176_v40 = vadd.f32 %v2175_v13, %v2174_v16 }
 0x69e   :  { %v2197_v27 = vadd.f32 %v2196_v61, %v2195_v25 }
 0x69f   :  { %v2198_v18 = vmul.f32 0.0078125, %v2176_v40 }
 0x6a1   :  { %v4834_v15 = vsub.f32 %v4773_v59, %v2198_v18  ;;  %v4837_v6 = vsub.f32 %v4777_v5, %v2198_v18  ;;  %v4840_v33 = vsub.f32 %v4785_v62, %v2198_v18  ;;  %v4843_v58 = vsub.f32 %v4791_v12, %v2198_v18 }
 0x6a2   :  { %v4846_v49 = vsub.f32 %v4797_v41, %v2198_v18  ;;  %v4848_v60 = vsub.f32 %v2100_v14, %v2198_v18  ;;  %v4850_v38 = vsub.f32 %v2106_v23, %v2198_v18  ;;  %v4852_v20 = vsub.f32 %v2110_v54, %v2198_v18 }
 0x6a3   :  { %v4854_v59 = vsub.f32 %v2116_v0, %v2198_v18  ;;  %v4856_v11 = vsub.f32 %v2120_v35, %v2198_v18  ;;  %v4858_v5 = vsub.f32 %v2126_v7, %v2198_v18  ;;  %v4860_v62 = vsub.f32 %v2130_v44, %v2198_v18 }
 0x6a4   :  { %v4863_v12 = vsub.f32 %v4806_v37, %v2198_v18  ;;  %v4865_v3 = vsub.f32 %v2140_v52, %v2198_v18  ;;  %v4867_v41 = vsub.f32 %v2146_v24, %v2198_v18  ;;  %v4869_v14 = vsub.f32 %v2150_v43, %v2198_v18 }
 0x6a5   :  { %v2232_v23 = vmul.f32 %v4834_v15, %v4834_v15  ;;  %v2234_v54 = vmul.f32 %v4837_v6, %v4837_v6  ;;  %v2199_v0 = vmul.f32 0.0078125, %v2197_v27  ;;  %v2236_v35 = vmul.f32 %v4840_v33, %v4840_v33 }
 0x6a6   :  { %v2238_v37 = vmul.f32 %v4843_v58, %v4843_v58  ;;  %v2244_v1 = vmul.f32 %v4850_v38, %v4850_v38  ;;  %v2248_v45 = vmul.f32 %v4854_v59, %v4854_v59  ;;  %v2250_v61 = vmul.f32 %v4856_v11, %v4856_v11 }
 0x6a7   :  { %v2264_v7 = vadd.f32 %v2234_v54, %v2232_v23  ;;  %v4880_v52 = vsub.f32 %v4775_v19, %v2199_v0  ;;  %v4883_v24 = vsub.f32 %v4781_v50, %v2199_v0  ;;  %v4886_v43 = vsub.f32 %v4788_v39, %v2199_v0 }
 0x6a8   :  { %v4889_v44 = vsub.f32 %v4794_v55, %v2199_v0  ;;  %v4892_v10 = vsub.f32 %v4800_v8, %v2199_v0  ;;  %v4895_v26 = vsub.f32 %v4803_v30, %v2199_v0  ;;  %v4898_v34 = vsub.f32 %v4808_v4, %v2199_v0 }
 0x6a9   :  { %v2265_v19 = vadd.f32 %v2264_v7, %v2236_v35  ;;  %v4901_v28 = vsub.f32 %v4813_v53, %v2199_v0  ;;  %v4904_v50 = vsub.f32 %v4818_v17, %v2199_v0  ;;  %v4907_v39 = vsub.f32 %v4823_v57, %v2199_v0 }
 0x6aa   :  { %v4909_v55 = vsub.f32 %v2128_v31, %v2199_v0  ;;  %v4911_v8 = vsub.f32 %v2132_v22, %v2199_v0  ;;  %v4914_v30 = vsub.f32 %v4810_v51, %v2199_v0  ;;  %v4917_v4 = vsub.f32 %v4815_v46, %v2199_v0 }
 0x6ab   :  { %v2240_v53 = vmul.f32 %v4846_v49, %v4846_v49  ;;  %v2266_v63 = vadd.f32 %v2265_v19, %v2238_v37  ;;  %v4922_v17 = vsub.f32 %v4820_v29, %v2199_v0  ;;  %v4925_v57 = vsub.f32 %v4825_v36, %v2199_v0 }
 0x6ac   :  { %v2233_v31 = vmul.f32 %v4880_v52, %v4880_v52  ;;  %v2235_v51 = vmul.f32 %v4883_v24, %v4883_v24  ;;  %v2242_v46 = vmul.f32 %v4848_v60, %v4848_v60  ;;  %v2237_v29 = vmul.f32 %v4886_v43, %v4886_v43 }
 0x6ad   :  { %v2267_v22 = vadd.f32 %v2266_v63, %v2240_v53  ;;  %v2246_v36 = vmul.f32 %v4852_v20, %v4852_v20  ;;  %v2239_v21 = vmul.f32 %v4889_v44, %v4889_v44  ;;  %v2241_v25 = vmul.f32 %v4892_v10, %v4892_v10 }
 0x6ae   :  { %v2285_v9 = vadd.f32 %v2235_v51, %v2233_v31  ;;  %v2243_v18 = vmul.f32 %v4895_v26, %v4895_v26  ;;  %v2252_v23 = vmul.f32 %v4858_v5, %v4858_v5  ;;  %v2245_v0 = vmul.f32 %v4898_v34, %v4898_v34 }
 0x6af   :  { %v2268_v42 = vadd.f32 %v2267_v22, %v2242_v46  ;;  %v2254_v37 = vmul.f32 %v4860_v62, %v4860_v62  ;;  %v2247_v19 = vmul.f32 %v4901_v28, %v4901_v28  ;;  %v2256_v63 = vmul.f32 %v4863_v12, %v4863_v12 }
 0x6b0   :  { %v2286_v56 = vadd.f32 %v2285_v9, %v2237_v29  ;;  %v2249_v51 = vmul.f32 %v4904_v50, %v4904_v50  ;;  %v2258_v22 = vmul.f32 %v4865_v3, %v4865_v3  ;;  %v2260_v9 = vmul.f32 %v4867_v41, %v4867_v41 }
 0x6b1   :  { %v2269_v47 = vadd.f32 %v2268_v42, %v2244_v1  ;;  %v2251_v42 = vmul.f32 %v4907_v39, %v4907_v39 }
 0x6b2   :  { %v2287_v13 = vadd.f32 %v2286_v56, %v2239_v21  ;;  %v2262_v56 = vmul.f32 %v4869_v14, %v4869_v14 }
 0x6b3   :  { %v2270_v16 = vadd.f32 %v2269_v47, %v2246_v36  ;;  %v2253_v47 = vmul.f32 %v4909_v55, %v4909_v55 }
 0x6b4   :  { %v2288_v27 = vadd.f32 %v2287_v13, %v2241_v25 }
 0x6b5   :  { %v2271_v40 = vadd.f32 %v2270_v16, %v2248_v45  ;;  %v2255_v16 = vmul.f32 %v4911_v8, %v4911_v8 }
 0x6b6   :  { %v2289_v35 = vadd.f32 %v2288_v27, %v2243_v18  ;;  %v2259_v27 = vmul.f32 %v4917_v4, %v4917_v4 }
 0x6b7   :  { %v2272_v54 = vadd.f32 %v2271_v40, %v2250_v61  ;;  %v2257_v61 = vmul.f32 %v4914_v30, %v4914_v30 }
 0x6b8   :  { %v2290_v53 = vadd.f32 %v2289_v35, %v2245_v0  ;;  %v2261_v0 = vmul.f32 %v4922_v17, %v4922_v17 }
 0x6b9   :  { %v2273_v7 = vadd.f32 %v2272_v54, %v2252_v23 }
 0x6ba   :  { %v2291_v46 = vadd.f32 %v2290_v53, %v2247_v19 }
 0x6bb   :  { %v2274_v31 = vadd.f32 %v2273_v7, %v2254_v37  ;;  %v2263_v7 = vmul.f32 %v4925_v57, %v4925_v57 }
 0x6bc   :  { %v2292_v29 = vadd.f32 %v2291_v46, %v2249_v51 }
 0x6bd   :  { %v2275_v1 = vadd.f32 %v2274_v31, %v2256_v63 }
 0x6be   :  { %v2293_v21 = vadd.f32 %v2292_v29, %v2251_v42 }
 0x6bf   :  { %v2276_v36 = vadd.f32 %v2275_v1, %v2258_v22 }
 0x6c0   :  { %v2294_v25 = vadd.f32 %v2293_v21, %v2253_v47 }
 0x6c1   :  { %v2277_v45 = vadd.f32 %v2276_v36, %v2260_v9 }
 0x6c2   :  { %v2295_v40 = vadd.f32 %v2294_v25, %v2255_v16 }
 0x6c3   :  { %v2278_v13 = vadd.f32 %v2277_v45, %v2262_v56 }
 0x6c4   :  { %v2296_v23 = vadd.f32 %v2295_v40, %v2257_v61  ;;  %v2155_v40 = vld [vmem:[%s5350_s8] sm:$0x3]  ;;  %s3507_s8 = smov [#allocation16]  }
 0x6c5   :  { %v2279_v18 = vrot.slane %v2278_v13, 4  ;;  %s2664_s0 = sshll.u32 %s3507_s8, 4  ;;  %s2665_s0 = int_to_ptr.vmem [resolvable:$true] %s2664_s0 }
 0x6c6   :  { %v2297_v35 = vadd.f32 %v2296_v23, %v2259_v27  ;;  %s3458_s17 = scalar_lea.vmem %s2665_s0, 4096  ;;  %p3463_p9 = scmp.lt.s32.totalorder %s2665_s0, %s2665_s0 }
 0x6c7   :  { %v2280_v54 = vadd.f32 %v2279_v18, %v2278_v13  ;;  %p3459_p8 = scmp.ne.s32.totalorder %s2665_s0, %s3458_s17  ;;  %p3464_p10 = scmp.lt.s32.totalorder %s3458_s17, %s3458_s17 }
 0x6c8   :  { %v2298_v19 = vadd.f32 %v2297_v35, %v2261_v0 }
 0x6c9   :  { %v2281_v37 = vrot.slane %v2280_v54, 2  ;;  %p3465_p11 = por %p3464_p10, %p3463_p9 }
 0x6ca   :  { %v2299_v63 = vadd.f32 %v2298_v19, %v2263_v7 }
 0x6cb   :  { %v2282_v53 = vadd.f32 %v2281_v37, %v2280_v54  ;;  %p3466_p12 = pnand %p3465_p11, %p3459_p8 }
 0x6cc   :  { %v2300_v51 = vrot.slane %v2299_v63, 4 }
 0x6cd   :  { %v2283_v31 = vrot.slane %v2282_v53, 1 }
 0x6ce   :  { %v2301_v22 = vadd.f32 %v2300_v51, %v2299_v63 }
 0x6cf   :  { %v2284_v46 = vadd.f32 %v2283_v31, %v2282_v53 }
 0x6d0   :  { %v2302_v42 = vrot.slane %v2301_v22, 2 }
 0x6d1   :  { %v2306_v1 = vmul.f32 0.0078125, %v2284_v46 }
 0x6d2   :  { %v2303_v9 = vadd.f32 %v2302_v42, %v2301_v22 }
 0x6d3   :  { %v2308_v29 = vadd.f32 1e-05, %v2306_v1 }
 0x6d4   :  { %v2304_v36 = vrot.slane %v2303_v9, 1 }
 0x6d5   :  { %3182 = vrsqrt.f32 %v2308_v29 }
 0x6d6   :  { %v2305_v47 = vadd.f32 %v2304_v36, %v2303_v9 }
 0x6d8   :  { %v2307_v21 = vmul.f32 0.0078125, %v2305_v47 }
 0x6da   :  { %v2309_v56 = vadd.f32 1e-05, %v2307_v21 }
 0x6dc   :  { %3184 = vrsqrt.f32 %v2309_v56 }
 0x6df   :  { %v3183_v45 = vpop.eup %3182 }
 0x6e0   :  { %v4982_v16 = vmul.f32 %v3183_v45, %v4860_v62  ;;  %v2314_v25 = vmul.f32 %v3183_v45, %v4837_v6  ;;  %v2312_v13 = vmul.f32 %v3183_v45, %v4834_v15  ;;  %v2318_v61 = vmul.f32 %v3183_v45, %v4843_v58 }
 0x6e1   :  { %v2316_v18 = vmul.f32 %v3183_v45, %v4840_v33  ;;  %v2322_v27 = vmul.f32 %v3183_v45, %v4848_v60  ;;  %v2320_v23 = vmul.f32 %v3183_v45, %v4846_v49  ;;  %v2326_v54 = vmul.f32 %v3183_v45, %v4852_v20 }
 0x6e2   :  { %v2324_v62 = vmul.f32 %v3183_v45, %v4850_v38  ;;  %v4997_v6 = vrot.slane %v2155_v40, %v1626_v2  ;;  %v2330_v15 = vmul.f32 %v3183_v45, %v4856_v11  ;;  %v2328_v58 = vmul.f32 %v3183_v45, %v4854_v59 }
 0x6e3   :  { %v2332_v0 = vmul.f32 %v3183_v45, %v4858_v5  ;;  %v5003_v33 = vmul.f32 %v3183_v45, %v4865_v3  ;;  %v5006_v60 = vmul.f32 %v3183_v45, %v4863_v12  ;;  %v5009_v49 = vmul.f32 %v3183_v45, %v4869_v14 }
 0x6e4   :  { %v5012_v38 = vmul.f32 %v3183_v45, %v4867_v41  ;;  %v5016_v2 = vrot.slane %v2155_v40, %v1630_v48  ;;  %v5019_v59 = vadd.f32 %v4997_v6, %v2314_v25  ;;  %v5022_v11 = vadd.f32 %v4997_v6, %v2312_v13 }
 0x6e5   :  { %v5098_v36 = vadd.f32 %v4997_v6, %v2328_v58  ;;  %v5112_v25 = vadd.f32 %v4997_v6, %v4982_v16  ;;  %v5115_v13 = vadd.f32 %v4997_v6, %v2332_v0  ;;  %v5129_v16 = vadd.f32 %v4997_v6, %v5003_v33 }
 0x6e6   :  { %v3185_v20 = vpop.eup %3184  ;;  %v5147_v0 = vadd.f32 %v4997_v6, %v5009_v49  ;;  %v5151_v33 = vadd.f32 %v4997_v6, %v5012_v38 }
 0x6e7   :  { %v2335_v5 = vmul.f32 %v3185_v20, %v4911_v8  ;;  %v2315_v12 = vmul.f32 %v3185_v20, %v4883_v24  ;;  %v2313_v3 = vmul.f32 %v3185_v20, %v4880_v52  ;;  %v2319_v41 = vmul.f32 %v3185_v20, %v4889_v44 }
 0x6e8   :  { %v2317_v14 = vmul.f32 %v3185_v20, %v4886_v43  ;;  %v2323_v32 = vmul.f32 %v3185_v20, %v4895_v26  ;;  %v2321_v48 = vmul.f32 %v3185_v20, %v4892_v10  ;;  %v2327_v35 = vmul.f32 %v3185_v20, %v4901_v28 }
 0x6e9   :  { %v5033_v37 = vadd.f32 %v5016_v2, %v2315_v12  ;;  %v5036_v7 = vadd.f32 %v5016_v2, %v2313_v3  ;;  %v2325_v24 = vmul.f32 %v3185_v20, %v4898_v34  ;;  %v5040_v52 = vadd.f32 %v4997_v6, %v2318_v61 }
 0x6ea   :  { %v5043_v44 = vadd.f32 %v4997_v6, %v2316_v18  ;;  %v5050_v26 = vadd.f32 %v5016_v2, %v2319_v41  ;;  %v5053_v28 = vadd.f32 %v5016_v2, %v2317_v14  ;;  %v5056_v34 = vadd.f32 %v4997_v6, %v2322_v27 }
 0x6eb   :  { %v2390_v43 = vmax.f32 %v5019_v59, %v5033_v37  ;;  %v2387_v10 = vmax.f32 %v5022_v11, %v5036_v7  ;;  %v5059_v8 = vadd.f32 %v4997_v6, %v2320_v23  ;;  %v5062_v19 = vadd.f32 %v5016_v2, %v2323_v32 }
 0x6ec   :  { %v2331_v53 = vmul.f32 %v3185_v20, %v4907_v39  ;;  %v2329_v63 = vmul.f32 %v3185_v20, %v4904_v50  ;;  %v5067_v31 = vadd.f32 %v5016_v2, %v2321_v48  ;;  %v2333_v51 = vmul.f32 %v3185_v20, %v4909_v55 }
 0x6ed   :  { %2391 = vmax.xlane.f32.xlu1 %v2390_v43  ;;  %2388 = vmax.xlane.f32.xlu0 %v2387_v10  ;;  %v2339_v46 = vmul.f32 %v3185_v20, %v4917_v4  ;;  %v2337_v22 = vmul.f32 %v3185_v20, %v4914_v30  ;;  %v2396_v1 = vmax.f32 %v5040_v52, %v5050_v26 }
 0x6ee   :  { %v2393_v42 = vmax.f32 %v5043_v44, %v5053_v28  ;;  %v2343_v29 = vmul.f32 %v3185_v20, %v4925_v57  ;;  %v2341_v39 = vmul.f32 %v3185_v20, %v4922_v17  ;;  %v5079_v50 = vadd.f32 %v4997_v6, %v2326_v54 }
 0x6ef   :  { %v5082_v55 = vadd.f32 %v4997_v6, %v2324_v62  ;;  %v2402_v30 = vmax.f32 %v5056_v34, %v5062_v19  ;;  %v2399_v4 = vmax.f32 %v5059_v8, %v5067_v31  ;;  %v5089_v9 = vadd.f32 %v5016_v2, %v2327_v35 }
 0x6f0   :  { %v5092_v57 = vadd.f32 %v5016_v2, %v2325_v24  ;;  %v5095_v17 = vadd.f32 %v4997_v6, %v2330_v15  ;;  %v5105_v56 = vadd.f32 %v5016_v2, %v2331_v53  ;;  %v5108_v45 = vadd.f32 %v5016_v2, %v2329_v63 }
 0x6f1   :  { %2397 = vmax.xlane.f32.xlu1 %v2396_v1  ;;  %2394 = vmax.xlane.f32.xlu0 %v2393_v42  ;;  %v2408_v47 = vmax.f32 %v5079_v50, %v5089_v9  ;;  %v5122_v18 = vadd.f32 %v5016_v2, %v2335_v5  ;;  %v5125_v27 = vadd.f32 %v5016_v2, %v2333_v51 }
 0x6f2   :  { %v2405_v21 = vmax.f32 %v5082_v55, %v5092_v57  ;;  %v2414_v61 = vmax.f32 %v5095_v17, %v5105_v56  ;;  %v2411_v40 = vmax.f32 %v5098_v36, %v5108_v45  ;;  %v5133_v23 = vadd.f32 %v4997_v6, %v5006_v60 }
 0x6f3   :  { %v2420_v54 = vmax.f32 %v5112_v25, %v5122_v18  ;;  %v2417_v62 = vmax.f32 %v5115_v13, %v5125_v27  ;;  %v5140_v15 = vadd.f32 %v5016_v2, %v2339_v46  ;;  %v5143_v58 = vadd.f32 %v5016_v2, %v2337_v22 }
 0x6f4   :  { %v5158_v5 = vadd.f32 %v5016_v2, %v2343_v29  ;;  %v5161_v12 = vadd.f32 %v5016_v2, %v2341_v39 }
 0x6f5   :  { %2403 = vmax.xlane.f32.xlu1 %v2402_v30  ;;  %2400 = vmax.xlane.f32.xlu0 %v2399_v4  ;;  %v2426_v60 = vmax.f32 %v5129_v16, %v5140_v15  ;;  %v2423_v20 = vmax.f32 %v5133_v23, %v5143_v58 }
 0x6f6   :  { %v2432_v49 = vmax.f32 %v5147_v0, %v5158_v5  ;;  %v2429_v6 = vmax.f32 %v5151_v33, %v5161_v12 }
 0x6f9   :  { %2409 = vmax.xlane.f32.xlu1 %v2408_v47  ;;  %2406 = vmax.xlane.f32.xlu0 %v2405_v21 }
 0x6fd   :  { %2415 = vmax.xlane.f32.xlu1 %v2414_v61  ;;  %2412 = vmax.xlane.f32.xlu0 %v2411_v40 }
 0x701   :  { %2421 = vmax.xlane.f32.xlu1 %v2420_v54  ;;  %2418 = vmax.xlane.f32.xlu0 %v2417_v62 }
 0x705   :  { %2427 = vmax.xlane.f32.xlu1 %v2426_v60  ;;  %2424 = vmax.xlane.f32.xlu0 %v2423_v20 }
 0x709   :  { %2433 = vmax.xlane.f32.xlu1 %v2432_v49  ;;  %2430 = vmax.xlane.f32.xlu0 %v2429_v6 }
 0x77a   :  { %v2392_v38 = vpop.xlane.xlu1 %2391  ;;  %v2389_v3 = vpop.xlane.xlu0 %2388 }
 0x77b   :  { %v2437_v41 = vsub.f32 %v5019_v59, %v2392_v38  ;;  %v2438_v14 = vsub.f32 %v5033_v37, %v2392_v38  ;;  %v2435_v32 = vsub.f32 %v5022_v11, %v2389_v3  ;;  %v2436_v2 = vsub.f32 %v5036_v7, %v2389_v3 }
 0x77d   :  { %v2471_v48 = vmul.f32 1.442695, %v2437_v41  ;;  %v2473_v35 = vmul.f32 1.442695, %v2438_v14  ;;  %v2467_v24 = vmul.f32 1.442695, %v2435_v32 }
 0x77e   :  { %v2469_v43 = vmul.f32 1.442695, %v2436_v2  ;;  %v2398_v10 = vpop.xlane.xlu1 %2397  ;;  %v2395_v53 = vpop.xlane.xlu0 %2394 }
 0x77f   :  { %3186 = vpow2.f32 %v2471_v48  ;;  %v2441_v63 = vsub.f32 %v5040_v52, %v2398_v10  ;;  %v2442_v51 = vsub.f32 %v5050_v26, %v2398_v10  ;;  %v2439_v46 = vsub.f32 %v5043_v44, %v2395_v53 }
 0x780   :  { %3188 = vpow2.f32 %v2473_v35  ;;  %v2440_v59 = vsub.f32 %v5053_v28, %v2395_v53 }
 0x781   :  { %3190 = vpow2.f32 %v2467_v24  ;;  %v2479_v11 = vmul.f32 1.442695, %v2441_v63  ;;  %v2481_v37 = vmul.f32 1.442695, %v2442_v51  ;;  %v2475_v7 = vmul.f32 1.442695, %v2439_v46 }
 0x782   :  { %3192 = vpow2.f32 %v2469_v43  ;;  %v2477_v22 = vmul.f32 1.442695, %v2440_v59  ;;  %v2404_v1 = vpop.xlane.xlu1 %2403  ;;  %v2401_v42 = vpop.xlane.xlu0 %2400 }
 0x783   :  { %3194 = vpow2.f32 %v2479_v11  ;;  %v2445_v29 = vsub.f32 %v5056_v34, %v2404_v1  ;;  %v2446_v52 = vsub.f32 %v5062_v19, %v2404_v1  ;;  %v2443_v26 = vsub.f32 %v5059_v8, %v2401_v42 }
 0x784   :  { %3196 = vpow2.f32 %v2481_v37  ;;  %v2444_v44 = vsub.f32 %v5067_v31, %v2401_v42 }
 0x785   :  { %3198 = vpow2.f32 %v2475_v7  ;;  %v2487_v28 = vmul.f32 1.442695, %v2445_v29  ;;  %v2489_v39 = vmul.f32 1.442695, %v2446_v52  ;;  %v2483_v30 = vmul.f32 1.442695, %v2443_v26 }
 0x786   :  { %3200 = vpow2.f32 %v2477_v22  ;;  %v2485_v4 = vmul.f32 1.442695, %v2444_v44  ;;  %v2410_v47 = vpop.xlane.xlu1 %2409  ;;  %v2407_v21 = vpop.xlane.xlu0 %2406 }
 0x787   :  { %3202 = vpow2.f32 %v2487_v28  ;;  %v2449_v61 = vsub.f32 %v5079_v50, %v2410_v47  ;;  %v2450_v34 = vsub.f32 %v5089_v9, %v2410_v47  ;;  %v2447_v19 = vsub.f32 %v5082_v55, %v2407_v21 }
 0x788   :  { %3204 = vpow2.f32 %v2489_v39  ;;  %v2448_v8 = vsub.f32 %v5092_v57, %v2407_v21 }
 0x789   :  { %v5183_v40 = vpop.eup %3186  ;;  %3206 = vpow2.f32 %v2483_v30  ;;  %v2495_v31 = vmul.f32 1.442695, %v2449_v61  ;;  %v2497_v54 = vmul.f32 1.442695, %v2450_v34  ;;  %v2491_v62 = vmul.f32 1.442695, %v2447_v19 }
 0x78a   :  { %v5185_v60 = vpop.eup %3188  ;;  %3208 = vpow2.f32 %v2485_v4  ;;  %v2493_v20 = vmul.f32 1.442695, %v2448_v8  ;;  %v2416_v49 = vpop.xlane.xlu1 %2415 }
 0x78b   :  { %v2413_v6 = vpop.xlane.xlu0 %2412  ;;  %v5187_v50 = vpop.eup %3190  ;;  %3210 = vpow2.f32 %v2495_v31  ;;  %v2453_v55 = vsub.f32 %v5095_v17, %v2416_v49  ;;  %v2454_v9 = vsub.f32 %v5105_v56, %v2416_v49  ;;  %v2534_v41 = vadd.f32 %v5185_v60, %v5183_v40 }
 0x78c   :  { %v2451_v57 = vsub.f32 %v5098_v36, %v2413_v6  ;;  %v5192_v38 = vpop.eup %3192  ;;  %3212 = vpow2.f32 %v2497_v54  ;;  %v2452_v3 = vsub.f32 %v5108_v45, %v2413_v6 }
 0x78d   :  { %v5197_v14 = vpop.eup %3194  ;;  %3214 = vpow2.f32 %v2491_v62  ;;  %v2503_v32 = vmul.f32 1.442695, %v2453_v55  ;;  %v2505_v2 = vmul.f32 1.442695, %v2454_v9  ;;  %2535 = vadd.xlane.f32.xlu1 %v2534_v41  ;;  %v2531_v36 = vadd.f32 %v5192_v38, %v5187_v50 }
 0x78e   :  { %v2499_v48 = vmul.f32 1.442695, %v2451_v57  ;;  %v5199_v35 = vpop.eup %3196  ;;  %3216 = vpow2.f32 %v2493_v20  ;;  %v2501_v17 = vmul.f32 1.442695, %v2452_v3  ;;  %v2422_v56 = vpop.xlane.xlu1 %2421 }
 0x78f   :  { %v2419_v24 = vpop.xlane.xlu0 %2418  ;;  %v5203_v45 = vpop.eup %3198  ;;  %3218 = vpow2.f32 %v2503_v32  ;;  %v2457_v43 = vsub.f32 %v5112_v25, %v2422_v56  ;;  %v2458_v10 = vsub.f32 %v5122_v18, %v2422_v56  ;;  %2532 = vadd.xlane.f32.xlu0 %v2531_v36  ;;  %v2540_v46 = vadd.f32 %v5199_v35, %v5197_v14 }
 0x790   :  { %v2455_v53 = vsub.f32 %v5115_v13, %v2419_v24  ;;  %v5208_v63 = vpop.eup %3200  ;;  %3220 = vpow2.f32 %v2505_v2  ;;  %v2456_v51 = vsub.f32 %v5125_v27, %v2419_v24 }
 0x791   :  { %v5213_v59 = vpop.eup %3202  ;;  %3222 = vpow2.f32 %v2499_v48  ;;  %v2511_v11 = vmul.f32 1.442695, %v2457_v43  ;;  %v2513_v37 = vmul.f32 1.442695, %v2458_v10  ;;  %2541 = vadd.xlane.f32.xlu1 %v2540_v46  ;;  %v2537_v13 = vadd.f32 %v5208_v63, %v5203_v45 }
 0x792   :  { %v2507_v7 = vmul.f32 1.442695, %v2455_v53  ;;  %v5215_v25 = vpop.eup %3204  ;;  %3224 = vpow2.f32 %v2501_v17  ;;  %v2509_v18 = vmul.f32 1.442695, %v2456_v51  ;;  %v2428_v22 = vpop.xlane.xlu1 %2427 }
 0x793   :  { %v2425_v1 = vpop.xlane.xlu0 %2424  ;;  %v5219_v27 = vpop.eup %3206  ;;  %3226 = vpow2.f32 %v2511_v11  ;;  %v2461_v42 = vsub.f32 %v5129_v16, %v2428_v22  ;;  %v2462_v29 = vsub.f32 %v5140_v15, %v2428_v22  ;;  %2538 = vadd.xlane.f32.xlu0 %v2537_v13  ;;  %v2546_v28 = vadd.f32 %v5215_v25, %v5213_v59 }
 0x794   :  { %v2459_v52 = vsub.f32 %v5133_v23, %v2425_v1  ;;  %v5224_v26 = vpop.eup %3208  ;;  %3228 = vpow2.f32 %v2513_v37  ;;  %v2460_v44 = vsub.f32 %v5143_v58, %v2425_v1 }
 0x795   :  { %v5229_v39 = vpop.eup %3210  ;;  %3230 = vpow2.f32 %v2507_v7  ;;  %v2519_v30 = vmul.f32 1.442695, %v2461_v42  ;;  %v2521_v4 = vmul.f32 1.442695, %v2462_v29  ;;  %2547 = vadd.xlane.f32.xlu1 %v2546_v28  ;;  %v2543_v23 = vadd.f32 %v5224_v26, %v5219_v27 }
 0x796   :  { %v2515_v47 = vmul.f32 1.442695, %v2459_v52  ;;  %v5231_v16 = vpop.eup %3212  ;;  %3232 = vpow2.f32 %v2509_v18  ;;  %v2517_v15 = vmul.f32 1.442695, %v2460_v44  ;;  %v2434_v21 = vpop.xlane.xlu1 %2433 }
 0x797   :  { %v2431_v61 = vpop.xlane.xlu0 %2430  ;;  %v5235_v58 = vpop.eup %3214  ;;  %3234 = vpow2.f32 %v2519_v30  ;;  %v2465_v34 = vsub.f32 %v5147_v0, %v2434_v21  ;;  %v2466_v19 = vsub.f32 %v5158_v5, %v2434_v21  ;;  %2544 = vadd.xlane.f32.xlu0 %v2543_v23  ;;  %v2552_v62 = vadd.f32 %v5231_v16, %v5229_v39 }
 0x798   :  { %v2463_v8 = vsub.f32 %v5151_v33, %v2431_v61  ;;  %v5240_v31 = vpop.eup %3216  ;;  %3236 = vpow2.f32 %v2521_v4  ;;  %v2464_v54 = vsub.f32 %v5161_v12, %v2431_v61 }
 0x799   :  { %v5245_v20 = vpop.eup %3218  ;;  %3238 = vpow2.f32 %v2515_v47  ;;  %v2527_v49 = vmul.f32 1.442695, %v2465_v34  ;;  %v2529_v6 = vmul.f32 1.442695, %v2466_v19  ;;  %2553 = vadd.xlane.f32.xlu1 %v2552_v62  ;;  %v2549_v33 = vadd.f32 %v5240_v31, %v5235_v58 }
 0x79a   :  { %v2523_v55 = vmul.f32 1.442695, %v2463_v8  ;;  %v5247_v0 = vpop.eup %3220  ;;  %3240 = vpow2.f32 %v2517_v15  ;;  %v2525_v5 = vmul.f32 1.442695, %v2464_v54 }
 0x79b   :  { %v5251_v9 = vpop.eup %3222  ;;  %3242 = vpow2.f32 %v2527_v49  ;;  %v2558_v12 = vadd.f32 %v5247_v0, %v5245_v20  ;;  %2550 = vadd.xlane.f32.xlu0 %v2549_v33 }
 0x79c   :  { %v5255_v57 = vpop.eup %3224  ;;  %3244 = vpow2.f32 %v2529_v6 }
 0x79d   :  { %v5257_v3 = vpop.eup %3226  ;;  %3246 = vpow2.f32 %v2523_v55  ;;  %v2555_v41 = vadd.f32 %v5255_v57, %v5251_v9  ;;  %2559 = vadd.xlane.f32.xlu1 %v2558_v12 }
 0x79e   :  { %v5261_v32 = vpop.eup %3228  ;;  %3248 = vpow2.f32 %v2525_v5 }
 0x79f   :  { %v5263_v2 = vpop.eup %3230  ;;  %v2564_v48 = vadd.f32 %v5261_v32, %v5257_v3  ;;  %2556 = vadd.xlane.f32.xlu0 %v2555_v41 }
 0x7a0   :  { %v5267_v17 = vpop.eup %3232 }
 0x7a1   :  { %v5269_v36 = vpop.eup %3234  ;;  %v2561_v56 = vadd.f32 %v5267_v17, %v5263_v2  ;;  %2565 = vadd.xlane.f32.xlu1 %v2564_v48 }
 0x7a2   :  { %v5273_v24 = vpop.eup %3236 }
 0x7a3   :  { %v5275_v43 = vpop.eup %3238  ;;  %v2570_v10 = vadd.f32 %v5273_v24, %v5269_v36  ;;  %2562 = vadd.xlane.f32.xlu0 %v2561_v56 }
 0x7a4   :  { %v5279_v53 = vpop.eup %3240 }
 0x7a5   :  { %v5281_v51 = vpop.eup %3242  ;;  %v2567_v46 = vadd.f32 %v5279_v53, %v5275_v43  ;;  %2571 = vadd.xlane.f32.xlu1 %v2570_v10 }
 0x7a6   :  { %v5285_v11 = vpop.eup %3244 }
 0x7a7   :  { %v5287_v37 = vpop.eup %3246  ;;  %v2576_v7 = vadd.f32 %v5285_v11, %v5281_v51  ;;  %2568 = vadd.xlane.f32.xlu0 %v2567_v46 }
 0x7a8   :  { %v5291_v18 = vpop.eup %3248 }
 0x7a9   :  { %v2573_v13 = vadd.f32 %v5291_v18, %v5287_v37  ;;  %2577 = vadd.xlane.f32.xlu1 %v2576_v7 }
 0x7ab   :  { %2574 = vadd.xlane.f32.xlu0 %v2573_v13 }
 0x81a   :  { %v2536_v22 = vpop.xlane.xlu1 %2535 }
 0x81b   :  { %3250 = vrcp.f32 %v2536_v22 }
 0x81c   :  { %v2533_v1 = vpop.xlane.xlu0 %2532 }
 0x81d   :  { %3252 = vrcp.f32 %v2533_v1 }
 0x81e   :  { %v2542_v42 = vpop.xlane.xlu1 %2541 }
 0x81f   :  { %3254 = vrcp.f32 %v2542_v42 }
 0x820   :  { %v2539_v29 = vpop.xlane.xlu0 %2538 }
 0x821   :  { %3256 = vrcp.f32 %v2539_v29 }
 0x822   :  { %v2548_v52 = vpop.xlane.xlu1 %2547 }
 0x823   :  { %3258 = vrcp.f32 %v2548_v52 }
 0x824   :  { %v2545_v44 = vpop.xlane.xlu0 %2544 }
 0x825   :  { %v3251_v28 = vpop.eup %3250  ;;  %3260 = vrcp.f32 %v2545_v44 }
 0x826   :  { %v2583_v30 = vmul.f32 %v3251_v28, %v5183_v40  ;;  %v2584_v4 = vmul.f32 %v3251_v28, %v5185_v60  ;;  %v2554_v47 = vpop.xlane.xlu1 %2553 }
 0x827   :  { %v3253_v15 = vpop.eup %3252  ;;  %3262 = vrcp.f32 %v2554_v47 }
 0x828   :  { %2629 = vst [vmem:[#allocation16 + $0x10] sm:$0xff] %v2583_v30  ;;  %2630 = vst [vmem:[#allocation16 + $0x18] sm:$0xff] %v2584_v4  ;;  %v2580_v23 = vmul.f32 %v3253_v15, %v5187_v50  ;;  %v2581_v21 = vmul.f32 %v3253_v15, %v5192_v38  ;;  %v2551_v61 = vpop.xlane.xlu0 %2550 }
 0x829   :  { %v3255_v34 = vpop.eup %3254  ;;  %3264 = vrcp.f32 %v2551_v61 }
 0x82a   :  { %2627 = vst [vmem:[#allocation16] sm:$0xff] %v2580_v23  ;;  %2628 = vst [vmem:[#allocation16 + $0x8] sm:$0xff] %v2581_v21  ;;  %v2589_v19 = vmul.f32 %v3255_v34, %v5197_v14  ;;  %v2590_v40 = vmul.f32 %v3255_v34, %v5199_v35  ;;  %v2560_v8 = vpop.xlane.xlu1 %2559 }
 0x82b   :  { %v3257_v60 = vpop.eup %3256  ;;  %3266 = vrcp.f32 %v2560_v8 }
 0x82c   :  { %2633 = vst [vmem:[#allocation16 + $0x30] sm:$0xff] %v2589_v19  ;;  %2634 = vst [vmem:[#allocation16 + $0x38] sm:$0xff] %v2590_v40  ;;  %v2586_v54 = vmul.f32 %v3257_v60, %v5203_v45  ;;  %v2587_v50 = vmul.f32 %v3257_v60, %v5208_v63  ;;  %v2557_v62 = vpop.xlane.xlu0 %2556 }
 0x82d   :  { %v3259_v38 = vpop.eup %3258  ;;  %3268 = vrcp.f32 %v2557_v62 }
 0x82e   :  { %2631 = vst [vmem:[#allocation16 + $0x20] sm:$0xff] %v2586_v54  ;;  %2632 = vst [vmem:[#allocation16 + $0x28] sm:$0xff] %v2587_v50  ;;  %v2595_v49 = vmul.f32 %v3259_v38, %v5213_v59  ;;  %v2596_v14 = vmul.f32 %v3259_v38, %v5215_v25  ;;  %v2566_v6 = vpop.xlane.xlu1 %2565 }
 0x82f   :  { %v3261_v35 = vpop.eup %3260  ;;  %3270 = vrcp.f32 %v2566_v6 }
 0x830   :  { %2637 = vst [vmem:[#allocation16 + $0x50] sm:$0xff] %v2595_v49  ;;  %2638 = vst [vmem:[#allocation16 + $0x58] sm:$0xff] %v2596_v14  ;;  %v2592_v55 = vmul.f32 %v3261_v35, %v5219_v27  ;;  %v2593_v45 = vmul.f32 %v3261_v35, %v5224_v26  ;;  %v2563_v5 = vpop.xlane.xlu0 %2562 }
 0x831   :  { %v3263_v63 = vpop.eup %3262  ;;  %3272 = vrcp.f32 %v2563_v5 }
 0x832   :  { %2635 = vst [vmem:[#allocation16 + $0x40] sm:$0xff] %v2592_v55  ;;  %2636 = vst [vmem:[#allocation16 + $0x48] sm:$0xff] %v2593_v45  ;;  %v2601_v33 = vmul.f32 %v3263_v63, %v5229_v39  ;;  %v2602_v59 = vmul.f32 %v3263_v63, %v5231_v16  ;;  %v2572_v12 = vpop.xlane.xlu1 %2571 }
 0x833   :  { %v3265_v25 = vpop.eup %3264  ;;  %3274 = vrcp.f32 %v2572_v12 }
 0x834   :  { %2641 = vst [vmem:[#allocation16 + $0x70] sm:$0xff] %v2601_v33  ;;  %2642 = vst [vmem:[#allocation16 + $0x78] sm:$0xff] %v2602_v59  ;;  %v2598_v41 = vmul.f32 %v3265_v25, %v5235_v58  ;;  %v2599_v27 = vmul.f32 %v3265_v25, %v5240_v31  ;;  %v2569_v48 = vpop.xlane.xlu0 %2568 }
 0x835   :  { %v3267_v26 = vpop.eup %3266  ;;  %3276 = vrcp.f32 %v2569_v48 }
 0x836   :  { %2639 = vst [vmem:[#allocation16 + $0x60] sm:$0xff] %v2598_v41  ;;  %2640 = vst [vmem:[#allocation16 + $0x68] sm:$0xff] %v2599_v27  ;;  %v2607_v56 = vmul.f32 %v3267_v26, %v5245_v20  ;;  %v2608_v39 = vmul.f32 %v3267_v26, %v5247_v0  ;;  %v2578_v10 = vpop.xlane.xlu1 %2577 }
 0x837   :  { %v3269_v16 = vpop.eup %3268  ;;  %3278 = vrcp.f32 %v2578_v10 }
 0x838   :  { %2645 = vst [vmem:[#allocation16 + $0x90] sm:$0xff] %v2607_v56  ;;  %2646 = vst [vmem:[#allocation16 + $0x98] sm:$0xff] %v2608_v39  ;;  %v2604_v46 = vmul.f32 %v3269_v16, %v5251_v9  ;;  %v2605_v58 = vmul.f32 %v3269_v16, %v5255_v57  ;;  %v2575_v7 = vpop.xlane.xlu0 %2574 }
 0x839   :  { %v3271_v31 = vpop.eup %3270  ;;  %3280 = vrcp.f32 %v2575_v7 }
 0x83a   :  { %2643 = vst [vmem:[#allocation16 + $0x80] sm:$0xff] %v2604_v46  ;;  %2644 = vst [vmem:[#allocation16 + $0x88] sm:$0xff] %v2605_v58  ;;  %v2613_v13 = vmul.f32 %v3271_v31, %v5257_v3  ;;  %v2614_v20 = vmul.f32 %v3271_v31, %v5261_v32 }
 0x83b   :  { %v3273_v22 = vpop.eup %3272 }
 0x83c   :  { %2649 = vst [vmem:[#allocation16 + $0xb0] sm:$0xff] %v2613_v13  ;;  %2650 = vst [vmem:[#allocation16 + $0xb8] sm:$0xff] %v2614_v20  ;;  %v2610_v0 = vmul.f32 %v3273_v22, %v5263_v2  ;;  %v2611_v1 = vmul.f32 %v3273_v22, %v5267_v17 }
 0x83d   :  { %v3275_v42 = vpop.eup %3274 }
 0x83e   :  { %2647 = vst [vmem:[#allocation16 + $0xa0] sm:$0xff] %v2610_v0  ;;  %2648 = vst [vmem:[#allocation16 + $0xa8] sm:$0xff] %v2611_v1  ;;  %v2619_v9 = vmul.f32 %v3275_v42, %v5269_v36  ;;  %v2620_v57 = vmul.f32 %v3275_v42, %v5273_v24 }
 0x83f   :  { %v3277_v29 = vpop.eup %3276 }
 0x840   :  { %2653 = vst [vmem:[#allocation16 + $0xd0] sm:$0xff] %v2619_v9  ;;  %2654 = vst [vmem:[#allocation16 + $0xd8] sm:$0xff] %v2620_v57  ;;  %v2616_v3 = vmul.f32 %v3277_v29, %v5275_v43  ;;  %v2617_v32 = vmul.f32 %v3277_v29, %v5279_v53 }
 0x841   :  { %v3279_v52 = vpop.eup %3278 }
 0x842   :  { %2651 = vst [vmem:[#allocation16 + $0xc0] sm:$0xff] %v2616_v3  ;;  %2652 = vst [vmem:[#allocation16 + $0xc8] sm:$0xff] %v2617_v32  ;;  %v2625_v2 = vmul.f32 %v3279_v52, %v5281_v51  ;;  %v2626_v17 = vmul.f32 %v3279_v52, %v5285_v11 }
 0x843   :  { %v3281_v44 = vpop.eup %3280 }
 0x844   :  { %2657 = vst [vmem:[#allocation16 + $0xf0] sm:$0xff] %v2625_v2  ;;  %2658 = vst [vmem:[#allocation16 + $0xf8] sm:$0xff] %v2626_v17  ;;  %v2622_v36 = vmul.f32 %v3281_v44, %v5287_v37  ;;  %v2623_v24 = vmul.f32 %v3281_v44, %v5291_v18 }
 0x846   :  { %2655 = vst [vmem:[#allocation16 + $0xe0] sm:$0xff] %v2622_v36  ;;  %2656 = vst [vmem:[#allocation16 + $0xe8] sm:$0xff] %v2623_v24 }
 0x847   :  { %3469 = shalt.err (!%p3466_p12)
}
 0x848   :  { %s3470_s25 = scalar_lea.hbm %s5354_s12, 4096 }
 0x849   :  { %p3471_p13 = scmp.ne.s32.totalorder %s5354_s12, %s3470_s25  ;;  %p3474_p0 = scmp.lt.u32.totalorder %s3470_s25, %s5354_s12 }
 0x84b   :  { %p3476_p1 = pnand %p3474_p0, %p3471_p13 }
 0x84d   :  { %3479 = shalt.err (!%p3476_p1)
}
 0x84e   :  { %2670 = dma.vmem_to_hbm [thread:$0]  %s2665_s0, 4096, %s5354_s12, [#allocation4], %s3500_s9, %s3500_s9, %s3501_s15  }
 0x84f   :  { %3490 = dma.done.wait [#allocation4], 4096  }
 0x850   :  { %3491 = vsyncadd [#allocation4], 4294963200 }
 0x851   :  { %2674 = vsyncpa [#allocation3], 1 }
 0x852   :  { %2675 = vsyncpa [#allocation6], 1 }
 0x853   :  { %2676 = vsyncpa [#allocation9], 1 }
 0x854   :  { %2677 = vsyncpa [#allocation12], 1 }
 0x855   :  { %2678 = vsyncpa [#allocation15], 1 }
 0x856   :  { %2679 = vsyncpa [#allocation4], 1 }

</bundles_post_ra>
